<compile_context>
chip_gen: v6e
topology: v6e:2x2x1
jax: 0.10.0
libtpu: 0.0.40
codegen_flags: <defaults>
</compile_context>

<pallas_src>
import jax
import jax.numpy as jnp
import numpy as np
from jax.experimental import pallas as pl
from jax.experimental.pallas import tpu as pltpu


def gru_fused_kernel(x_ref,        # (S, B, I)   time-major input
                     wih0_ref,     # (3, I, H)   layer-0 input weights, gate-split, pre-transposed
                     bih0_ref,     # (3, 1, H)
                     whh0_ref,     # (3, H, H)   layer-0 hidden weights, gate-split, pre-transposed
                     bhh0_ref,     # (3, 1, H)
                     w1rz_ref,     # (2, 2H, H)  layer-1 fused [W_ih; W_hh] for r,z gates
                     b1rz_ref,     # (2, 1, H)   layer-1 (b_ih + b_hh) for r,z
                     wih1n_ref,    # (H, H)      layer-1 n-gate input weight
                     bih1n_ref,    # (1, H)
                     whh1n_ref,    # (H, H)      layer-1 n-gate hidden weight
                     bhh1n_ref,    # (1, H)
                     fcw_ref,      # (H, 1)
                     fcb_ref,      # (1, 1)      SMEM scalar
                     out_ref,      # (S, B, 1)   time-major output
                     xr_ref, xz_ref, xn_ref,     # (S, B, H) scratch: layer-0 input projections
                     h2seq_ref):   # (S, B, H)   scratch: layer-1 hidden sequence
    S, B, I = x_ref.shape
    H = whh0_ref.shape[2]

    # ---- Layer-0 input projections: one batched matmul per gate, OUTSIDE the
    # time loop, stored time-major so per-step reads are pure address offsets.
    x2d = x_ref[...].reshape(S * B, I)
    xr_ref[...] = (jnp.dot(x2d, wih0_ref[0], preferred_element_type=jnp.float32)
                   + bih0_ref[0]).reshape(S, B, H)
    xz_ref[...] = (jnp.dot(x2d, wih0_ref[1], preferred_element_type=jnp.float32)
                   + bih0_ref[1]).reshape(S, B, H)
    xn_ref[...] = (jnp.dot(x2d, wih0_ref[2], preferred_element_type=jnp.float32)
                   + bih0_ref[2]).reshape(S, B, H)

    # ---- Hoisted weight loads and bias broadcasts (done once, not per step).
    whh0_r, whh0_z, whh0_n = whh0_ref[0], whh0_ref[1], whh0_ref[2]
    w1_r, w1_z = w1rz_ref[0], w1rz_ref[1]
    wih1_n = wih1n_ref[...]
    whh1_n = whh1n_ref[...]

    bhh0_r = jnp.broadcast_to(bhh0_ref[0], (B, H))
    bhh0_z = jnp.broadcast_to(bhh0_ref[1], (B, H))
    bhh0_n = jnp.broadcast_to(bhh0_ref[2], (B, H))
    b1_r = jnp.broadcast_to(b1rz_ref[0], (B, H))
    b1_z = jnp.broadcast_to(b1rz_ref[1], (B, H))
    bih1_n = jnp.broadcast_to(bih1n_ref[...], (B, H))
    bhh1_n = jnp.broadcast_to(bhh1n_ref[...], (B, H))

    def step(t, carry):
        h1, h2 = carry

        # ---------- GRU layer 0 (PyTorch gate order r, z, n) ----------
        gr0 = xr_ref[t] + jnp.dot(h1, whh0_r, preferred_element_type=jnp.float32) + bhh0_r
        gz0 = xz_ref[t] + jnp.dot(h1, whh0_z, preferred_element_type=jnp.float32) + bhh0_z
        ghn0 = jnp.dot(h1, whh0_n, preferred_element_type=jnp.float32) + bhh0_n
        r0 = jax.nn.sigmoid(gr0)
        z0 = jax.nn.sigmoid(gz0)
        n0 = jnp.tanh(xn_ref[t] + r0 * ghn0)
        h1n = (1.0 - z0) * n0 + z0 * h1

        # ---------- GRU layer 1, fused into the same time step ----------
        # r/z: one matmul on [h1_t, h2_{t-1}] against stacked [W_ih; W_hh].
        cat = jnp.concatenate([h1n, h2], axis=1)                       # (B, 2H)
        r1 = jax.nn.sigmoid(
            jnp.dot(cat, w1_r, preferred_element_type=jnp.float32) + b1_r)
        z1 = jax.nn.sigmoid(
            jnp.dot(cat, w1_z, preferred_element_type=jnp.float32) + b1_z)
        # n gate: hidden projection kept separate because r multiplies it.
        gi1n = jnp.dot(h1n, wih1_n, preferred_element_type=jnp.float32) + bih1_n
        gh1n = jnp.dot(h2, whh1_n, preferred_element_type=jnp.float32) + bhh1_n
        n1 = jnp.tanh(gi1n + r1 * gh1n)
        h2n = (1.0 - z1) * n1 + z1 * h2

        h2seq_ref[t] = h2n       # leading-axis store: pure address offset
        return (h1n, h2n)

    h0 = jnp.zeros((B, H), jnp.float32)
    # S is small & static -> fully unroll for scheduler visibility.
    jax.lax.fori_loop(0, S, step, (h0, h0), unroll=True)

    # ---- ReLU + Linear(H -> 1) head: one batched matmul after the loop ----
    act = jnp.maximum(h2seq_ref[...], 0.0).reshape(S * B, H)
    y = (jnp.dot(act, fcw_ref[...], preferred_element_type=jnp.float32)
         + fcb_ref[0, 0])
    out_ref[...] = y.reshape(S, B, 1)


def prepare_params(p, hidden_size):
    """Host-side layout plumbing: transpose, gate-split, and fuse weights."""
    H = hidden_size

    def gate_w(w):   # (3H, D) -> [(D, H)] * 3, pre-transposed
        return [jnp.transpose(w[g * H:(g + 1) * H, :]) for g in range(3)]

    def gate_b(b):   # (3H,) -> [(1, H)] * 3
        return [b[g * H:(g + 1) * H].reshape(1, H) for g in range(3)]

    wih0 = jnp.stack(gate_w(p["wih0"]))    # (3, I, H)
    bih0 = jnp.stack(gate_b(p["bih0"]))    # (3, 1, H)
    whh0 = jnp.stack(gate_w(p["whh0"]))    # (3, H, H)
    bhh0 = jnp.stack(gate_b(p["bhh0"]))    # (3, 1, H)

    wih1 = gate_w(p["wih1"])
    whh1 = gate_w(p["whh1"])
    bih1 = gate_b(p["bih1"])
    bhh1 = gate_b(p["bhh1"])

    # Layer-1 r/z gates: fuse input+hidden projection into one (2H, H) weight.
    w1rz = jnp.stack([jnp.concatenate([wih1[0], whh1[0]], axis=0),
                      jnp.concatenate([wih1[1], whh1[1]], axis=0)])   # (2, 2H, H)
    b1rz = jnp.stack([bih1[0] + bhh1[0], bih1[1] + bhh1[1]])          # (2, 1, H)

    fcw_t = jnp.transpose(p["fcw"])        # (H, 1)
    fcb = p["fcb"].reshape(1, 1)

    return (wih0, bih0, whh0, bhh0, w1rz, b1rz,
            wih1[2], bih1[2], whh1[2], bhh1[2], fcw_t, fcb)


def gru_forward(x, params):
    B, S, _ = x.shape
    H = params["whh0"].shape[1]
    prepped = prepare_params(params, H)
    x_tm = jnp.transpose(x, (1, 0, 2)).astype(jnp.float32)   # time-major (S, B, I)

    # All tensors in VMEM except the scalar fc bias (SMEM).
    in_specs = ([pl.BlockSpec(memory_space=pltpu.MemorySpace.VMEM)] * (len(prepped))
                + [pl.BlockSpec(memory_space=pltpu.MemorySpace.SMEM)])
    # (1 input for x + 11 VMEM params, then fcb in SMEM)

    # NOTE: gridless single invocation is appropriate at these toy shapes; for
    # large B, add a batch-tile grid axis with dimension_semantics=("parallel",)
    # so both v7x TensorCores are used.
    out_tm = pl.pallas_call(
        gru_fused_kernel,
        out_shape=jax.ShapeDtypeStruct((S, B, 1), jnp.float32),
        in_specs=in_specs,
        out_specs=pl.BlockSpec(memory_space=pltpu.MemorySpace.VMEM),
        scratch_shapes=[
            pltpu.VMEM((S, B, H), jnp.float32),  # layer-0 x-proj, r gate
            pltpu.VMEM((S, B, H), jnp.float32),  # layer-0 x-proj, z gate
            pltpu.VMEM((S, B, H), jnp.float32),  # layer-0 x-proj, n gate
            pltpu.VMEM((S, B, H), jnp.float32),  # layer-1 hidden sequence
        ],
    )(x_tm, *prepped)
    return jnp.transpose(out_tm, (1, 0, 2))   # back to batch-first (B, S, 1)


def gru_forward_ref(x, params):
    """Pure-JAX reference matching torch.nn.GRU(num_layers=2) + ReLU + Linear."""
    def layer(x_bsd, w_ih, w_hh, b_ih, b_hh):
        B, S, _ = x_bsd.shape
        H = w_hh.shape[1]

        def step(h, x_t):
            gi = x_t @ w_ih.T + b_ih
            gh = h @ w_hh.T + b_hh
            r = jax.nn.sigmoid(gi[:, :H] + gh[:, :H])
            z = jax.nn.sigmoid(gi[:, H:2 * H] + gh[:, H:2 * H])
            n = jnp.tanh(gi[:, 2 * H:] + r * gh[:, 2 * H:])
            h_new = (1.0 - z) * n + z * h
            return h_new, h_new

        h0 = jnp.zeros((B, H), jnp.float32)
        _, hs = jax.lax.scan(step, h0, jnp.swapaxes(x_bsd, 0, 1))
        return jnp.swapaxes(hs, 0, 1)

    h1 = layer(x, params["wih0"], params["whh0"], params["bih0"], params["bhh0"])
    h2 = layer(h1, params["wih1"], params["whh1"], params["bih1"], params["bhh1"])
    return jnp.maximum(h2, 0.0) @ params["fcw"].T + params["fcb"]


def init_params(key, input_size, hidden_size, output_size):
    """PyTorch-layout params, uniform(-1/sqrt(H), 1/sqrt(H)) init."""
    H = hidden_size
    bound = 1.0 / np.sqrt(H)
    keys = jax.random.split(key, 10)

    def u(k, shape):
        return jax.random.uniform(k, shape, jnp.float32, -bound, bound)

    return {
        "wih0": u(keys[0], (3 * H, input_size)),
        "whh0": u(keys[1], (3 * H, H)),
        "bih0": u(keys[2], (3 * H,)),
        "bhh0": u(keys[3], (3 * H,)),
        "wih1": u(keys[4], (3 * H, H)),
        "whh1": u(keys[5], (3 * H, H)),
        "bih1": u(keys[6], (3 * H,)),
        "bhh1": u(keys[7], (3 * H,)),
        "fcw":  u(keys[8], (output_size, H)),
        "fcb":  u(keys[9], (output_size,)),
    }


if __name__ == "__main__":
    # Shapes per the module: window_size=input_size=50, hidden=64, output=1;
    # small batch/seq for the test.
    batch, seq = 2, 8
    input_size, hidden_size, output_size = 50, 64, 1

    key = jax.random.PRNGKey(0)
    k_x, k_p = jax.random.split(key)
    x = jax.random.normal(k_x, (batch, seq, input_size), jnp.float32)
    params = init_params(k_p, input_size, hidden_size, output_size)

    out = jax.block_until_ready(gru_forward(x, params))
    ref = jax.block_until_ready(gru_forward_ref(x, params))

    assert out.shape == (batch, seq, output_size)
    np.testing.assert_allclose(np.asarray(out), np.asarray(ref),
                               rtol=1e-4, atol=1e-4)

    print("KERNEL_OK")
</pallas_src>

<mosaic_0001>
module attributes {stable_mosaic.version = 11 : i64} {
  func.func @gru_fused_kernel(%arg0: memref<8x2x50xf32, #tpu.memory_space<vmem>>, %arg1: memref<3x50x64xf32, #tpu.memory_space<vmem>>, %arg2: memref<3x1x64xf32, #tpu.memory_space<vmem>>, %arg3: memref<3x64x64xf32, #tpu.memory_space<vmem>>, %arg4: memref<3x1x64xf32, #tpu.memory_space<vmem>>, %arg5: memref<2x128x64xf32, #tpu.memory_space<vmem>>, %arg6: memref<2x1x64xf32, #tpu.memory_space<vmem>>, %arg7: memref<64x64xf32, #tpu.memory_space<vmem>>, %arg8: memref<1x64xf32, #tpu.memory_space<vmem>>, %arg9: memref<64x64xf32, #tpu.memory_space<vmem>>, %arg10: memref<1x64xf32, #tpu.memory_space<vmem>>, %arg11: memref<64x1xf32, #tpu.memory_space<vmem>>, %arg12: memref<1x1xf32, #tpu.memory_space<smem>>, %arg13: memref<8x2x1xf32, #tpu.memory_space<vmem>>, %arg14: memref<8x2x64xf32, #tpu.memory_space<vmem>>, %arg15: memref<8x2x64xf32, #tpu.memory_space<vmem>>, %arg16: memref<8x2x64xf32, #tpu.memory_space<vmem>>, %arg17: memref<8x2x64xf32, #tpu.memory_space<vmem>>) attributes {dimension_semantics = [], scalar_prefetch = 0 : i64, scratch_operands = 4 : i64, tpu.core_type = #tpu.core_type<tc>} {
    %c0 = arith.constant 0 : index
    %c0_0 = arith.constant 0 : index
    %c0_1 = arith.constant 0 : index
    %0 = vector.load %arg0[%c0, %c0_0, %c0_1] : memref<8x2x50xf32, #tpu.memory_space<vmem>>, vector<8x2x50xf32>
    %1 = vector.shape_cast %0 : vector<8x2x50xf32> to vector<16x50xf32>
    %c0_2 = arith.constant 0 : index
    %c0_3 = arith.constant 0 : index
    %c0_4 = arith.constant 0 : index
    %2 = vector.load %arg1[%c0_2, %c0_3, %c0_4] : memref<3x50x64xf32, #tpu.memory_space<vmem>>, vector<1x50x64xf32>
    %3 = vector.shape_cast %2 : vector<1x50x64xf32> to vector<50x64xf32>
    %cst = arith.constant dense<0.000000e+00> : vector<16x64xf32>
    %4 = tpu.matmul %1, %3, %cst {dimension_numbers = #tpu.dot_dimension_numbers<[1], [0], [0], [1], [0, 0, 1, 1], [], []>} : vector<16x50xf32>, vector<50x64xf32>, vector<16x64xf32> -> vector<16x64xf32>
    %c0_5 = arith.constant 0 : index
    %c0_6 = arith.constant 0 : index
    %c0_7 = arith.constant 0 : index
    %5 = vector.load %arg2[%c0_5, %c0_6, %c0_7] : memref<3x1x64xf32, #tpu.memory_space<vmem>>, vector<1x1x64xf32>
    %6 = vector.shape_cast %5 : vector<1x1x64xf32> to vector<1x64xf32>
    %7 = vector.broadcast %6 : vector<1x64xf32> to vector<16x64xf32>
    %8 = arith.addf %4, %7 : vector<16x64xf32>
    %9 = vector.shape_cast %8 : vector<16x64xf32> to vector<8x2x64xf32>
    %c0_8 = arith.constant 0 : index
    %c0_9 = arith.constant 0 : index
    %c0_10 = arith.constant 0 : index
    %10 = vector.load %arg14[%c0_8, %c0_9, %c0_10] : memref<8x2x64xf32, #tpu.memory_space<vmem>>, vector<8x2x64xf32>
    tpu.vector_store %arg14[%c0_8, %c0_9, %c0_10], %9 {strides = array<i32>} : memref<8x2x64xf32, #tpu.memory_space<vmem>>, vector<8x2x64xf32>,
    %c1 = arith.constant 1 : index
    %c0_11 = arith.constant 0 : index
    %c0_12 = arith.constant 0 : index
    %11 = vector.load %arg1[%c1, %c0_11, %c0_12] : memref<3x50x64xf32, #tpu.memory_space<vmem>>, vector<1x50x64xf32>
    %12 = vector.shape_cast %11 : vector<1x50x64xf32> to vector<50x64xf32>
    %cst_13 = arith.constant dense<0.000000e+00> : vector<16x64xf32>
    %13 = tpu.matmul %1, %12, %cst_13 {dimension_numbers = #tpu.dot_dimension_numbers<[1], [0], [0], [1], [0, 0, 1, 1], [], []>} : vector<16x50xf32>, vector<50x64xf32>, vector<16x64xf32> -> vector<16x64xf32>
    %c1_14 = arith.constant 1 : index
    %c0_15 = arith.constant 0 : index
    %c0_16 = arith.constant 0 : index
    %14 = vector.load %arg2[%c1_14, %c0_15, %c0_16] : memref<3x1x64xf32, #tpu.memory_space<vmem>>, vector<1x1x64xf32>
    %15 = vector.shape_cast %14 : vector<1x1x64xf32> to vector<1x64xf32>
    %16 = vector.broadcast %15 : vector<1x64xf32> to vector<16x64xf32>
    %17 = arith.addf %13, %16 : vector<16x64xf32>
    %18 = vector.shape_cast %17 : vector<16x64xf32> to vector<8x2x64xf32>
    %c0_17 = arith.constant 0 : index
    %c0_18 = arith.constant 0 : index
    %c0_19 = arith.constant 0 : index
    %19 = vector.load %arg15[%c0_17, %c0_18, %c0_19] : memref<8x2x64xf32, #tpu.memory_space<vmem>>, vector<8x2x64xf32>
    tpu.vector_store %arg15[%c0_17, %c0_18, %c0_19], %18 {strides = array<i32>} : memref<8x2x64xf32, #tpu.memory_space<vmem>>, vector<8x2x64xf32>,
    %c2 = arith.constant 2 : index
    %c0_20 = arith.constant 0 : index
    %c0_21 = arith.constant 0 : index
    %20 = vector.load %arg1[%c2, %c0_20, %c0_21] : memref<3x50x64xf32, #tpu.memory_space<vmem>>, vector<1x50x64xf32>
    %21 = vector.shape_cast %20 : vector<1x50x64xf32> to vector<50x64xf32>
    %cst_22 = arith.constant dense<0.000000e+00> : vector<16x64xf32>
    %22 = tpu.matmul %1, %21, %cst_22 {dimension_numbers = #tpu.dot_dimension_numbers<[1], [0], [0], [1], [0, 0, 1, 1], [], []>} : vector<16x50xf32>, vector<50x64xf32>, vector<16x64xf32> -> vector<16x64xf32>
    %c2_23 = arith.constant 2 : index
    %c0_24 = arith.constant 0 : index
    %c0_25 = arith.constant 0 : index
    %23 = vector.load %arg2[%c2_23, %c0_24, %c0_25] : memref<3x1x64xf32, #tpu.memory_space<vmem>>, vector<1x1x64xf32>
    %24 = vector.shape_cast %23 : vector<1x1x64xf32> to vector<1x64xf32>
    %25 = vector.broadcast %24 : vector<1x64xf32> to vector<16x64xf32>
    %26 = arith.addf %22, %25 : vector<16x64xf32>
    %27 = vector.shape_cast %26 : vector<16x64xf32> to vector<8x2x64xf32>
    %c0_26 = arith.constant 0 : index
    %c0_27 = arith.constant 0 : index
    %c0_28 = arith.constant 0 : index
    %28 = vector.load %arg16[%c0_26, %c0_27, %c0_28] : memref<8x2x64xf32, #tpu.memory_space<vmem>>, vector<8x2x64xf32>
    tpu.vector_store %arg16[%c0_26, %c0_27, %c0_28], %27 {strides = array<i32>} : memref<8x2x64xf32, #tpu.memory_space<vmem>>, vector<8x2x64xf32>,
    %c0_29 = arith.constant 0 : index
    %c0_30 = arith.constant 0 : index
    %c0_31 = arith.constant 0 : index
    %29 = vector.load %arg3[%c0_29, %c0_30, %c0_31] : memref<3x64x64xf32, #tpu.memory_space<vmem>>, vector<1x64x64xf32>
    %30 = vector.shape_cast %29 : vector<1x64x64xf32> to vector<64x64xf32>
    %c1_32 = arith.constant 1 : index
    %c0_33 = arith.constant 0 : index
    %c0_34 = arith.constant 0 : index
    %31 = vector.load %arg3[%c1_32, %c0_33, %c0_34] : memref<3x64x64xf32, #tpu.memory_space<vmem>>, vector<1x64x64xf32>
    %32 = vector.shape_cast %31 : vector<1x64x64xf32> to vector<64x64xf32>
    %c2_35 = arith.constant 2 : index
    %c0_36 = arith.constant 0 : index
    %c0_37 = arith.constant 0 : index
    %33 = vector.load %arg3[%c2_35, %c0_36, %c0_37] : memref<3x64x64xf32, #tpu.memory_space<vmem>>, vector<1x64x64xf32>
    %34 = vector.shape_cast %33 : vector<1x64x64xf32> to vector<64x64xf32>
    %c0_38 = arith.constant 0 : index
    %c0_39 = arith.constant 0 : index
    %c0_40 = arith.constant 0 : index
    %35 = vector.load %arg5[%c0_38, %c0_39, %c0_40] : memref<2x128x64xf32, #tpu.memory_space<vmem>>, vector<1x128x64xf32>
    %36 = vector.shape_cast %35 : vector<1x128x64xf32> to vector<128x64xf32>
    %c1_41 = arith.constant 1 : index
    %c0_42 = arith.constant 0 : index
    %c0_43 = arith.constant 0 : index
    %37 = vector.load %arg5[%c1_41, %c0_42, %c0_43] : memref<2x128x64xf32, #tpu.memory_space<vmem>>, vector<1x128x64xf32>
    %38 = vector.shape_cast %37 : vector<1x128x64xf32> to vector<128x64xf32>
    %c0_44 = arith.constant 0 : index
    %c0_45 = arith.constant 0 : index
    %39 = vector.load %arg7[%c0_44, %c0_45] : memref<64x64xf32, #tpu.memory_space<vmem>>, vector<64x64xf32>
    %c0_46 = arith.constant 0 : index
    %c0_47 = arith.constant 0 : index
    %40 = vector.load %arg9[%c0_46, %c0_47] : memref<64x64xf32, #tpu.memory_space<vmem>>, vector<64x64xf32>
    %c0_48 = arith.constant 0 : index
    %c0_49 = arith.constant 0 : index
    %c0_50 = arith.constant 0 : index
    %41 = vector.load %arg4[%c0_48, %c0_49, %c0_50] : memref<3x1x64xf32, #tpu.memory_space<vmem>>, vector<1x1x64xf32>
    %42 = vector.shape_cast %41 : vector<1x1x64xf32> to vector<1x64xf32>
    %43 = vector.shape_cast %42 : vector<1x64xf32> to vector<1x64xf32>
    %44 = vector.broadcast %43 : vector<1x64xf32> to vector<2x64xf32>
    %c1_51 = arith.constant 1 : index
    %c0_52 = arith.constant 0 : index
    %c0_53 = arith.constant 0 : index
    %45 = vector.load %arg4[%c1_51, %c0_52, %c0_53] : memref<3x1x64xf32, #tpu.memory_space<vmem>>, vector<1x1x64xf32>
    %46 = vector.shape_cast %45 : vector<1x1x64xf32> to vector<1x64xf32>
    %47 = vector.shape_cast %46 : vector<1x64xf32> to vector<1x64xf32>
    %48 = vector.broadcast %47 : vector<1x64xf32> to vector<2x64xf32>
    %c2_54 = arith.constant 2 : index
    %c0_55 = arith.constant 0 : index
    %c0_56 = arith.constant 0 : index
    %49 = vector.load %arg4[%c2_54, %c0_55, %c0_56] : memref<3x1x64xf32, #tpu.memory_space<vmem>>, vector<1x1x64xf32>
    %50 = vector.shape_cast %49 : vector<1x1x64xf32> to vector<1x64xf32>
    %51 = vector.shape_cast %50 : vector<1x64xf32> to vector<1x64xf32>
    %52 = vector.broadcast %51 : vector<1x64xf32> to vector<2x64xf32>
    %c0_57 = arith.constant 0 : index
    %c0_58 = arith.constant 0 : index
    %c0_59 = arith.constant 0 : index
    %53 = vector.load %arg6[%c0_57, %c0_58, %c0_59] : memref<2x1x64xf32, #tpu.memory_space<vmem>>, vector<1x1x64xf32>
    %54 = vector.shape_cast %53 : vector<1x1x64xf32> to vector<1x64xf32>
    %55 = vector.shape_cast %54 : vector<1x64xf32> to vector<1x64xf32>
    %56 = vector.broadcast %55 : vector<1x64xf32> to vector<2x64xf32>
    %c1_60 = arith.constant 1 : index
    %c0_61 = arith.constant 0 : index
    %c0_62 = arith.constant 0 : index
    %57 = vector.load %arg6[%c1_60, %c0_61, %c0_62] : memref<2x1x64xf32, #tpu.memory_space<vmem>>, vector<1x1x64xf32>
    %58 = vector.shape_cast %57 : vector<1x1x64xf32> to vector<1x64xf32>
    %59 = vector.shape_cast %58 : vector<1x64xf32> to vector<1x64xf32>
    %60 = vector.broadcast %59 : vector<1x64xf32> to vector<2x64xf32>
    %c0_63 = arith.constant 0 : index
    %c0_64 = arith.constant 0 : index
    %61 = vector.load %arg8[%c0_63, %c0_64] : memref<1x64xf32, #tpu.memory_space<vmem>>, vector<1x64xf32>
    %62 = vector.shape_cast %61 : vector<1x64xf32> to vector<1x64xf32>
    %63 = vector.broadcast %62 : vector<1x64xf32> to vector<2x64xf32>
    %c0_65 = arith.constant 0 : index
    %c0_66 = arith.constant 0 : index
    %64 = vector.load %arg10[%c0_65, %c0_66] : memref<1x64xf32, #tpu.memory_space<vmem>>, vector<1x64xf32>
    %65 = vector.shape_cast %64 : vector<1x64xf32> to vector<1x64xf32>
    %66 = vector.broadcast %65 : vector<1x64xf32> to vector<2x64xf32>
    %cst_67 = arith.constant 0.000000e+00 : f32
    %67 = vector.broadcast %cst_67 : f32 to vector<2x64xf32>
    %c0_i32 = arith.constant 0 : i32
    %68 = arith.index_cast %c0_i32 : i32 to index
    %c0_68 = arith.constant 0 : index
    %c0_69 = arith.constant 0 : index
    %69 = vector.load %arg14[%68, %c0_68, %c0_69] : memref<8x2x64xf32, #tpu.memory_space<vmem>>, vector<1x2x64xf32>
    %70 = vector.shape_cast %69 : vector<1x2x64xf32> to vector<2x64xf32>
    %cst_70 = arith.constant dense<0.000000e+00> : vector<2x64xf32>
    %71 = tpu.matmul %67, %30, %cst_70 {dimension_numbers = #tpu.dot_dimension_numbers<[1], [0], [0], [1], [0, 0, 1, 1], [], []>} : vector<2x64xf32>, vector<64x64xf32>, vector<2x64xf32> -> vector<2x64xf32>
    %72 = arith.addf %70, %71 : vector<2x64xf32>
    %73 = arith.addf %72, %44 : vector<2x64xf32>
    %74 = arith.index_cast %c0_i32 : i32 to index
    %c0_71 = arith.constant 0 : index
    %c0_72 = arith.constant 0 : index
    %75 = vector.load %arg15[%74, %c0_71, %c0_72] : memref<8x2x64xf32, #tpu.memory_space<vmem>>, vector<1x2x64xf32>
    %76 = vector.shape_cast %75 : vector<1x2x64xf32> to vector<2x64xf32>
    %cst_73 = arith.constant dense<0.000000e+00> : vector<2x64xf32>
    %77 = tpu.matmul %67, %32, %cst_73 {dimension_numbers = #tpu.dot_dimension_numbers<[1], [0], [0], [1], [0, 0, 1, 1], [], []>} : vector<2x64xf32>, vector<64x64xf32>, vector<2x64xf32> -> vector<2x64xf32>
    %78 = arith.addf %76, %77 : vector<2x64xf32>
    %79 = arith.addf %78, %48 : vector<2x64xf32>
    %cst_74 = arith.constant dense<0.000000e+00> : vector<2x64xf32>
    %80 = tpu.matmul %67, %34, %cst_74 {dimension_numbers = #tpu.dot_dimension_numbers<[1], [0], [0], [1], [0, 0, 1, 1], [], []>} : vector<2x64xf32>, vector<64x64xf32>, vector<2x64xf32> -> vector<2x64xf32>
    %81 = arith.addf %80, %52 : vector<2x64xf32>
    %82 = arith.negf %73 : vector<2x64xf32>
    %83 = math.exp %82 : vector<2x64xf32>
    %cst_75 = arith.constant 1.000000e+00 : f32
    %84 = vector.broadcast %cst_75 : f32 to vector<2x64xf32>
    %85 = arith.addf %84, %83 : vector<2x64xf32>
    %86 = arith.divf %84, %85 : vector<2x64xf32>
    %87 = arith.negf %79 : vector<2x64xf32>
    %88 = math.exp %87 : vector<2x64xf32>
    %cst_76 = arith.constant 1.000000e+00 : f32
    %89 = vector.broadcast %cst_76 : f32 to vector<2x64xf32>
    %90 = arith.addf %89, %88 : vector<2x64xf32>
    %91 = arith.divf %89, %90 : vector<2x64xf32>
    %92 = arith.index_cast %c0_i32 : i32 to index
    %c0_77 = arith.constant 0 : index
    %c0_78 = arith.constant 0 : index
    %93 = vector.load %arg16[%92, %c0_77, %c0_78] : memref<8x2x64xf32, #tpu.memory_space<vmem>>, vector<1x2x64xf32>
    %94 = vector.shape_cast %93 : vector<1x2x64xf32> to vector<2x64xf32>
    %95 = arith.mulf %86, %81 : vector<2x64xf32>
    %96 = arith.addf %94, %95 : vector<2x64xf32>
    %97 = math.tanh %96 : vector<2x64xf32>
    %cst_79 = arith.constant 1.000000e+00 : f32
    %98 = vector.broadcast %cst_79 : f32 to vector<2x64xf32>
    %99 = arith.subf %98, %91 : vector<2x64xf32>
    %100 = arith.mulf %99, %97 : vector<2x64xf32>
    %101 = arith.mulf %91, %67 : vector<2x64xf32>
    %102 = arith.addf %100, %101 : vector<2x64xf32>
    %103 = tpu.concatenate %102, %67 in 1 : vector<2x64xf32>, vector<2x64xf32> -> vector<2x128xf32>
    %cst_80 = arith.constant dense<0.000000e+00> : vector<2x64xf32>
    %104 = tpu.matmul %103, %36, %cst_80 {dimension_numbers = #tpu.dot_dimension_numbers<[1], [0], [0], [1], [0, 0, 1, 1], [], []>} : vector<2x128xf32>, vector<128x64xf32>, vector<2x64xf32> -> vector<2x64xf32>
    %105 = arith.addf %104, %56 : vector<2x64xf32>
    %106 = arith.negf %105 : vector<2x64xf32>
    %107 = math.exp %106 : vector<2x64xf32>
    %cst_81 = arith.constant 1.000000e+00 : f32
    %108 = vector.broadcast %cst_81 : f32 to vector<2x64xf32>
    %109 = arith.addf %108, %107 : vector<2x64xf32>
    %110 = arith.divf %108, %109 : vector<2x64xf32>
    %cst_82 = arith.constant dense<0.000000e+00> : vector<2x64xf32>
    %111 = tpu.matmul %103, %38, %cst_82 {dimension_numbers = #tpu.dot_dimension_numbers<[1], [0], [0], [1], [0, 0, 1, 1], [], []>} : vector<2x128xf32>, vector<128x64xf32>, vector<2x64xf32> -> vector<2x64xf32>
    %112 = arith.addf %111, %60 : vector<2x64xf32>
    %113 = arith.negf %112 : vector<2x64xf32>
    %114 = math.exp %113 : vector<2x64xf32>
    %cst_83 = arith.constant 1.000000e+00 : f32
    %115 = vector.broadcast %cst_83 : f32 to vector<2x64xf32>
    %116 = arith.addf %115, %114 : vector<2x64xf32>
    %117 = arith.divf %115, %116 : vector<2x64xf32>
    %cst_84 = arith.constant dense<0.000000e+00> : vector<2x64xf32>
    %118 = tpu.matmul %102, %39, %cst_84 {dimension_numbers = #tpu.dot_dimension_numbers<[1], [0], [0], [1], [0, 0, 1, 1], [], []>} : vector<2x64xf32>, vector<64x64xf32>, vector<2x64xf32> -> vector<2x64xf32>
    %119 = arith.addf %118, %63 : vector<2x64xf32>
    %cst_85 = arith.constant dense<0.000000e+00> : vector<2x64xf32>
    %120 = tpu.matmul %67, %40, %cst_85 {dimension_numbers = #tpu.dot_dimension_numbers<[1], [0], [0], [1], [0, 0, 1, 1], [], []>} : vector<2x64xf32>, vector<64x64xf32>, vector<2x64xf32> -> vector<2x64xf32>
    %121 = arith.addf %120, %66 : vector<2x64xf32>
    %122 = arith.mulf %110, %121 : vector<2x64xf32>
    %123 = arith.addf %119, %122 : vector<2x64xf32>
    %124 = math.tanh %123 : vector<2x64xf32>
    %cst_86 = arith.constant 1.000000e+00 : f32
    %125 = vector.broadcast %cst_86 : f32 to vector<2x64xf32>
    %126 = arith.subf %125, %117 : vector<2x64xf32>
    %127 = arith.mulf %126, %124 : vector<2x64xf32>
    %128 = arith.mulf %117, %67 : vector<2x64xf32>
    %129 = arith.addf %127, %128 : vector<2x64xf32>
    %130 = arith.index_cast %c0_i32 : i32 to index
    %c0_87 = arith.constant 0 : index
    %c0_88 = arith.constant 0 : index
    %131 = vector.load %arg17[%130, %c0_87, %c0_88] : memref<8x2x64xf32, #tpu.memory_space<vmem>>, vector<1x2x64xf32>
    %132 = vector.shape_cast %131 : vector<1x2x64xf32> to vector<2x64xf32>
    %133 = vector.shape_cast %129 : vector<2x64xf32> to vector<1x2x64xf32>
    tpu.vector_store %arg17[%130, %c0_87, %c0_88], %133 {strides = array<i32>} : memref<8x2x64xf32, #tpu.memory_space<vmem>>, vector<1x2x64xf32>,
    %c1_i32 = arith.constant 1 : i32
    %134 = arith.index_cast %c1_i32 : i32 to index
    %c0_89 = arith.constant 0 : index
    %c0_90 = arith.constant 0 : index
    %135 = vector.load %arg14[%134, %c0_89, %c0_90] : memref<8x2x64xf32, #tpu.memory_space<vmem>>, vector<1x2x64xf32>
    %136 = vector.shape_cast %135 : vector<1x2x64xf32> to vector<2x64xf32>
    %cst_91 = arith.constant dense<0.000000e+00> : vector<2x64xf32>
    %137 = tpu.matmul %102, %30, %cst_91 {dimension_numbers = #tpu.dot_dimension_numbers<[1], [0], [0], [1], [0, 0, 1, 1], [], []>} : vector<2x64xf32>, vector<64x64xf32>, vector<2x64xf32> -> vector<2x64xf32>
    %138 = arith.addf %136, %137 : vector<2x64xf32>
    %139 = arith.addf %138, %44 : vector<2x64xf32>
    %140 = arith.index_cast %c1_i32 : i32 to index
    %c0_92 = arith.constant 0 : index
    %c0_93 = arith.constant 0 : index
    %141 = vector.load %arg15[%140, %c0_92, %c0_93] : memref<8x2x64xf32, #tpu.memory_space<vmem>>, vector<1x2x64xf32>
    %142 = vector.shape_cast %141 : vector<1x2x64xf32> to vector<2x64xf32>
    %cst_94 = arith.constant dense<0.000000e+00> : vector<2x64xf32>
    %143 = tpu.matmul %102, %32, %cst_94 {dimension_numbers = #tpu.dot_dimension_numbers<[1], [0], [0], [1], [0, 0, 1, 1], [], []>} : vector<2x64xf32>, vector<64x64xf32>, vector<2x64xf32> -> vector<2x64xf32>
    %144 = arith.addf %142, %143 : vector<2x64xf32>
    %145 = arith.addf %144, %48 : vector<2x64xf32>
    %cst_95 = arith.constant dense<0.000000e+00> : vector<2x64xf32>
    %146 = tpu.matmul %102, %34, %cst_95 {dimension_numbers = #tpu.dot_dimension_numbers<[1], [0], [0], [1], [0, 0, 1, 1], [], []>} : vector<2x64xf32>, vector<64x64xf32>, vector<2x64xf32> -> vector<2x64xf32>
    %147 = arith.addf %146, %52 : vector<2x64xf32>
    %148 = arith.negf %139 : vector<2x64xf32>
    %149 = math.exp %148 : vector<2x64xf32>
    %cst_96 = arith.constant 1.000000e+00 : f32
    %150 = vector.broadcast %cst_96 : f32 to vector<2x64xf32>
    %151 = arith.addf %150, %149 : vector<2x64xf32>
    %152 = arith.divf %150, %151 : vector<2x64xf32>
    %153 = arith.negf %145 : vector<2x64xf32>
    %154 = math.exp %153 : vector<2x64xf32>
    %cst_97 = arith.constant 1.000000e+00 : f32
    %155 = vector.broadcast %cst_97 : f32 to vector<2x64xf32>
    %156 = arith.addf %155, %154 : vector<2x64xf32>
    %157 = arith.divf %155, %156 : vector<2x64xf32>
    %158 = arith.index_cast %c1_i32 : i32 to index
    %c0_98 = arith.constant 0 : index
    %c0_99 = arith.constant 0 : index
    %159 = vector.load %arg16[%158, %c0_98, %c0_99] : memref<8x2x64xf32, #tpu.memory_space<vmem>>, vector<1x2x64xf32>
    %160 = vector.shape_cast %159 : vector<1x2x64xf32> to vector<2x64xf32>
    %161 = arith.mulf %152, %147 : vector<2x64xf32>
    %162 = arith.addf %160, %161 : vector<2x64xf32>
    %163 = math.tanh %162 : vector<2x64xf32>
    %cst_100 = arith.constant 1.000000e+00 : f32
    %164 = vector.broadcast %cst_100 : f32 to vector<2x64xf32>
    %165 = arith.subf %164, %157 : vector<2x64xf32>
    %166 = arith.mulf %165, %163 : vector<2x64xf32>
    %167 = arith.mulf %157, %102 : vector<2x64xf32>
    %168 = arith.addf %166, %167 : vector<2x64xf32>
    %169 = tpu.concatenate %168, %129 in 1 : vector<2x64xf32>, vector<2x64xf32> -> vector<2x128xf32>
    %cst_101 = arith.constant dense<0.000000e+00> : vector<2x64xf32>
    %170 = tpu.matmul %169, %36, %cst_101 {dimension_numbers = #tpu.dot_dimension_numbers<[1], [0], [0], [1], [0, 0, 1, 1], [], []>} : vector<2x128xf32>, vector<128x64xf32>, vector<2x64xf32> -> vector<2x64xf32>
    %171 = arith.addf %170, %56 : vector<2x64xf32>
    %172 = arith.negf %171 : vector<2x64xf32>
    %173 = math.exp %172 : vector<2x64xf32>
    %cst_102 = arith.constant 1.000000e+00 : f32
    %174 = vector.broadcast %cst_102 : f32 to vector<2x64xf32>
    %175 = arith.addf %174, %173 : vector<2x64xf32>
    %176 = arith.divf %174, %175 : vector<2x64xf32>
    %cst_103 = arith.constant dense<0.000000e+00> : vector<2x64xf32>
    %177 = tpu.matmul %169, %38, %cst_103 {dimension_numbers = #tpu.dot_dimension_numbers<[1], [0], [0], [1], [0, 0, 1, 1], [], []>} : vector<2x128xf32>, vector<128x64xf32>, vector<2x64xf32> -> vector<2x64xf32>
    %178 = arith.addf %177, %60 : vector<2x64xf32>
    %179 = arith.negf %178 : vector<2x64xf32>
    %180 = math.exp %179 : vector<2x64xf32>
    %cst_104 = arith.constant 1.000000e+00 : f32
    %181 = vector.broadcast %cst_104 : f32 to vector<2x64xf32>
    %182 = arith.addf %181, %180 : vector<2x64xf32>
    %183 = arith.divf %181, %182 : vector<2x64xf32>
    %cst_105 = arith.constant dense<0.000000e+00> : vector<2x64xf32>
    %184 = tpu.matmul %168, %39, %cst_105 {dimension_numbers = #tpu.dot_dimension_numbers<[1], [0], [0], [1], [0, 0, 1, 1], [], []>} : vector<2x64xf32>, vector<64x64xf32>, vector<2x64xf32> -> vector<2x64xf32>
    %185 = arith.addf %184, %63 : vector<2x64xf32>
    %cst_106 = arith.constant dense<0.000000e+00> : vector<2x64xf32>
    %186 = tpu.matmul %129, %40, %cst_106 {dimension_numbers = #tpu.dot_dimension_numbers<[1], [0], [0], [1], [0, 0, 1, 1], [], []>} : vector<2x64xf32>, vector<64x64xf32>, vector<2x64xf32> -> vector<2x64xf32>
    %187 = arith.addf %186, %66 : vector<2x64xf32>
    %188 = arith.mulf %176, %187 : vector<2x64xf32>
    %189 = arith.addf %185, %188 : vector<2x64xf32>
    %190 = math.tanh %189 : vector<2x64xf32>
    %cst_107 = arith.constant 1.000000e+00 : f32
    %191 = vector.broadcast %cst_107 : f32 to vector<2x64xf32>
    %192 = arith.subf %191, %183 : vector<2x64xf32>
    %193 = arith.mulf %192, %190 : vector<2x64xf32>
    %194 = arith.mulf %183, %129 : vector<2x64xf32>
    %195 = arith.addf %193, %194 : vector<2x64xf32>
    %196 = arith.index_cast %c1_i32 : i32 to index
    %c0_108 = arith.constant 0 : index
    %c0_109 = arith.constant 0 : index
    %197 = vector.load %arg17[%196, %c0_108, %c0_109] : memref<8x2x64xf32, #tpu.memory_space<vmem>>, vector<1x2x64xf32>
    %198 = vector.shape_cast %197 : vector<1x2x64xf32> to vector<2x64xf32>
    %199 = vector.shape_cast %195 : vector<2x64xf32> to vector<1x2x64xf32>
    tpu.vector_store %arg17[%196, %c0_108, %c0_109], %199 {strides = array<i32>} : memref<8x2x64xf32, #tpu.memory_space<vmem>>, vector<1x2x64xf32>,
    %c2_i32 = arith.constant 2 : i32
    %200 = arith.index_cast %c2_i32 : i32 to index
    %c0_110 = arith.constant 0 : index
    %c0_111 = arith.constant 0 : index
    %201 = vector.load %arg14[%200, %c0_110, %c0_111] : memref<8x2x64xf32, #tpu.memory_space<vmem>>, vector<1x2x64xf32>
    %202 = vector.shape_cast %201 : vector<1x2x64xf32> to vector<2x64xf32>
    %cst_112 = arith.constant dense<0.000000e+00> : vector<2x64xf32>
    %203 = tpu.matmul %168, %30, %cst_112 {dimension_numbers = #tpu.dot_dimension_numbers<[1], [0], [0], [1], [0, 0, 1, 1], [], []>} : vector<2x64xf32>, vector<64x64xf32>, vector<2x64xf32> -> vector<2x64xf32>
    %204 = arith.addf %202, %203 : vector<2x64xf32>
    %205 = arith.addf %204, %44 : vector<2x64xf32>
    %206 = arith.index_cast %c2_i32 : i32 to index
    %c0_113 = arith.constant 0 : index
    %c0_114 = arith.constant 0 : index
    %207 = vector.load %arg15[%206, %c0_113, %c0_114] : memref<8x2x64xf32, #tpu.memory_space<vmem>>, vector<1x2x64xf32>
    %208 = vector.shape_cast %207 : vector<1x2x64xf32> to vector<2x64xf32>
    %cst_115 = arith.constant dense<0.000000e+00> : vector<2x64xf32>
    %209 = tpu.matmul %168, %32, %cst_115 {dimension_numbers = #tpu.dot_dimension_numbers<[1], [0], [0], [1], [0, 0, 1, 1], [], []>} : vector<2x64xf32>, vector<64x64xf32>, vector<2x64xf32> -> vector<2x64xf32>
    %210 = arith.addf %208, %209 : vector<2x64xf32>
    %211 = arith.addf %210, %48 : vector<2x64xf32>
    %cst_116 = arith.constant dense<0.000000e+00> : vector<2x64xf32>
    %212 = tpu.matmul %168, %34, %cst_116 {dimension_numbers = #tpu.dot_dimension_numbers<[1], [0], [0], [1], [0, 0, 1, 1], [], []>} : vector<2x64xf32>, vector<64x64xf32>, vector<2x64xf32> -> vector<2x64xf32>
    %213 = arith.addf %212, %52 : vector<2x64xf32>
    %214 = arith.negf %205 : vector<2x64xf32>
    %215 = math.exp %214 : vector<2x64xf32>
    %cst_117 = arith.constant 1.000000e+00 : f32
    %216 = vector.broadcast %cst_117 : f32 to vector<2x64xf32>
    %217 = arith.addf %216, %215 : vector<2x64xf32>
    %218 = arith.divf %216, %217 : vector<2x64xf32>
    %219 = arith.negf %211 : vector<2x64xf32>
    %220 = math.exp %219 : vector<2x64xf32>
    %cst_118 = arith.constant 1.000000e+00 : f32
    %221 = vector.broadcast %cst_118 : f32 to vector<2x64xf32>
    %222 = arith.addf %221, %220 : vector<2x64xf32>
    %223 = arith.divf %221, %222 : vector<2x64xf32>
    %224 = arith.index_cast %c2_i32 : i32 to index
    %c0_119 = arith.constant 0 : index
    %c0_120 = arith.constant 0 : index
    %225 = vector.load %arg16[%224, %c0_119, %c0_120] : memref<8x2x64xf32, #tpu.memory_space<vmem>>, vector<1x2x64xf32>
    %226 = vector.shape_cast %225 : vector<1x2x64xf32> to vector<2x64xf32>
    %227 = arith.mulf %218, %213 : vector<2x64xf32>
    %228 = arith.addf %226, %227 : vector<2x64xf32>
    %229 = math.tanh %228 : vector<2x64xf32>
    %cst_121 = arith.constant 1.000000e+00 : f32
    %230 = vector.broadcast %cst_121 : f32 to vector<2x64xf32>
    %231 = arith.subf %230, %223 : vector<2x64xf32>
    %232 = arith.mulf %231, %229 : vector<2x64xf32>
    %233 = arith.mulf %223, %168 : vector<2x64xf32>
    %234 = arith.addf %232, %233 : vector<2x64xf32>
    %235 = tpu.concatenate %234, %195 in 1 : vector<2x64xf32>, vector<2x64xf32> -> vector<2x128xf32>
    %cst_122 = arith.constant dense<0.000000e+00> : vector<2x64xf32>
    %236 = tpu.matmul %235, %36, %cst_122 {dimension_numbers = #tpu.dot_dimension_numbers<[1], [0], [0], [1], [0, 0, 1, 1], [], []>} : vector<2x128xf32>, vector<128x64xf32>, vector<2x64xf32> -> vector<2x64xf32>
    %237 = arith.addf %236, %56 : vector<2x64xf32>
    %238 = arith.negf %237 : vector<2x64xf32>
    %239 = math.exp %238 : vector<2x64xf32>
    %cst_123 = arith.constant 1.000000e+00 : f32
    %240 = vector.broadcast %cst_123 : f32 to vector<2x64xf32>
    %241 = arith.addf %240, %239 : vector<2x64xf32>
    %242 = arith.divf %240, %241 : vector<2x64xf32>
    %cst_124 = arith.constant dense<0.000000e+00> : vector<2x64xf32>
    %243 = tpu.matmul %235, %38, %cst_124 {dimension_numbers = #tpu.dot_dimension_numbers<[1], [0], [0], [1], [0, 0, 1, 1], [], []>} : vector<2x128xf32>, vector<128x64xf32>, vector<2x64xf32> -> vector<2x64xf32>
    %244 = arith.addf %243, %60 : vector<2x64xf32>
    %245 = arith.negf %244 : vector<2x64xf32>
    %246 = math.exp %245 : vector<2x64xf32>
    %cst_125 = arith.constant 1.000000e+00 : f32
    %247 = vector.broadcast %cst_125 : f32 to vector<2x64xf32>
    %248 = arith.addf %247, %246 : vector<2x64xf32>
    %249 = arith.divf %247, %248 : vector<2x64xf32>
    %cst_126 = arith.constant dense<0.000000e+00> : vector<2x64xf32>
    %250 = tpu.matmul %234, %39, %cst_126 {dimension_numbers = #tpu.dot_dimension_numbers<[1], [0], [0], [1], [0, 0, 1, 1], [], []>} : vector<2x64xf32>, vector<64x64xf32>, vector<2x64xf32> -> vector<2x64xf32>
    %251 = arith.addf %250, %63 : vector<2x64xf32>
    %cst_127 = arith.constant dense<0.000000e+00> : vector<2x64xf32>
    %252 = tpu.matmul %195, %40, %cst_127 {dimension_numbers = #tpu.dot_dimension_numbers<[1], [0], [0], [1], [0, 0, 1, 1], [], []>} : vector<2x64xf32>, vector<64x64xf32>, vector<2x64xf32> -> vector<2x64xf32>
    %253 = arith.addf %252, %66 : vector<2x64xf32>
    %254 = arith.mulf %242, %253 : vector<2x64xf32>
    %255 = arith.addf %251, %254 : vector<2x64xf32>
    %256 = math.tanh %255 : vector<2x64xf32>
    %cst_128 = arith.constant 1.000000e+00 : f32
    %257 = vector.broadcast %cst_128 : f32 to vector<2x64xf32>
    %258 = arith.subf %257, %249 : vector<2x64xf32>
    %259 = arith.mulf %258, %256 : vector<2x64xf32>
    %260 = arith.mulf %249, %195 : vector<2x64xf32>
    %261 = arith.addf %259, %260 : vector<2x64xf32>
    %262 = arith.index_cast %c2_i32 : i32 to index
    %c0_129 = arith.constant 0 : index
    %c0_130 = arith.constant 0 : index
    %263 = vector.load %arg17[%262, %c0_129, %c0_130] : memref<8x2x64xf32, #tpu.memory_space<vmem>>, vector<1x2x64xf32>
    %264 = vector.shape_cast %263 : vector<1x2x64xf32> to vector<2x64xf32>
    %265 = vector.shape_cast %261 : vector<2x64xf32> to vector<1x2x64xf32>
    tpu.vector_store %arg17[%262, %c0_129, %c0_130], %265 {strides = array<i32>} : memref<8x2x64xf32, #tpu.memory_space<vmem>>, vector<1x2x64xf32>,
    %c3_i32 = arith.constant 3 : i32
    %266 = arith.index_cast %c3_i32 : i32 to index
    %c0_131 = arith.constant 0 : index
    %c0_132 = arith.constant 0 : index
    %267 = vector.load %arg14[%266, %c0_131, %c0_132] : memref<8x2x64xf32, #tpu.memory_space<vmem>>, vector<1x2x64xf32>
    %268 = vector.shape_cast %267 : vector<1x2x64xf32> to vector<2x64xf32>
    %cst_133 = arith.constant dense<0.000000e+00> : vector<2x64xf32>
    %269 = tpu.matmul %234, %30, %cst_133 {dimension_numbers = #tpu.dot_dimension_numbers<[1], [0], [0], [1], [0, 0, 1, 1], [], []>} : vector<2x64xf32>, vector<64x64xf32>, vector<2x64xf32> -> vector<2x64xf32>
    %270 = arith.addf %268, %269 : vector<2x64xf32>
    %271 = arith.addf %270, %44 : vector<2x64xf32>
    %272 = arith.index_cast %c3_i32 : i32 to index
    %c0_134 = arith.constant 0 : index
    %c0_135 = arith.constant 0 : index
    %273 = vector.load %arg15[%272, %c0_134, %c0_135] : memref<8x2x64xf32, #tpu.memory_space<vmem>>, vector<1x2x64xf32>
    %274 = vector.shape_cast %273 : vector<1x2x64xf32> to vector<2x64xf32>
    %cst_136 = arith.constant dense<0.000000e+00> : vector<2x64xf32>
    %275 = tpu.matmul %234, %32, %cst_136 {dimension_numbers = #tpu.dot_dimension_numbers<[1], [0], [0], [1], [0, 0, 1, 1], [], []>} : vector<2x64xf32>, vector<64x64xf32>, vector<2x64xf32> -> vector<2x64xf32>
    %276 = arith.addf %274, %275 : vector<2x64xf32>
    %277 = arith.addf %276, %48 : vector<2x64xf32>
    %cst_137 = arith.constant dense<0.000000e+00> : vector<2x64xf32>
    %278 = tpu.matmul %234, %34, %cst_137 {dimension_numbers = #tpu.dot_dimension_numbers<[1], [0], [0], [1], [0, 0, 1, 1], [], []>} : vector<2x64xf32>, vector<64x64xf32>, vector<2x64xf32> -> vector<2x64xf32>
    %279 = arith.addf %278, %52 : vector<2x64xf32>
    %280 = arith.negf %271 : vector<2x64xf32>
    %281 = math.exp %280 : vector<2x64xf32>
    %cst_138 = arith.constant 1.000000e+00 : f32
    %282 = vector.broadcast %cst_138 : f32 to vector<2x64xf32>
    %283 = arith.addf %282, %281 : vector<2x64xf32>
    %284 = arith.divf %282, %283 : vector<2x64xf32>
    %285 = arith.negf %277 : vector<2x64xf32>
    %286 = math.exp %285 : vector<2x64xf32>
    %cst_139 = arith.constant 1.000000e+00 : f32
    %287 = vector.broadcast %cst_139 : f32 to vector<2x64xf32>
    %288 = arith.addf %287, %286 : vector<2x64xf32>
    %289 = arith.divf %287, %288 : vector<2x64xf32>
    %290 = arith.index_cast %c3_i32 : i32 to index
    %c0_140 = arith.constant 0 : index
    %c0_141 = arith.constant 0 : index
    %291 = vector.load %arg16[%290, %c0_140, %c0_141] : memref<8x2x64xf32, #tpu.memory_space<vmem>>, vector<1x2x64xf32>
    %292 = vector.shape_cast %291 : vector<1x2x64xf32> to vector<2x64xf32>
    %293 = arith.mulf %284, %279 : vector<2x64xf32>
    %294 = arith.addf %292, %293 : vector<2x64xf32>
    %295 = math.tanh %294 : vector<2x64xf32>
    %cst_142 = arith.constant 1.000000e+00 : f32
    %296 = vector.broadcast %cst_142 : f32 to vector<2x64xf32>
    %297 = arith.subf %296, %289 : vector<2x64xf32>
    %298 = arith.mulf %297, %295 : vector<2x64xf32>
    %299 = arith.mulf %289, %234 : vector<2x64xf32>
    %300 = arith.addf %298, %299 : vector<2x64xf32>
    %301 = tpu.concatenate %300, %261 in 1 : vector<2x64xf32>, vector<2x64xf32> -> vector<2x128xf32>
    %cst_143 = arith.constant dense<0.000000e+00> : vector<2x64xf32>
    %302 = tpu.matmul %301, %36, %cst_143 {dimension_numbers = #tpu.dot_dimension_numbers<[1], [0], [0], [1], [0, 0, 1, 1], [], []>} : vector<2x128xf32>, vector<128x64xf32>, vector<2x64xf32> -> vector<2x64xf32>
    %303 = arith.addf %302, %56 : vector<2x64xf32>
    %304 = arith.negf %303 : vector<2x64xf32>
    %305 = math.exp %304 : vector<2x64xf32>
    %cst_144 = arith.constant 1.000000e+00 : f32
    %306 = vector.broadcast %cst_144 : f32 to vector<2x64xf32>
    %307 = arith.addf %306, %305 : vector<2x64xf32>
    %308 = arith.divf %306, %307 : vector<2x64xf32>
    %cst_145 = arith.constant dense<0.000000e+00> : vector<2x64xf32>
    %309 = tpu.matmul %301, %38, %cst_145 {dimension_numbers = #tpu.dot_dimension_numbers<[1], [0], [0], [1], [0, 0, 1, 1], [], []>} : vector<2x128xf32>, vector<128x64xf32>, vector<2x64xf32> -> vector<2x64xf32>
    %310 = arith.addf %309, %60 : vector<2x64xf32>
    %311 = arith.negf %310 : vector<2x64xf32>
    %312 = math.exp %311 : vector<2x64xf32>
    %cst_146 = arith.constant 1.000000e+00 : f32
    %313 = vector.broadcast %cst_146 : f32 to vector<2x64xf32>
    %314 = arith.addf %313, %312 : vector<2x64xf32>
    %315 = arith.divf %313, %314 : vector<2x64xf32>
    %cst_147 = arith.constant dense<0.000000e+00> : vector<2x64xf32>
    %316 = tpu.matmul %300, %39, %cst_147 {dimension_numbers = #tpu.dot_dimension_numbers<[1], [0], [0], [1], [0, 0, 1, 1], [], []>} : vector<2x64xf32>, vector<64x64xf32>, vector<2x64xf32> -> vector<2x64xf32>
    %317 = arith.addf %316, %63 : vector<2x64xf32>
    %cst_148 = arith.constant dense<0.000000e+00> : vector<2x64xf32>
    %318 = tpu.matmul %261, %40, %cst_148 {dimension_numbers = #tpu.dot_dimension_numbers<[1], [0], [0], [1], [0, 0, 1, 1], [], []>} : vector<2x64xf32>, vector<64x64xf32>, vector<2x64xf32> -> vector<2x64xf32>
    %319 = arith.addf %318, %66 : vector<2x64xf32>
    %320 = arith.mulf %308, %319 : vector<2x64xf32>
    %321 = arith.addf %317, %320 : vector<2x64xf32>
    %322 = math.tanh %321 : vector<2x64xf32>
    %cst_149 = arith.constant 1.000000e+00 : f32
    %323 = vector.broadcast %cst_149 : f32 to vector<2x64xf32>
    %324 = arith.subf %323, %315 : vector<2x64xf32>
    %325 = arith.mulf %324, %322 : vector<2x64xf32>
    %326 = arith.mulf %315, %261 : vector<2x64xf32>
    %327 = arith.addf %325, %326 : vector<2x64xf32>
    %328 = arith.index_cast %c3_i32 : i32 to index
    %c0_150 = arith.constant 0 : index
    %c0_151 = arith.constant 0 : index
    %329 = vector.load %arg17[%328, %c0_150, %c0_151] : memref<8x2x64xf32, #tpu.memory_space<vmem>>, vector<1x2x64xf32>
    %330 = vector.shape_cast %329 : vector<1x2x64xf32> to vector<2x64xf32>
    %331 = vector.shape_cast %327 : vector<2x64xf32> to vector<1x2x64xf32>
    tpu.vector_store %arg17[%328, %c0_150, %c0_151], %331 {strides = array<i32>} : memref<8x2x64xf32, #tpu.memory_space<vmem>>, vector<1x2x64xf32>,
    %c4_i32 = arith.constant 4 : i32
    %332 = arith.index_cast %c4_i32 : i32 to index
    %c0_152 = arith.constant 0 : index
    %c0_153 = arith.constant 0 : index
    %333 = vector.load %arg14[%332, %c0_152, %c0_153] : memref<8x2x64xf32, #tpu.memory_space<vmem>>, vector<1x2x64xf32>
    %334 = vector.shape_cast %333 : vector<1x2x64xf32> to vector<2x64xf32>
    %cst_154 = arith.constant dense<0.000000e+00> : vector<2x64xf32>
    %335 = tpu.matmul %300, %30, %cst_154 {dimension_numbers = #tpu.dot_dimension_numbers<[1], [0], [0], [1], [0, 0, 1, 1], [], []>} : vector<2x64xf32>, vector<64x64xf32>, vector<2x64xf32> -> vector<2x64xf32>
    %336 = arith.addf %334, %335 : vector<2x64xf32>
    %337 = arith.addf %336, %44 : vector<2x64xf32>
    %338 = arith.index_cast %c4_i32 : i32 to index
    %c0_155 = arith.constant 0 : index
    %c0_156 = arith.constant 0 : index
    %339 = vector.load %arg15[%338, %c0_155, %c0_156] : memref<8x2x64xf32, #tpu.memory_space<vmem>>, vector<1x2x64xf32>
    %340 = vector.shape_cast %339 : vector<1x2x64xf32> to vector<2x64xf32>
    %cst_157 = arith.constant dense<0.000000e+00> : vector<2x64xf32>
    %341 = tpu.matmul %300, %32, %cst_157 {dimension_numbers = #tpu.dot_dimension_numbers<[1], [0], [0], [1], [0, 0, 1, 1], [], []>} : vector<2x64xf32>, vector<64x64xf32>, vector<2x64xf32> -> vector<2x64xf32>
    %342 = arith.addf %340, %341 : vector<2x64xf32>
    %343 = arith.addf %342, %48 : vector<2x64xf32>
    %cst_158 = arith.constant dense<0.000000e+00> : vector<2x64xf32>
    %344 = tpu.matmul %300, %34, %cst_158 {dimension_numbers = #tpu.dot_dimension_numbers<[1], [0], [0], [1], [0, 0, 1, 1], [], []>} : vector<2x64xf32>, vector<64x64xf32>, vector<2x64xf32> -> vector<2x64xf32>
    %345 = arith.addf %344, %52 : vector<2x64xf32>
    %346 = arith.negf %337 : vector<2x64xf32>
    %347 = math.exp %346 : vector<2x64xf32>
    %cst_159 = arith.constant 1.000000e+00 : f32
    %348 = vector.broadcast %cst_159 : f32 to vector<2x64xf32>
    %349 = arith.addf %348, %347 : vector<2x64xf32>
    %350 = arith.divf %348, %349 : vector<2x64xf32>
    %351 = arith.negf %343 : vector<2x64xf32>
    %352 = math.exp %351 : vector<2x64xf32>
    %cst_160 = arith.constant 1.000000e+00 : f32
    %353 = vector.broadcast %cst_160 : f32 to vector<2x64xf32>
    %354 = arith.addf %353, %352 : vector<2x64xf32>
    %355 = arith.divf %353, %354 : vector<2x64xf32>
    %356 = arith.index_cast %c4_i32 : i32 to index
    %c0_161 = arith.constant 0 : index
    %c0_162 = arith.constant 0 : index
    %357 = vector.load %arg16[%356, %c0_161, %c0_162] : memref<8x2x64xf32, #tpu.memory_space<vmem>>, vector<1x2x64xf32>
    %358 = vector.shape_cast %357 : vector<1x2x64xf32> to vector<2x64xf32>
    %359 = arith.mulf %350, %345 : vector<2x64xf32>
    %360 = arith.addf %358, %359 : vector<2x64xf32>
    %361 = math.tanh %360 : vector<2x64xf32>
    %cst_163 = arith.constant 1.000000e+00 : f32
    %362 = vector.broadcast %cst_163 : f32 to vector<2x64xf32>
    %363 = arith.subf %362, %355 : vector<2x64xf32>
    %364 = arith.mulf %363, %361 : vector<2x64xf32>
    %365 = arith.mulf %355, %300 : vector<2x64xf32>
    %366 = arith.addf %364, %365 : vector<2x64xf32>
    %367 = tpu.concatenate %366, %327 in 1 : vector<2x64xf32>, vector<2x64xf32> -> vector<2x128xf32>
    %cst_164 = arith.constant dense<0.000000e+00> : vector<2x64xf32>
    %368 = tpu.matmul %367, %36, %cst_164 {dimension_numbers = #tpu.dot_dimension_numbers<[1], [0], [0], [1], [0, 0, 1, 1], [], []>} : vector<2x128xf32>, vector<128x64xf32>, vector<2x64xf32> -> vector<2x64xf32>
    %369 = arith.addf %368, %56 : vector<2x64xf32>
    %370 = arith.negf %369 : vector<2x64xf32>
    %371 = math.exp %370 : vector<2x64xf32>
    %cst_165 = arith.constant 1.000000e+00 : f32
    %372 = vector.broadcast %cst_165 : f32 to vector<2x64xf32>
    %373 = arith.addf %372, %371 : vector<2x64xf32>
    %374 = arith.divf %372, %373 : vector<2x64xf32>
    %cst_166 = arith.constant dense<0.000000e+00> : vector<2x64xf32>
    %375 = tpu.matmul %367, %38, %cst_166 {dimension_numbers = #tpu.dot_dimension_numbers<[1], [0], [0], [1], [0, 0, 1, 1], [], []>} : vector<2x128xf32>, vector<128x64xf32>, vector<2x64xf32> -> vector<2x64xf32>
    %376 = arith.addf %375, %60 : vector<2x64xf32>
    %377 = arith.negf %376 : vector<2x64xf32>
    %378 = math.exp %377 : vector<2x64xf32>
    %cst_167 = arith.constant 1.000000e+00 : f32
    %379 = vector.broadcast %cst_167 : f32 to vector<2x64xf32>
    %380 = arith.addf %379, %378 : vector<2x64xf32>
    %381 = arith.divf %379, %380 : vector<2x64xf32>
    %cst_168 = arith.constant dense<0.000000e+00> : vector<2x64xf32>
    %382 = tpu.matmul %366, %39, %cst_168 {dimension_numbers = #tpu.dot_dimension_numbers<[1], [0], [0], [1], [0, 0, 1, 1], [], []>} : vector<2x64xf32>, vector<64x64xf32>, vector<2x64xf32> -> vector<2x64xf32>
    %383 = arith.addf %382, %63 : vector<2x64xf32>
    %cst_169 = arith.constant dense<0.000000e+00> : vector<2x64xf32>
    %384 = tpu.matmul %327, %40, %cst_169 {dimension_numbers = #tpu.dot_dimension_numbers<[1], [0], [0], [1], [0, 0, 1, 1], [], []>} : vector<2x64xf32>, vector<64x64xf32>, vector<2x64xf32> -> vector<2x64xf32>
    %385 = arith.addf %384, %66 : vector<2x64xf32>
    %386 = arith.mulf %374, %385 : vector<2x64xf32>
    %387 = arith.addf %383, %386 : vector<2x64xf32>
    %388 = math.tanh %387 : vector<2x64xf32>
    %cst_170 = arith.constant 1.000000e+00 : f32
    %389 = vector.broadcast %cst_170 : f32 to vector<2x64xf32>
    %390 = arith.subf %389, %381 : vector<2x64xf32>
    %391 = arith.mulf %390, %388 : vector<2x64xf32>
    %392 = arith.mulf %381, %327 : vector<2x64xf32>
    %393 = arith.addf %391, %392 : vector<2x64xf32>
    %394 = arith.index_cast %c4_i32 : i32 to index
    %c0_171 = arith.constant 0 : index
    %c0_172 = arith.constant 0 : index
    %395 = vector.load %arg17[%394, %c0_171, %c0_172] : memref<8x2x64xf32, #tpu.memory_space<vmem>>, vector<1x2x64xf32>
    %396 = vector.shape_cast %395 : vector<1x2x64xf32> to vector<2x64xf32>
    %397 = vector.shape_cast %393 : vector<2x64xf32> to vector<1x2x64xf32>
    tpu.vector_store %arg17[%394, %c0_171, %c0_172], %397 {strides = array<i32>} : memref<8x2x64xf32, #tpu.memory_space<vmem>>, vector<1x2x64xf32>,
    %c5_i32 = arith.constant 5 : i32
    %398 = arith.index_cast %c5_i32 : i32 to index
    %c0_173 = arith.constant 0 : index
    %c0_174 = arith.constant 0 : index
    %399 = vector.load %arg14[%398, %c0_173, %c0_174] : memref<8x2x64xf32, #tpu.memory_space<vmem>>, vector<1x2x64xf32>
    %400 = vector.shape_cast %399 : vector<1x2x64xf32> to vector<2x64xf32>
    %cst_175 = arith.constant dense<0.000000e+00> : vector<2x64xf32>
    %401 = tpu.matmul %366, %30, %cst_175 {dimension_numbers = #tpu.dot_dimension_numbers<[1], [0], [0], [1], [0, 0, 1, 1], [], []>} : vector<2x64xf32>, vector<64x64xf32>, vector<2x64xf32> -> vector<2x64xf32>
    %402 = arith.addf %400, %401 : vector<2x64xf32>
    %403 = arith.addf %402, %44 : vector<2x64xf32>
    %404 = arith.index_cast %c5_i32 : i32 to index
    %c0_176 = arith.constant 0 : index
    %c0_177 = arith.constant 0 : index
    %405 = vector.load %arg15[%404, %c0_176, %c0_177] : memref<8x2x64xf32, #tpu.memory_space<vmem>>, vector<1x2x64xf32>
    %406 = vector.shape_cast %405 : vector<1x2x64xf32> to vector<2x64xf32>
    %cst_178 = arith.constant dense<0.000000e+00> : vector<2x64xf32>
    %407 = tpu.matmul %366, %32, %cst_178 {dimension_numbers = #tpu.dot_dimension_numbers<[1], [0], [0], [1], [0, 0, 1, 1], [], []>} : vector<2x64xf32>, vector<64x64xf32>, vector<2x64xf32> -> vector<2x64xf32>
    %408 = arith.addf %406, %407 : vector<2x64xf32>
    %409 = arith.addf %408, %48 : vector<2x64xf32>
    %cst_179 = arith.constant dense<0.000000e+00> : vector<2x64xf32>
    %410 = tpu.matmul %366, %34, %cst_179 {dimension_numbers = #tpu.dot_dimension_numbers<[1], [0], [0], [1], [0, 0, 1, 1], [], []>} : vector<2x64xf32>, vector<64x64xf32>, vector<2x64xf32> -> vector<2x64xf32>
    %411 = arith.addf %410, %52 : vector<2x64xf32>
    %412 = arith.negf %403 : vector<2x64xf32>
    %413 = math.exp %412 : vector<2x64xf32>
    %cst_180 = arith.constant 1.000000e+00 : f32
    %414 = vector.broadcast %cst_180 : f32 to vector<2x64xf32>
    %415 = arith.addf %414, %413 : vector<2x64xf32>
    %416 = arith.divf %414, %415 : vector<2x64xf32>
    %417 = arith.negf %409 : vector<2x64xf32>
    %418 = math.exp %417 : vector<2x64xf32>
    %cst_181 = arith.constant 1.000000e+00 : f32
    %419 = vector.broadcast %cst_181 : f32 to vector<2x64xf32>
    %420 = arith.addf %419, %418 : vector<2x64xf32>
    %421 = arith.divf %419, %420 : vector<2x64xf32>
    %422 = arith.index_cast %c5_i32 : i32 to index
    %c0_182 = arith.constant 0 : index
    %c0_183 = arith.constant 0 : index
    %423 = vector.load %arg16[%422, %c0_182, %c0_183] : memref<8x2x64xf32, #tpu.memory_space<vmem>>, vector<1x2x64xf32>
    %424 = vector.shape_cast %423 : vector<1x2x64xf32> to vector<2x64xf32>
    %425 = arith.mulf %416, %411 : vector<2x64xf32>
    %426 = arith.addf %424, %425 : vector<2x64xf32>
    %427 = math.tanh %426 : vector<2x64xf32>
    %cst_184 = arith.constant 1.000000e+00 : f32
    %428 = vector.broadcast %cst_184 : f32 to vector<2x64xf32>
    %429 = arith.subf %428, %421 : vector<2x64xf32>
    %430 = arith.mulf %429, %427 : vector<2x64xf32>
    %431 = arith.mulf %421, %366 : vector<2x64xf32>
    %432 = arith.addf %430, %431 : vector<2x64xf32>
    %433 = tpu.concatenate %432, %393 in 1 : vector<2x64xf32>, vector<2x64xf32> -> vector<2x128xf32>
    %cst_185 = arith.constant dense<0.000000e+00> : vector<2x64xf32>
    %434 = tpu.matmul %433, %36, %cst_185 {dimension_numbers = #tpu.dot_dimension_numbers<[1], [0], [0], [1], [0, 0, 1, 1], [], []>} : vector<2x128xf32>, vector<128x64xf32>, vector<2x64xf32> -> vector<2x64xf32>
    %435 = arith.addf %434, %56 : vector<2x64xf32>
    %436 = arith.negf %435 : vector<2x64xf32>
    %437 = math.exp %436 : vector<2x64xf32>
    %cst_186 = arith.constant 1.000000e+00 : f32
    %438 = vector.broadcast %cst_186 : f32 to vector<2x64xf32>
    %439 = arith.addf %438, %437 : vector<2x64xf32>
    %440 = arith.divf %438, %439 : vector<2x64xf32>
    %cst_187 = arith.constant dense<0.000000e+00> : vector<2x64xf32>
    %441 = tpu.matmul %433, %38, %cst_187 {dimension_numbers = #tpu.dot_dimension_numbers<[1], [0], [0], [1], [0, 0, 1, 1], [], []>} : vector<2x128xf32>, vector<128x64xf32>, vector<2x64xf32> -> vector<2x64xf32>
    %442 = arith.addf %441, %60 : vector<2x64xf32>
    %443 = arith.negf %442 : vector<2x64xf32>
    %444 = math.exp %443 : vector<2x64xf32>
    %cst_188 = arith.constant 1.000000e+00 : f32
    %445 = vector.broadcast %cst_188 : f32 to vector<2x64xf32>
    %446 = arith.addf %445, %444 : vector<2x64xf32>
    %447 = arith.divf %445, %446 : vector<2x64xf32>
    %cst_189 = arith.constant dense<0.000000e+00> : vector<2x64xf32>
    %448 = tpu.matmul %432, %39, %cst_189 {dimension_numbers = #tpu.dot_dimension_numbers<[1], [0], [0], [1], [0, 0, 1, 1], [], []>} : vector<2x64xf32>, vector<64x64xf32>, vector<2x64xf32> -> vector<2x64xf32>
    %449 = arith.addf %448, %63 : vector<2x64xf32>
    %cst_190 = arith.constant dense<0.000000e+00> : vector<2x64xf32>
    %450 = tpu.matmul %393, %40, %cst_190 {dimension_numbers = #tpu.dot_dimension_numbers<[1], [0], [0], [1], [0, 0, 1, 1], [], []>} : vector<2x64xf32>, vector<64x64xf32>, vector<2x64xf32> -> vector<2x64xf32>
    %451 = arith.addf %450, %66 : vector<2x64xf32>
    %452 = arith.mulf %440, %451 : vector<2x64xf32>
    %453 = arith.addf %449, %452 : vector<2x64xf32>
    %454 = math.tanh %453 : vector<2x64xf32>
    %cst_191 = arith.constant 1.000000e+00 : f32
    %455 = vector.broadcast %cst_191 : f32 to vector<2x64xf32>
    %456 = arith.subf %455, %447 : vector<2x64xf32>
    %457 = arith.mulf %456, %454 : vector<2x64xf32>
    %458 = arith.mulf %447, %393 : vector<2x64xf32>
    %459 = arith.addf %457, %458 : vector<2x64xf32>
    %460 = arith.index_cast %c5_i32 : i32 to index
    %c0_192 = arith.constant 0 : index
    %c0_193 = arith.constant 0 : index
    %461 = vector.load %arg17[%460, %c0_192, %c0_193] : memref<8x2x64xf32, #tpu.memory_space<vmem>>, vector<1x2x64xf32>
    %462 = vector.shape_cast %461 : vector<1x2x64xf32> to vector<2x64xf32>
    %463 = vector.shape_cast %459 : vector<2x64xf32> to vector<1x2x64xf32>
    tpu.vector_store %arg17[%460, %c0_192, %c0_193], %463 {strides = array<i32>} : memref<8x2x64xf32, #tpu.memory_space<vmem>>, vector<1x2x64xf32>,
    %c6_i32 = arith.constant 6 : i32
    %464 = arith.index_cast %c6_i32 : i32 to index
    %c0_194 = arith.constant 0 : index
    %c0_195 = arith.constant 0 : index
    %465 = vector.load %arg14[%464, %c0_194, %c0_195] : memref<8x2x64xf32, #tpu.memory_space<vmem>>, vector<1x2x64xf32>
    %466 = vector.shape_cast %465 : vector<1x2x64xf32> to vector<2x64xf32>
    %cst_196 = arith.constant dense<0.000000e+00> : vector<2x64xf32>
    %467 = tpu.matmul %432, %30, %cst_196 {dimension_numbers = #tpu.dot_dimension_numbers<[1], [0], [0], [1], [0, 0, 1, 1], [], []>} : vector<2x64xf32>, vector<64x64xf32>, vector<2x64xf32> -> vector<2x64xf32>
    %468 = arith.addf %466, %467 : vector<2x64xf32>
    %469 = arith.addf %468, %44 : vector<2x64xf32>
    %470 = arith.index_cast %c6_i32 : i32 to index
    %c0_197 = arith.constant 0 : index
    %c0_198 = arith.constant 0 : index
    %471 = vector.load %arg15[%470, %c0_197, %c0_198] : memref<8x2x64xf32, #tpu.memory_space<vmem>>, vector<1x2x64xf32>
    %472 = vector.shape_cast %471 : vector<1x2x64xf32> to vector<2x64xf32>
    %cst_199 = arith.constant dense<0.000000e+00> : vector<2x64xf32>
    %473 = tpu.matmul %432, %32, %cst_199 {dimension_numbers = #tpu.dot_dimension_numbers<[1], [0], [0], [1], [0, 0, 1, 1], [], []>} : vector<2x64xf32>, vector<64x64xf32>, vector<2x64xf32> -> vector<2x64xf32>
    %474 = arith.addf %472, %473 : vector<2x64xf32>
    %475 = arith.addf %474, %48 : vector<2x64xf32>
    %cst_200 = arith.constant dense<0.000000e+00> : vector<2x64xf32>
    %476 = tpu.matmul %432, %34, %cst_200 {dimension_numbers = #tpu.dot_dimension_numbers<[1], [0], [0], [1], [0, 0, 1, 1], [], []>} : vector<2x64xf32>, vector<64x64xf32>, vector<2x64xf32> -> vector<2x64xf32>
    %477 = arith.addf %476, %52 : vector<2x64xf32>
    %478 = arith.negf %469 : vector<2x64xf32>
    %479 = math.exp %478 : vector<2x64xf32>
    %cst_201 = arith.constant 1.000000e+00 : f32
    %480 = vector.broadcast %cst_201 : f32 to vector<2x64xf32>
    %481 = arith.addf %480, %479 : vector<2x64xf32>
    %482 = arith.divf %480, %481 : vector<2x64xf32>
    %483 = arith.negf %475 : vector<2x64xf32>
    %484 = math.exp %483 : vector<2x64xf32>
    %cst_202 = arith.constant 1.000000e+00 : f32
    %485 = vector.broadcast %cst_202 : f32 to vector<2x64xf32>
    %486 = arith.addf %485, %484 : vector<2x64xf32>
    %487 = arith.divf %485, %486 : vector<2x64xf32>
    %488 = arith.index_cast %c6_i32 : i32 to index
    %c0_203 = arith.constant 0 : index
    %c0_204 = arith.constant 0 : index
    %489 = vector.load %arg16[%488, %c0_203, %c0_204] : memref<8x2x64xf32, #tpu.memory_space<vmem>>, vector<1x2x64xf32>
    %490 = vector.shape_cast %489 : vector<1x2x64xf32> to vector<2x64xf32>
    %491 = arith.mulf %482, %477 : vector<2x64xf32>
    %492 = arith.addf %490, %491 : vector<2x64xf32>
    %493 = math.tanh %492 : vector<2x64xf32>
    %cst_205 = arith.constant 1.000000e+00 : f32
    %494 = vector.broadcast %cst_205 : f32 to vector<2x64xf32>
    %495 = arith.subf %494, %487 : vector<2x64xf32>
    %496 = arith.mulf %495, %493 : vector<2x64xf32>
    %497 = arith.mulf %487, %432 : vector<2x64xf32>
    %498 = arith.addf %496, %497 : vector<2x64xf32>
    %499 = tpu.concatenate %498, %459 in 1 : vector<2x64xf32>, vector<2x64xf32> -> vector<2x128xf32>
    %cst_206 = arith.constant dense<0.000000e+00> : vector<2x64xf32>
    %500 = tpu.matmul %499, %36, %cst_206 {dimension_numbers = #tpu.dot_dimension_numbers<[1], [0], [0], [1], [0, 0, 1, 1], [], []>} : vector<2x128xf32>, vector<128x64xf32>, vector<2x64xf32> -> vector<2x64xf32>
    %501 = arith.addf %500, %56 : vector<2x64xf32>
    %502 = arith.negf %501 : vector<2x64xf32>
    %503 = math.exp %502 : vector<2x64xf32>
    %cst_207 = arith.constant 1.000000e+00 : f32
    %504 = vector.broadcast %cst_207 : f32 to vector<2x64xf32>
    %505 = arith.addf %504, %503 : vector<2x64xf32>
    %506 = arith.divf %504, %505 : vector<2x64xf32>
    %cst_208 = arith.constant dense<0.000000e+00> : vector<2x64xf32>
    %507 = tpu.matmul %499, %38, %cst_208 {dimension_numbers = #tpu.dot_dimension_numbers<[1], [0], [0], [1], [0, 0, 1, 1], [], []>} : vector<2x128xf32>, vector<128x64xf32>, vector<2x64xf32> -> vector<2x64xf32>
    %508 = arith.addf %507, %60 : vector<2x64xf32>
    %509 = arith.negf %508 : vector<2x64xf32>
    %510 = math.exp %509 : vector<2x64xf32>
    %cst_209 = arith.constant 1.000000e+00 : f32
    %511 = vector.broadcast %cst_209 : f32 to vector<2x64xf32>
    %512 = arith.addf %511, %510 : vector<2x64xf32>
    %513 = arith.divf %511, %512 : vector<2x64xf32>
    %cst_210 = arith.constant dense<0.000000e+00> : vector<2x64xf32>
    %514 = tpu.matmul %498, %39, %cst_210 {dimension_numbers = #tpu.dot_dimension_numbers<[1], [0], [0], [1], [0, 0, 1, 1], [], []>} : vector<2x64xf32>, vector<64x64xf32>, vector<2x64xf32> -> vector<2x64xf32>
    %515 = arith.addf %514, %63 : vector<2x64xf32>
    %cst_211 = arith.constant dense<0.000000e+00> : vector<2x64xf32>
    %516 = tpu.matmul %459, %40, %cst_211 {dimension_numbers = #tpu.dot_dimension_numbers<[1], [0], [0], [1], [0, 0, 1, 1], [], []>} : vector<2x64xf32>, vector<64x64xf32>, vector<2x64xf32> -> vector<2x64xf32>
    %517 = arith.addf %516, %66 : vector<2x64xf32>
    %518 = arith.mulf %506, %517 : vector<2x64xf32>
    %519 = arith.addf %515, %518 : vector<2x64xf32>
    %520 = math.tanh %519 : vector<2x64xf32>
    %cst_212 = arith.constant 1.000000e+00 : f32
    %521 = vector.broadcast %cst_212 : f32 to vector<2x64xf32>
    %522 = arith.subf %521, %513 : vector<2x64xf32>
    %523 = arith.mulf %522, %520 : vector<2x64xf32>
    %524 = arith.mulf %513, %459 : vector<2x64xf32>
    %525 = arith.addf %523, %524 : vector<2x64xf32>
    %526 = arith.index_cast %c6_i32 : i32 to index
    %c0_213 = arith.constant 0 : index
    %c0_214 = arith.constant 0 : index
    %527 = vector.load %arg17[%526, %c0_213, %c0_214] : memref<8x2x64xf32, #tpu.memory_space<vmem>>, vector<1x2x64xf32>
    %528 = vector.shape_cast %527 : vector<1x2x64xf32> to vector<2x64xf32>
    %529 = vector.shape_cast %525 : vector<2x64xf32> to vector<1x2x64xf32>
    tpu.vector_store %arg17[%526, %c0_213, %c0_214], %529 {strides = array<i32>} : memref<8x2x64xf32, #tpu.memory_space<vmem>>, vector<1x2x64xf32>,
    %c7_i32 = arith.constant 7 : i32
    %530 = arith.index_cast %c7_i32 : i32 to index
    %c0_215 = arith.constant 0 : index
    %c0_216 = arith.constant 0 : index
    %531 = vector.load %arg14[%530, %c0_215, %c0_216] : memref<8x2x64xf32, #tpu.memory_space<vmem>>, vector<1x2x64xf32>
    %532 = vector.shape_cast %531 : vector<1x2x64xf32> to vector<2x64xf32>
    %cst_217 = arith.constant dense<0.000000e+00> : vector<2x64xf32>
    %533 = tpu.matmul %498, %30, %cst_217 {dimension_numbers = #tpu.dot_dimension_numbers<[1], [0], [0], [1], [0, 0, 1, 1], [], []>} : vector<2x64xf32>, vector<64x64xf32>, vector<2x64xf32> -> vector<2x64xf32>
    %534 = arith.addf %532, %533 : vector<2x64xf32>
    %535 = arith.addf %534, %44 : vector<2x64xf32>
    %536 = arith.index_cast %c7_i32 : i32 to index
    %c0_218 = arith.constant 0 : index
    %c0_219 = arith.constant 0 : index
    %537 = vector.load %arg15[%536, %c0_218, %c0_219] : memref<8x2x64xf32, #tpu.memory_space<vmem>>, vector<1x2x64xf32>
    %538 = vector.shape_cast %537 : vector<1x2x64xf32> to vector<2x64xf32>
    %cst_220 = arith.constant dense<0.000000e+00> : vector<2x64xf32>
    %539 = tpu.matmul %498, %32, %cst_220 {dimension_numbers = #tpu.dot_dimension_numbers<[1], [0], [0], [1], [0, 0, 1, 1], [], []>} : vector<2x64xf32>, vector<64x64xf32>, vector<2x64xf32> -> vector<2x64xf32>
    %540 = arith.addf %538, %539 : vector<2x64xf32>
    %541 = arith.addf %540, %48 : vector<2x64xf32>
    %cst_221 = arith.constant dense<0.000000e+00> : vector<2x64xf32>
    %542 = tpu.matmul %498, %34, %cst_221 {dimension_numbers = #tpu.dot_dimension_numbers<[1], [0], [0], [1], [0, 0, 1, 1], [], []>} : vector<2x64xf32>, vector<64x64xf32>, vector<2x64xf32> -> vector<2x64xf32>
    %543 = arith.addf %542, %52 : vector<2x64xf32>
    %544 = arith.negf %535 : vector<2x64xf32>
    %545 = math.exp %544 : vector<2x64xf32>
    %cst_222 = arith.constant 1.000000e+00 : f32
    %546 = vector.broadcast %cst_222 : f32 to vector<2x64xf32>
    %547 = arith.addf %546, %545 : vector<2x64xf32>
    %548 = arith.divf %546, %547 : vector<2x64xf32>
    %549 = arith.negf %541 : vector<2x64xf32>
    %550 = math.exp %549 : vector<2x64xf32>
    %cst_223 = arith.constant 1.000000e+00 : f32
    %551 = vector.broadcast %cst_223 : f32 to vector<2x64xf32>
    %552 = arith.addf %551, %550 : vector<2x64xf32>
    %553 = arith.divf %551, %552 : vector<2x64xf32>
    %554 = arith.index_cast %c7_i32 : i32 to index
    %c0_224 = arith.constant 0 : index
    %c0_225 = arith.constant 0 : index
    %555 = vector.load %arg16[%554, %c0_224, %c0_225] : memref<8x2x64xf32, #tpu.memory_space<vmem>>, vector<1x2x64xf32>
    %556 = vector.shape_cast %555 : vector<1x2x64xf32> to vector<2x64xf32>
    %557 = arith.mulf %548, %543 : vector<2x64xf32>
    %558 = arith.addf %556, %557 : vector<2x64xf32>
    %559 = math.tanh %558 : vector<2x64xf32>
    %cst_226 = arith.constant 1.000000e+00 : f32
    %560 = vector.broadcast %cst_226 : f32 to vector<2x64xf32>
    %561 = arith.subf %560, %553 : vector<2x64xf32>
    %562 = arith.mulf %561, %559 : vector<2x64xf32>
    %563 = arith.mulf %553, %498 : vector<2x64xf32>
    %564 = arith.addf %562, %563 : vector<2x64xf32>
    %565 = tpu.concatenate %564, %525 in 1 : vector<2x64xf32>, vector<2x64xf32> -> vector<2x128xf32>
    %cst_227 = arith.constant dense<0.000000e+00> : vector<2x64xf32>
    %566 = tpu.matmul %565, %36, %cst_227 {dimension_numbers = #tpu.dot_dimension_numbers<[1], [0], [0], [1], [0, 0, 1, 1], [], []>} : vector<2x128xf32>, vector<128x64xf32>, vector<2x64xf32> -> vector<2x64xf32>
    %567 = arith.addf %566, %56 : vector<2x64xf32>
    %568 = arith.negf %567 : vector<2x64xf32>
    %569 = math.exp %568 : vector<2x64xf32>
    %cst_228 = arith.constant 1.000000e+00 : f32
    %570 = vector.broadcast %cst_228 : f32 to vector<2x64xf32>
    %571 = arith.addf %570, %569 : vector<2x64xf32>
    %572 = arith.divf %570, %571 : vector<2x64xf32>
    %cst_229 = arith.constant dense<0.000000e+00> : vector<2x64xf32>
    %573 = tpu.matmul %565, %38, %cst_229 {dimension_numbers = #tpu.dot_dimension_numbers<[1], [0], [0], [1], [0, 0, 1, 1], [], []>} : vector<2x128xf32>, vector<128x64xf32>, vector<2x64xf32> -> vector<2x64xf32>
    %574 = arith.addf %573, %60 : vector<2x64xf32>
    %575 = arith.negf %574 : vector<2x64xf32>
    %576 = math.exp %575 : vector<2x64xf32>
    %cst_230 = arith.constant 1.000000e+00 : f32
    %577 = vector.broadcast %cst_230 : f32 to vector<2x64xf32>
    %578 = arith.addf %577, %576 : vector<2x64xf32>
    %579 = arith.divf %577, %578 : vector<2x64xf32>
    %cst_231 = arith.constant dense<0.000000e+00> : vector<2x64xf32>
    %580 = tpu.matmul %564, %39, %cst_231 {dimension_numbers = #tpu.dot_dimension_numbers<[1], [0], [0], [1], [0, 0, 1, 1], [], []>} : vector<2x64xf32>, vector<64x64xf32>, vector<2x64xf32> -> vector<2x64xf32>
    %581 = arith.addf %580, %63 : vector<2x64xf32>
    %cst_232 = arith.constant dense<0.000000e+00> : vector<2x64xf32>
    %582 = tpu.matmul %525, %40, %cst_232 {dimension_numbers = #tpu.dot_dimension_numbers<[1], [0], [0], [1], [0, 0, 1, 1], [], []>} : vector<2x64xf32>, vector<64x64xf32>, vector<2x64xf32> -> vector<2x64xf32>
    %583 = arith.addf %582, %66 : vector<2x64xf32>
    %584 = arith.mulf %572, %583 : vector<2x64xf32>
    %585 = arith.addf %581, %584 : vector<2x64xf32>
    %586 = math.tanh %585 : vector<2x64xf32>
    %cst_233 = arith.constant 1.000000e+00 : f32
    %587 = vector.broadcast %cst_233 : f32 to vector<2x64xf32>
    %588 = arith.subf %587, %579 : vector<2x64xf32>
    %589 = arith.mulf %588, %586 : vector<2x64xf32>
    %590 = arith.mulf %579, %525 : vector<2x64xf32>
    %591 = arith.addf %589, %590 : vector<2x64xf32>
    %592 = arith.index_cast %c7_i32 : i32 to index
    %c0_234 = arith.constant 0 : index
    %c0_235 = arith.constant 0 : index
    %593 = vector.load %arg17[%592, %c0_234, %c0_235] : memref<8x2x64xf32, #tpu.memory_space<vmem>>, vector<1x2x64xf32>
    %594 = vector.shape_cast %593 : vector<1x2x64xf32> to vector<2x64xf32>
    %595 = vector.shape_cast %591 : vector<2x64xf32> to vector<1x2x64xf32>
    tpu.vector_store %arg17[%592, %c0_234, %c0_235], %595 {strides = array<i32>} : memref<8x2x64xf32, #tpu.memory_space<vmem>>, vector<1x2x64xf32>,
    %c8_i32 = arith.constant 8 : i32
    %c0_236 = arith.constant 0 : index
    %c0_237 = arith.constant 0 : index
    %c0_238 = arith.constant 0 : index
    %596 = vector.load %arg17[%c0_236, %c0_237, %c0_238] : memref<8x2x64xf32, #tpu.memory_space<vmem>>, vector<8x2x64xf32>
    %cst_239 = arith.constant 0.000000e+00 : f32
    %597 = vector.broadcast %cst_239 : f32 to vector<8x2x64xf32>
    %598 = arith.maximumf %596, %597 : vector<8x2x64xf32>
    %599 = vector.shape_cast %598 : vector<8x2x64xf32> to vector<16x64xf32>
    %c0_240 = arith.constant 0 : index
    %c0_241 = arith.constant 0 : index
    %600 = vector.load %arg11[%c0_240, %c0_241] : memref<64x1xf32, #tpu.memory_space<vmem>>, vector<64x1xf32>
    %cst_242 = arith.constant dense<0.000000e+00> : vector<16x1xf32>
    %601 = tpu.matmul %599, %600, %cst_242 {dimension_numbers = #tpu.dot_dimension_numbers<[1], [0], [0], [1], [0, 0, 1, 1], [], []>} : vector<16x64xf32>, vector<64x1xf32>, vector<16x1xf32> -> vector<16x1xf32>
    %c0_243 = arith.constant 0 : index
    %c0_244 = arith.constant 0 : index
    %602 = memref.load %arg12[%c0_243, %c0_244] : memref<1x1xf32, #tpu.memory_space<smem>>
    %603 = vector.broadcast %602 : f32 to vector<16x1xf32>
    %604 = arith.addf %601, %603 : vector<16x1xf32>
    %605 = vector.shape_cast %604 : vector<16x1xf32> to vector<8x2x1xf32>
    %c0_245 = arith.constant 0 : index
    %c0_246 = arith.constant 0 : index
    %c0_247 = arith.constant 0 : index
    %606 = vector.load %arg13[%c0_245, %c0_246, %c0_247] : memref<8x2x1xf32, #tpu.memory_space<vmem>>, vector<8x2x1xf32>
    tpu.vector_store %arg13[%c0_245, %c0_246, %c0_247], %605 {strides = array<i32>} : memref<8x2x1xf32, #tpu.memory_space<vmem>>, vector<8x2x1xf32>,
    return
  }
}

</mosaic_0001>

<bundles_post_ra>
// kernel: tpu_custom_call.1
= control target key start
LH: loop header
LB: loop body
LE: loop exit
PB: predicated region body
PF: predicated region fallthrough
CT: control target
= control target key end

     0   :  { %19 = vsyncpa [#allocation8], 0  ;;  %s7826_s25 = smov [#allocation7]   ;;  %s10721_s0 = inlined_call_operand.vmem [shape: f32[8,2,50], index: 0, kind: input, shape index: {}]   ;;  %s10722_s1 = inlined_call_operand.vmem [shape: f32[3,50,64], index: 1, kind: input, shape index: {}]   ;;  %s10723_s2 = inlined_call_operand.vmem [shape: f32[3,1,64], index: 2, kind: input, shape index: {}]   ;;  %s10724_s3 = inlined_call_operand.vmem [shape: f32[3,64,64], index: 3, kind: input, shape index: {}]   ;;  %s10725_s4 = inlined_call_operand.vmem [shape: f32[3,1,64], index: 4, kind: input, shape index: {}]   ;;  %s10726_s5 = inlined_call_operand.vmem [shape: f32[2,128,64], index: 5, kind: input, shape index: {}]   ;;  %s10727_s6 = inlined_call_operand.vmem [shape: f32[2,1,64], index: 6, kind: input, shape index: {}]   ;;  %s10728_s7 = inlined_call_operand.vmem [shape: f32[64,64], index: 7, kind: input, shape index: {}]   ;;  %s10729_s8 = inlined_call_operand.vmem [shape: f32[1,64], index: 8, kind: input, shape index: {}]   ;;  %s10730_s9 = inlined_call_operand.hbm [shape: f32[64,64], index: 9, kind: input, shape index: {}]   ;;  %s10731_s10 = inlined_call_operand.vmem [shape: f32[1,64], index: 10, kind: input, shape index: {}]   ;;  %s10732_s11 = inlined_call_operand.vmem [shape: f32[64,1], index: 11, kind: input, shape index: {}]   ;;  %s10733_s12 = inlined_call_operand.<no memory space> [shape: f32[1,1], index: 12, kind: input, shape index: {}]   ;;  %s10734_s13 = inlined_call_operand.vmem [shape: f32[8,2,1], index: 13, kind: output, shape index: {}]  }
   0x1   :  { %s43_s26 = sshll.u32 %s7826_s25, 4  ;;  %s44_s26 = int_to_ptr.vmem [resolvable:$true] %s43_s26 }
   0x2   :  { %s7812_s27 = scalar_lea.vmem %s44_s26, 1024  ;;  %p7817_p1 = scmp.lt.s32.totalorder %s44_s26, %s44_s26 }
   0x3   :  { %p7813_p0 = scmp.ne.s32.totalorder %s44_s26, %s7812_s27  ;;  %p7818_p2 = scmp.lt.s32.totalorder %s7812_s27, %s7812_s27 }
   0x5   :  { %p7819_p3 = por %p7818_p2, %p7817_p1 }
   0x7   :  { %p7820_p4 = pnand %p7819_p3, %p7813_p0 }
   0x9   :  { %7823 = shalt.err (!%p7820_p4)
}
   0xa   :  { %s7827_s28 = smov 128   ;;  %s7828_s29 = smov 8  }
   0xb   :  { %49 = dma.hbm_to_vmem [thread:$0]  %s10730_s9, 1024, %s44_s26, [#allocation8], %s7827_s28, %s7827_s28, %s7828_s29  }
   0xc   :  { %7824 = dma.done.wait [#allocation8], 1024  }
   0xd   :  { %7825 = vsyncadd [#allocation8], 4294966272  ;;  %v7829_v0 = vmov 1983009808   ;;  %v94_v2 = vlaneseq  ;;  %vm128_vm0 = vcmask 1041408   ;;  %v72_v5 = vld [vmem:[%s10722_s1 + $0x28] sm:$0xff] }
   0xe   :  { %v92_v1 = vunpack.c.l.s4 %v7829_v0  ;;  %v73_v3 = vld [vmem:[%s10722_s1 + $0x30] sm:$0x3]  ;;  %v5288_v4 = vld [vmem:[%s10722_s1 + $0x68] sm:$0x3]  ;;  %v5287_v8 = vld [vmem:[%s10722_s1 + $0x60] sm:$0xff]  ;;  %vm123_vm1 = vcmask 408576  }
   0xf   :  { %v95_v7 = vshrl.u32 %v94_v2, 7  ;;  %6089 = vmatprep.subr.msk.mxu0 %vm128_vm0, %v73_v3  ;;  %6106 = vmatprep.subr.msk.mxu1 %vm128_vm0, %v5288_v4  ;;  %v71_v9 = vld [vmem:[%s10722_s1 + $0x20] sm:$0xff]  ;;  %v5286_v10 = vld [vmem:[%s10722_s1 + $0x58] sm:$0xff]  ;;  %v5285_v12 = vld [vmem:[%s10722_s1 + $0x50] sm:$0xff]  ;;  %v10740_v41 = vmov 0.0   ;;  %vm7831_vm2 = vmmov 0  }
  0x10   :  { %v93_v6 = vunpack.c.0.s8 %v92_v1  ;;  %6090 = vmatpush3.msk.msra.mxu0 %vm128_vm0, %v73_v3  ;;  %6107 = vmatpush3.msk.msra.mxu1 %vm128_vm0, %v5288_v4  ;;  %v70_v11 = vld [vmem:[%s10722_s1 + $0x18] sm:$0xff]  ;;  %v69_v13 = vld [vmem:[%s10722_s1 + $0x10] sm:$0xff]  ;;  %v5284_v14 = vld [vmem:[%s10722_s1 + $0x48] sm:$0xff]  ;;  %vm251_vm3 = vcmask 517120   ;;  %vm680_vm4 = vcmask 523264   ;;  %s7832_s22 = smov 64  }
  0x11   :  { %6091 = vmatprep.subr.mxu0 %v72_v5  ;;  %6108 = vmatprep.subr.mxu1 %v5287_v8  ;;  %v59_v15 = vld [vmem:[%s10721_s0] sm:$0x3]  ;;  %v60_v17 = vld [vmem:[%s10721_s0 + $0x2] sm:$0x3]  ;;  %v61_v18 = vld [vmem:[%s10721_s0 + $0x4] sm:$0x3] }
  0x12   :  { %6092 = vmatpush3.msra.mxu0 %v72_v5  ;;  %6109 = vmatpush3.msra.mxu1 %v5287_v8  ;;  %v7943_v16 = vsub.s32 %v93_v6, %v95_v7  ;;  %v62_v19 = vld [vmem:[%s10721_s0 + $0x6] sm:$0x3]  ;;  %v89_v20 = vcombine.low %v59_v15, %v60_v17  ;;  %v63_v22 = vld [vmem:[%s10721_s0 + $0x8] sm:$0x3]  ;;  %v64_v23 = vld [vmem:[%s10721_s0 + $0xa] sm:$0x3] }
  0x13   :  { %6093 = vmatprep.subr.mxu0 %v71_v9  ;;  %6110 = vmatprep.subr.mxu1 %v5286_v10  ;;  %v90_v21 = vcombine.low %v61_v18, %v62_v19  ;;  %v65_v24 = vld [vmem:[%s10721_s0 + $0xc] sm:$0x3]  ;;  %v66_v25 = vld [vmem:[%s10721_s0 + $0xe] sm:$0x3]  ;;  %v106_v26 = vcombine.low %v63_v22, %v64_v23  ;;  %v5283_v28 = vld [vmem:[%s10722_s1 + $0x40] sm:$0xff]  ;;  %vm5264_vm5 = vcmask 1024  }
  0x14   :  { %10896 = vst [vmem:[#allocation10_spill] sm:$0xff] %v7943_v16  ;;  %6094 = vmatpush3.msra.mxu0 %v71_v9  ;;  %6111 = vmatpush3.msra.mxu1 %v5286_v10  ;;  %v68_v27 = vld [vmem:[%s10722_s1 + $0x8] sm:$0xff]  ;;  %v97_v29 = vrot.slane %v89_v20, %v7943_v16  ;;  %v107_v31 = vcombine.low %v65_v24, %v66_v25  ;;  %v67_v33 = vld [vmem:[%s10722_s1] sm:$0xff]  ;;  %v5282_v34 = vld [vmem:[%s10722_s1 + $0x38] sm:$0xff] }
  0x15   :  { %6095 = vmatprep.subr.mxu0 %v70_v11  ;;  %6112 = vmatprep.subr.mxu1 %v5285_v12  ;;  %v104_v30 = vrot.slane %v90_v21, %v7943_v16  ;;  %v114_v32 = vrot.slane %v106_v26, %v7943_v16  ;;  %v5300_v38 = vld [vmem:[%s10722_s1 + $0xa0] sm:$0x3]  ;;  %v7990_v39 = vld [vmem:[%s10724_s3 + $0x38] sm:$0xff]  ;;  %v8002_v42 = vld [vmem:[%s10724_s3 + $0x30] sm:$0xff] }
  0x16   :  { %6096 = vmatpush3.msra.mxu0 %v70_v11  ;;  %6113 = vmatpush3.msra.mxu1 %v5285_v12  ;;  %v121_v36 = vrot.slane %v107_v31, %v7943_v16  ;;  %v5299_v40 = vld [vmem:[%s10722_s1 + $0x98] sm:$0xff]  ;;  %v5298_v43 = vld [vmem:[%s10722_s1 + $0x90] sm:$0xff]  ;;  %v8013_v44 = vld [vmem:[%s10724_s3 + $0x28] sm:$0xff] }
  0x17   :  { %6097 = vmatprep.subr.mxu0 %v69_v13  ;;  %6114 = vmatprep.subr.mxu1 %v5284_v14  ;;  %v105_v35 = vcombine.low %v97_v29, %v104_v30  ;;  %v5297_v45 = vld [vmem:[%s10722_s1 + $0x88] sm:$0xff]  ;;  %v8023_v46 = vld [vmem:[%s10724_s3 + $0x20] sm:$0xff]  ;;  %v8033_v48 = vld [vmem:[%s10724_s3 + $0x18] sm:$0xff] }
  0x18   :  { %6098 = vmatpush3.msra.mxu0 %v69_v13  ;;  %6115 = vmatpush3.msra.mxu1 %v5284_v14  ;;  %v122_v37 = vcombine.low %v114_v32, %v121_v36  ;;  %v5296_v47 = vld [vmem:[%s10722_s1 + $0x80] sm:$0xff]  ;;  %v5295_v49 = vld [vmem:[%s10722_s1 + $0x78] sm:$0xff]  ;;  %v8043_v50 = vld [vmem:[%s10724_s3 + $0x10] sm:$0xff] }
  0x19   :  { %6099 = vmatprep.subr.mxu0 %v68_v27  ;;  %6116 = vmatprep.subr.mxu1 %v5283_v28  ;;  %v5294_v51 = vld [vmem:[%s10722_s1 + $0x70] sm:$0xff]  ;;  %v8053_v52 = vld [vmem:[%s10724_s3 + $0x8] sm:$0xff]  ;;  %v8061_v53 = vld [vmem:[%s10724_s3] sm:$0xff] }
  0x1a   :  { %6100 = vmatpush3.msra.mxu0 %v68_v27  ;;  %6117 = vmatpush3.msra.mxu1 %v5283_v28  ;;  %v8068_v54 = vld [vmem:[%s10724_s3 + $0x78] sm:$0xff]  ;;  %v8078_v55 = vld [vmem:[%s10724_s3 + $0x70] sm:$0xff]  ;;  %v8091_v57 = vld [vmem:[%s10724_s3 + $0x68] sm:$0xff] }
  0x1b   :  { %6101 = vmatprep.subr.mxu0 %v67_v33  ;;  %6118 = vmatprep.subr.mxu1 %v5282_v34  ;;  %v8085_v56 = vld [vmem:[%s10724_s3 + $0xb8] sm:$0xff]  ;;  %v8100_v58 = vld [vmem:[%s10724_s3 + $0xb0] sm:$0xff]  ;;  %v8106_v59 = vld [vmem:[%s10724_s3 + $0x60] sm:$0xff] }
  0x1c   :  { %6102 = vmatpush3.msra.mxu0 %v67_v33  ;;  %6103 = vmatprep.mubr.msk.f32.mxu0 %vm123_vm1, %v105_v35  ;;  %v8114_v60 = vld [vmem:[%s10724_s3 + $0xa8] sm:$0xff]  ;;  %v8120_v61 = vld [vmem:[%s10724_s3 + $0x58] sm:$0xff]  ;;  %v8128_v62 = vld [vmem:[%s10724_s3 + $0xa0] sm:$0xff] }
  0x1d   :  { %6119 = vmatpush3.msra.mxu1 %v5282_v34  ;;  %6120 = vmatprep.mubr.msk.f32.mxu1 %vm123_vm1, %v105_v35  ;;  %v8134_v63 = vld [vmem:[%s10724_s3 + $0x50] sm:$0xff]  ;;  %v8142_v0 = vld [vmem:[%s10724_s3 + $0x98] sm:$0xff]  ;;  %v8148_v1 = vld [vmem:[%s10724_s3 + $0x48] sm:$0xff] }
  0x1e   :  { %6104 = vmatmul.mubr.msk.f32.vlgmr.msra.gmra.mxu0 %vm123_vm1, %v122_v37  ;;  %6121 = vmatmul.mubr.msk.f32.vlgmr.msra.gmra.mxu1 %vm123_vm1, %v122_v37  ;;  %v8156_v2 = vld [vmem:[%s10724_s3 + $0x90] sm:$0xff]  ;;  %v8162_v3 = vld [vmem:[%s10724_s3 + $0x40] sm:$0xff]  ;;  %v8170_v4 = vld [vmem:[%s10724_s3 + $0x88] sm:$0xff] }
  0x1f   :  { %6123 = vmatprep.subr.msk.mxu0 %vm128_vm0, %v5300_v38  ;;  %6140 = vmatprep.subr.mxu1 %v10740_v41  ;;  %v8179_v5 = vld [vmem:[%s10724_s3 + $0x80] sm:$0xff]  ;;  %v8197_v6 = vld [vmem:[%s10726_s5 + $0x78] sm:$0xff]  ;;  %v8211_v8 = vld [vmem:[%s10726_s5 + $0x70] sm:$0xff] }
  0x20   :  { %6124 = vmatpush3.msk.msra.mxu0 %vm128_vm0, %v5300_v38  ;;  %6141 = vmatpush3.msra.mxu1 %v7990_v39  ;;  %v8202_v7 = vld [vmem:[%s10726_s5 + $0xf8] sm:$0xff]  ;;  %v8216_v9 = vld [vmem:[%s10726_s5 + $0xf0] sm:$0xff]  ;;  %v8225_v10 = vld [vmem:[%s10726_s5 + $0x68] sm:$0xff] }
  0x21   :  { %6125 = vmatprep.subr.mxu0 %v5299_v40  ;;  %6142 = vmatprep.subr.mxu1 %v10740_v41  ;;  %v8230_v11 = vld [vmem:[%s10726_s5 + $0xe8] sm:$0xff]  ;;  %v8239_v12 = vld [vmem:[%s10726_s5 + $0x60] sm:$0xff]  ;;  %v8253_v14 = vld [vmem:[%s10726_s5 + $0x58] sm:$0xff] }
  0x22   :  { %6126 = vmatpush3.msra.mxu0 %v5299_v40  ;;  %6143 = vmatpush3.msra.mxu1 %v8002_v42  ;;  %v8244_v13 = vld [vmem:[%s10726_s5 + $0xe0] sm:$0xff]  ;;  %v8258_v15 = vld [vmem:[%s10726_s5 + $0xd8] sm:$0xff]  ;;  %v8267_v17 = vld [vmem:[%s10726_s5 + $0x50] sm:$0xff] }
  0x23   :  { %6127 = vmatprep.subr.mxu0 %v5298_v43  ;;  %6144 = vmatprep.subr.mxu1 %v10740_v41  ;;  %v8272_v18 = vld [vmem:[%s10726_s5 + $0xd0] sm:$0xff]  ;;  %v8281_v19 = vld [vmem:[%s10726_s5 + $0x48] sm:$0xff]  ;;  %v8295_v21 = vld [vmem:[%s10726_s5 + $0x40] sm:$0xff] }
  0x24   :  { %6128 = vmatpush3.msra.mxu0 %v5298_v43  ;;  %6145 = vmatpush3.msra.mxu1 %v8013_v44  ;;  %v8286_v20 = vld [vmem:[%s10726_s5 + $0xc8] sm:$0xff]  ;;  %v8300_v22 = vld [vmem:[%s10726_s5 + $0xc0] sm:$0xff]  ;;  %v8309_v23 = vld [vmem:[%s10726_s5 + $0x38] sm:$0xff] }
  0x25   :  { %6129 = vmatprep.subr.mxu0 %v5297_v45  ;;  %6146 = vmatprep.subr.mxu1 %v10740_v41  ;;  %10897 = vst [vmem:[#allocation11_spill] sm:$0xff] %v8286_v20  ;;  %10898 = vst [vmem:[#allocation12_spill] sm:$0xff] %v8300_v22  ;;  %v8314_v24 = vld [vmem:[%s10726_s5 + $0xb8] sm:$0xff]  ;;  %v8323_v25 = vld [vmem:[%s10726_s5 + $0x30] sm:$0xff] }
  0x26   :  { %6130 = vmatpush3.msra.mxu0 %v5297_v45  ;;  %6147 = vmatpush3.msra.mxu1 %v8023_v46  ;;  %10899 = vst [vmem:[#allocation13_spill] sm:$0xff] %v8314_v24  ;;  %v8328_v26 = vld [vmem:[%s10726_s5 + $0xb0] sm:$0xff]  ;;  %v8337_v27 = vld [vmem:[%s10726_s5 + $0x28] sm:$0xff]  ;;  %v8351_v29 = vld [vmem:[%s10726_s5 + $0x20] sm:$0xff] }
  0x27   :  { %6131 = vmatprep.subr.mxu0 %v5296_v47  ;;  %6148 = vmatprep.subr.mxu1 %v10740_v41  ;;  %10900 = vst [vmem:[#allocation14_spill] sm:$0xff] %v8328_v26  ;;  %v8342_v28 = vld [vmem:[%s10726_s5 + $0xa8] sm:$0xff]  ;;  %v8356_v30 = vld [vmem:[%s10726_s5 + $0xa0] sm:$0xff]  ;;  %v8365_v31 = vld [vmem:[%s10726_s5 + $0x18] sm:$0xff] }
  0x28   :  { %6132 = vmatpush3.msra.mxu0 %v5296_v47  ;;  %6149 = vmatpush3.msra.mxu1 %v8033_v48  ;;  %10901 = vst [vmem:[#allocation15_spill] sm:$0xff] %v8342_v28  ;;  %10902 = vst [vmem:[#allocation16_spill] sm:$0xff] %v8356_v30  ;;  %v8370_v32 = vld [vmem:[%s10726_s5 + $0x98] sm:$0xff]  ;;  %v8379_v33 = vld [vmem:[%s10726_s5 + $0x10] sm:$0xff] }
  0x29   :  { %6133 = vmatprep.subr.mxu0 %v5295_v49  ;;  %6150 = vmatprep.subr.mxu1 %v10740_v41  ;;  %10903 = vst [vmem:[#allocation17_spill] sm:$0xff] %v8370_v32  ;;  %10904 = vst [vmem:[#allocation18_spill] sm:$0xff] %v8379_v33  ;;  %v8384_v34 = vld [vmem:[%s10726_s5 + $0x90] sm:$0xff]  ;;  %v8398_v36 = vld [vmem:[%s10726_s5 + $0x88] sm:$0xff] }
  0x2a   :  { %6134 = vmatpush3.msra.mxu0 %v5295_v49  ;;  %6151 = vmatpush3.msra.mxu1 %v8043_v50  ;;  %10905 = vst [vmem:[#allocation19_spill] sm:$0xff] %v8384_v34  ;;  %10907 = vst [vmem:[#allocation21_spill] sm:$0xff] %v8398_v36  ;;  %v8412_v38 = vld [vmem:[%s10726_s5 + $0x80] sm:$0xff] }
  0x2b   :  { %6135 = vmatprep.subr.mxu0 %v5294_v51  ;;  %6152 = vmatprep.subr.mxu1 %v10740_v41  ;;  %10909 = vst [vmem:[#allocation23_spill] sm:$0xff] %v8412_v38  ;;  %v5278_v40 = vld [vmem:[%s10723_s2] ss:$0 sm:$0xff]  ;;  %v5290_v43 = vld [vmem:[%s10723_s2 + $0x1] ss:$0 sm:$0xff] }
  0x2c   :  { %6136 = vmatpush3.msra.mxu0 %v5294_v51  ;;  %6153 = vmatpush3.msra.mxu1 %v8053_v52 }
  0x2d   :  { %6137 = vmatprep.mubr.msk.f32.mxu0 %vm123_vm1, %v105_v35  ;;  %6154 = vmatprep.subr.mxu1 %v10740_v41  ;;  %v8393_v35 = vld [vmem:[%s10726_s5 + $0x8] sm:$0xff] }
  0x2e   :  { %6159 = vmatprep.subr.mxu0 %v10740_v41  ;;  %6138 = vmatmul.mubr.msk.f32.vlgmr.msra.gmra.mxu0 %vm123_vm1, %v122_v37  ;;  %10906 = vst [vmem:[#allocation20_spill] sm:$0xff] %v8393_v35  ;;  %v8407_v37 = vld [vmem:[%s10726_s5] sm:$0xff] }
  0x2f   :  { %6155 = vmatpush3.msra.mxu1 %v8061_v53  ;;  %6156 = vmatprep.mubr.msk.f32.mxu1 %vm7831_vm2, %v10740_v41  ;;  %10908 = vst [vmem:[#allocation22_spill] sm:$0xff] %v8407_v37 }
  0x30   :  { %6160 = vmatpush3.msra.mxu0 %v8068_v54  ;;  %6157 = vmatmul.mubr.f32.vlgmr.msra.gmra.mxu1 %v10740_v41 }
  0x31   :  { %6161 = vmatprep.subr.mxu0 %v10740_v41  ;;  %6175 = vmatprep.mubr.msk.f32.mxu0 %vm7831_vm2, %v10740_v41 }
  0x32   :  { %6162 = vmatpush3.msra.mxu0 %v8078_v55  ;;  %6178 = vmatprep.subr.mxu1 %v10740_v41 }
  0x33   :  { %6163 = vmatprep.subr.mxu0 %v10740_v41  ;;  %6179 = vmatpush3.msra.mxu1 %v8085_v56 }
  0x34   :  { %6164 = vmatpush3.msra.mxu0 %v8091_v57  ;;  %6180 = vmatprep.subr.mxu1 %v10740_v41 }
  0x35   :  { %6165 = vmatprep.subr.mxu0 %v10740_v41  ;;  %6181 = vmatpush3.msra.mxu1 %v8100_v58 }
  0x36   :  { %6166 = vmatpush3.msra.mxu0 %v8106_v59  ;;  %6182 = vmatprep.subr.mxu1 %v10740_v41 }
  0x37   :  { %6167 = vmatprep.subr.mxu0 %v10740_v41  ;;  %6183 = vmatpush3.msra.mxu1 %v8114_v60 }
  0x38   :  { %6168 = vmatpush3.msra.mxu0 %v8120_v61  ;;  %6184 = vmatprep.subr.mxu1 %v10740_v41 }
  0x39   :  { %6169 = vmatprep.subr.mxu0 %v10740_v41  ;;  %6185 = vmatpush3.msra.mxu1 %v8128_v62 }
  0x3a   :  { %6170 = vmatpush3.msra.mxu0 %v8134_v63  ;;  %6186 = vmatprep.subr.mxu1 %v10740_v41 }
  0x3b   :  { %6171 = vmatprep.subr.mxu0 %v10740_v41  ;;  %6187 = vmatpush3.msra.mxu1 %v8142_v0 }
  0x3c   :  { %6172 = vmatpush3.msra.mxu0 %v8148_v1  ;;  %6188 = vmatprep.subr.mxu1 %v10740_v41 }
  0x3d   :  { %6173 = vmatprep.subr.mxu0 %v10740_v41  ;;  %6189 = vmatpush3.msra.mxu1 %v8156_v2 }
  0x3e   :  { %6174 = vmatpush3.msra.mxu0 %v8162_v3  ;;  %6190 = vmatprep.subr.mxu1 %v10740_v41 }
  0x3f   :  { %6176 = vmatmul.mubr.f32.vlgmr.msra.gmra.mxu0 %v10740_v41  ;;  %6191 = vmatpush3.msra.mxu1 %v8170_v4 }
  0x40   :  { %6192 = vmatprep.subr.mxu1 %v10740_v41  ;;  %6194 = vmatprep.mubr.msk.f32.mxu1 %vm7831_vm2, %v10740_v41 }
  0x41   :  { %6193 = vmatpush3.msra.mxu1 %v8179_v5  ;;  %6197 = vmatprep.subr.mxu0 %v10740_v41 }
  0x42   :  { %6195 = vmatmul.mubr.f32.vlgmr.msra.gmra.mxu1 %v10740_v41  ;;  %6232 = vmatprep.subr.mxu1 %v10740_v41 }
  0x43   :  { %6229 = vmatprep.mubr.msk.f32.mxu0 %vm7831_vm2, %v10740_v41  ;;  %6264 = vmatprep.mubr.msk.f32.mxu1 %vm7831_vm2, %v10740_v41 }
  0x44   :  { %6198 = vmatpush3.msra.mxu0 %v8197_v6  ;;  %6233 = vmatpush3.msra.mxu1 %v8202_v7 }
  0x45   :  { %6199 = vmatprep.subr.mxu0 %v10740_v41  ;;  %6234 = vmatprep.subr.mxu1 %v10740_v41 }
  0x46   :  { %6200 = vmatpush3.msra.mxu0 %v8211_v8  ;;  %6235 = vmatpush3.msra.mxu1 %v8216_v9 }
  0x47   :  { %6201 = vmatprep.subr.mxu0 %v10740_v41  ;;  %6236 = vmatprep.subr.mxu1 %v10740_v41 }
  0x48   :  { %6202 = vmatpush3.msra.mxu0 %v8225_v10  ;;  %6237 = vmatpush3.msra.mxu1 %v8230_v11 }
  0x49   :  { %6203 = vmatprep.subr.mxu0 %v10740_v41  ;;  %6238 = vmatprep.subr.mxu1 %v10740_v41 }
  0x4a   :  { %6204 = vmatpush3.msra.mxu0 %v8239_v12  ;;  %6239 = vmatpush3.msra.mxu1 %v8244_v13 }
  0x4b   :  { %6205 = vmatprep.subr.mxu0 %v10740_v41  ;;  %6240 = vmatprep.subr.mxu1 %v10740_v41 }
  0x4c   :  { %6206 = vmatpush3.msra.mxu0 %v8253_v14  ;;  %6241 = vmatpush3.msra.mxu1 %v8258_v15 }
  0x4d   :  { %6207 = vmatprep.subr.mxu0 %v10740_v41  ;;  %6242 = vmatprep.subr.mxu1 %v10740_v41 }
  0x4e   :  { %6208 = vmatpush3.msra.mxu0 %v8267_v17  ;;  %6243 = vmatpush3.msra.mxu1 %v8272_v18 }
  0x4f   :  { %6209 = vmatprep.subr.mxu0 %v10740_v41  ;;  %6244 = vmatprep.subr.mxu1 %v10740_v41 }
  0x50   :  { %6210 = vmatpush3.msra.mxu0 %v8281_v19  ;;  %6245 = vmatpush3.msra.mxu1 %v8286_v20 }
  0x51   :  { %6211 = vmatprep.subr.mxu0 %v10740_v41  ;;  %6246 = vmatprep.subr.mxu1 %v10740_v41 }
  0x52   :  { %6212 = vmatpush3.msra.mxu0 %v8295_v21  ;;  %6247 = vmatpush3.msra.mxu1 %v8300_v22 }
  0x53   :  { %6213 = vmatprep.subr.mxu0 %v10740_v41  ;;  %6248 = vmatprep.subr.mxu1 %v10740_v41 }
  0x54   :  { %6214 = vmatpush3.msra.mxu0 %v8309_v23  ;;  %6249 = vmatpush3.msra.mxu1 %v8314_v24 }
  0x55   :  { %6215 = vmatprep.subr.mxu0 %v10740_v41  ;;  %6250 = vmatprep.subr.mxu1 %v10740_v41 }
  0x56   :  { %6216 = vmatpush3.msra.mxu0 %v8323_v25  ;;  %6251 = vmatpush3.msra.mxu1 %v8328_v26 }
  0x57   :  { %6217 = vmatprep.subr.mxu0 %v10740_v41  ;;  %6252 = vmatprep.subr.mxu1 %v10740_v41 }
  0x58   :  { %6218 = vmatpush3.msra.mxu0 %v8337_v27  ;;  %6253 = vmatpush3.msra.mxu1 %v8342_v28 }
  0x59   :  { %6219 = vmatprep.subr.mxu0 %v10740_v41  ;;  %6254 = vmatprep.subr.mxu1 %v10740_v41 }
  0x5a   :  { %6220 = vmatpush3.msra.mxu0 %v8351_v29  ;;  %6255 = vmatpush3.msra.mxu1 %v8356_v30 }
  0x5b   :  { %6221 = vmatprep.subr.mxu0 %v10740_v41  ;;  %6256 = vmatprep.subr.mxu1 %v10740_v41 }
  0x5c   :  { %6222 = vmatpush3.msra.mxu0 %v8365_v31  ;;  %6257 = vmatpush3.msra.mxu1 %v8370_v32 }
  0x5d   :  { %6223 = vmatprep.subr.mxu0 %v10740_v41  ;;  %6258 = vmatprep.subr.mxu1 %v10740_v41 }
  0x5e   :  { %6224 = vmatpush3.msra.mxu0 %v8379_v33  ;;  %6259 = vmatpush3.msra.mxu1 %v8384_v34 }
  0x5f   :  { %6225 = vmatprep.subr.mxu0 %v10740_v41  ;;  %6260 = vmatprep.subr.mxu1 %v10740_v41 }
  0x60   :  { %6226 = vmatpush3.msra.mxu0 %v8393_v35  ;;  %6261 = vmatpush3.msra.mxu1 %v8398_v36 }
  0x61   :  { %6227 = vmatprep.subr.mxu0 %v10740_v41  ;;  %6262 = vmatprep.subr.mxu1 %v10740_v41 }
  0x62   :  { %6228 = vmatpush3.msra.mxu0 %v8407_v37  ;;  %6263 = vmatpush3.msra.mxu1 %v8412_v38 }
  0x63   :  { %6267 = vmatprep.subr.mxu0 %v10740_v41  ;;  %6286 = vmatprep.subr.mxu1 %v10740_v41 }
  0xde   :  { %v6105_v45 = vpop.f32.mrf.mxu0  ;;  %v6122_v47 = vpop.f32.mrf.mxu1 }
  0xdf   :  { %v204_v49 = vadd.f32 %v6105_v45, %v5278_v40  ;;  %v351_v51 = vadd.f32 %v6122_v47, %v5290_v43 }
  0xe0   :  { %v198_v36 = vpop.f32.mrf.mxu0  ;;  %v345_v34 = vpop.f32.mrf.mxu1 }
  0xe1   :  { %v226_v38 = vcombine.high %v204_v49, %v204_v49  ;;  %v233_v32 = vrot.slane %v204_v49, %v7943_v16  ;;  %v373_v30 = vcombine.high %v351_v51, %v351_v51  ;;  %v380_v41 = vrot.slane %v351_v51, %v7943_v16 }
  0xe2   :  { %v199_v28 = vadd.f32 %v5278_v40, %v198_v36  ;;  %v346_v26 = vadd.f32 %v5290_v43, %v345_v34 }
  0xe3   :  { %v240_v37 = vrot.slane %v226_v38, %v7943_v16  ;;  %v241_v24 = vcombine.high %v233_v32, %v233_v32  ;;  %256 = vst.msk [vmem:[#allocation2 + $0x8] sm:$0x3] %vm251_vm3, %v233_v32  ;;  %v387_v35 = vrot.slane %v373_v30, %v7943_v16  ;;  %v388_v45 = vcombine.high %v380_v41, %v380_v41 }
  0xe4   :  { %402 = vst.msk [vmem:[#allocation3 + $0x8] sm:$0x3] %vm251_vm3, %v380_v41  ;;  %v209_v47 = vcombine.high %v199_v28, %v199_v28  ;;  %v216_v22 = vrot.slane %v199_v28, %v7943_v16  ;;  %v356_v33 = vcombine.high %v346_v26, %v346_v26  ;;  %v363_v49 = vrot.slane %v346_v26, %v7943_v16 }
  0xe5   :  { %v242_v20 = vcombine.high %v240_v37, %v240_v37  ;;  %257 = vst.msk [vmem:[#allocation2 + $0xa] sm:$0x3] %vm251_vm3, %v241_v24  ;;  %258 = vst.msk [vmem:[#allocation2 + $0xc] sm:$0x3] %vm251_vm3, %v240_v37  ;;  %v389_v34 = vcombine.high %v387_v35, %v387_v35 }
  0xe6   :  { %403 = vst.msk [vmem:[#allocation3 + $0xa] sm:$0x3] %vm251_vm3, %v388_v45  ;;  %404 = vst.msk [vmem:[#allocation3 + $0xc] sm:$0x3] %vm251_vm3, %v387_v35  ;;  %v223_v30 = vrot.slane %v209_v47, %v7943_v16  ;;  %v224_v32 = vcombine.high %v216_v22, %v216_v22  ;;  %v370_v41 = vrot.slane %v356_v33, %v7943_v16  ;;  %v8454_v35 = vld [vmem:[%s10725_s4] ss:$0 sm:$0xff] }
  0xe7   :  { %252 = vst.msk [vmem:[#allocation2] sm:$0x3] %vm251_vm3, %v216_v22  ;;  %v371_v28 = vcombine.high %v363_v49, %v363_v49  ;;  %398 = vst.msk [vmem:[#allocation3] sm:$0x3] %vm251_vm3, %v363_v49 }
  0xe8   :  { %259 = vst.msk [vmem:[#allocation2 + $0xe] sm:$0x3] %vm251_vm3, %v242_v20  ;;  %405 = vst.msk [vmem:[#allocation3 + $0xe] sm:$0x3] %vm251_vm3, %v389_v34  ;;  %v225_v24 = vcombine.high %v223_v30, %v223_v30  ;;  %v372_v26 = vcombine.high %v370_v41, %v370_v41  ;;  %v5302_v20 = vld [vmem:[%s10723_s2 + $0x2] ss:$0 sm:$0xff] }
  0xe9   :  { %253 = vst.msk [vmem:[#allocation2 + $0x2] sm:$0x3] %vm251_vm3, %v224_v32  ;;  %254 = vst.msk [vmem:[#allocation2 + $0x4] sm:$0x3] %vm251_vm3, %v223_v30 }
  0xea   :  { %399 = vst.msk [vmem:[#allocation3 + $0x2] sm:$0x3] %vm251_vm3, %v371_v28  ;;  %400 = vst.msk [vmem:[#allocation3 + $0x4] sm:$0x3] %vm251_vm3, %v370_v41 }
  0xeb   :  { %255 = vst.msk [vmem:[#allocation2 + $0x6] sm:$0x3] %vm251_vm3, %v225_v24  ;;  %401 = vst.msk [vmem:[#allocation3 + $0x6] sm:$0x3] %vm251_vm3, %v372_v26 }
  0xee   :  { %v6139_v22 = vpop.f32.mrf.mxu0  ;;  %v679_v36 = vld [vmem:[#allocation2] sm:$0x3] }
  0xef   :  { %v497_v33 = vadd.f32 %v6139_v22, %v5302_v20 }
  0xf0   :  { %v750_v37 = vpop.f32.mrf.mxu1  ;;  %v491_v38 = vpop.f32.mrf.mxu0 }
  0xf1   :  { %v519_v40 = vcombine.high %v497_v33, %v497_v33  ;;  %v526_v43 = vrot.slane %v497_v33, %v7943_v16  ;;  %v754_v51 = vadd.f32 %v750_v37, %v679_v36  ;;  %v492_v45 = vadd.f32 %v5302_v20, %v491_v38  ;;  %v8472_v33 = vld [vmem:[%s10725_s4 + $0x1] ss:$0 sm:$0xff]  ;;  %v756_v36 = vld [vmem:[#allocation3] sm:$0x3] }
  0xf2   :  { %v6158_v47 = vpop.f32.mrf.mxu1 }
  0xf3   :  { %v533_v49 = vrot.slane %v519_v40, %v7943_v16  ;;  %v534_v34 = vcombine.high %v526_v43, %v526_v43  ;;  %548 = vst.msk [vmem:[#allocation4 + $0x8] sm:$0x3] %vm251_vm3, %v526_v43  ;;  %v755_v30 = vadd.f32 %v8454_v35, %v754_v51  ;;  %v502_v32 = vcombine.high %v492_v45, %v492_v45 }
  0xf4   :  { %v509_v41 = vrot.slane %v492_v45, %v7943_v16 }
  0xf5   :  { %v535_v28 = vcombine.high %v533_v49, %v533_v49  ;;  %549 = vst.msk [vmem:[#allocation4 + $0xa] sm:$0x3] %vm251_vm3, %v534_v34  ;;  %550 = vst.msk [vmem:[#allocation4 + $0xc] sm:$0x3] %vm251_vm3, %v533_v49  ;;  %v5348_v24 = vmul.f32 -1.442695, %v755_v30  ;;  %v516_v26 = vrot.slane %v502_v32, %v7943_v16 }
  0xf6   :  { %v517_v20 = vcombine.high %v509_v41, %v509_v41  ;;  %544 = vst.msk [vmem:[#allocation4] sm:$0x3] %vm251_vm3, %v509_v41  ;;  %v8478_v30 = vld [vmem:[%s10725_s4 + $0x2] ss:$0 sm:$0xff] }
  0xf7   :  { %551 = vst.msk [vmem:[#allocation4 + $0xe] sm:$0x3] %vm251_vm3, %v535_v28  ;;  %7486 = vpow2.f32 %v5348_v24  ;;  %v518_v22 = vcombine.high %v516_v26, %v516_v26  ;;  %546 = vst.msk [vmem:[#allocation4 + $0x4] sm:$0x3] %vm251_vm3, %v516_v26  ;;  %v8567_v16 = vld [vmem:[#allocation7] sm:$0xff] }
  0xf8   :  { %545 = vst.msk [vmem:[#allocation4 + $0x2] sm:$0x3] %vm251_vm3, %v517_v20 }
  0xf9   :  { %547 = vst.msk [vmem:[#allocation4 + $0x6] sm:$0x3] %vm251_vm3, %v518_v22 }
  0xfd   :  { %v911_v20 = vld [vmem:[#allocation4] sm:$0x3] }
  0xff   :  { %v823_v37 = vpop.f32.mrf.mxu0 }
 0x100   :  { %v827_v38 = vadd.f32 %v823_v37, %v756_v36 }
 0x101   :  { %v6177_v40 = vpop.f32.mrf.mxu0 }
 0x102   :  { %v828_v43 = vadd.f32 %v8472_v33, %v827_v38  ;;  %v895_v51 = vpop.f32.mrf.mxu1 }
 0x103   :  { %v896_v32 = vadd.f32 %v8478_v30, %v895_v51  ;;  %v8486_v51 = vld [vmem:[%s10728_s7 + $0x38] sm:$0xff] }
 0x104   :  { %v7487_v45 = vpop.eup %7486  ;;  %v5349_v47 = vmul.f32 -1.442695, %v828_v43  ;;  %v6196_v49 = vpop.f32.mrf.mxu1 }
 0x105   :  { %v902_v34 = vadd.f32 1.0, %v7487_v45  ;;  %v8497_v49 = vld [vmem:[%s10728_s7 + $0x30] sm:$0xff] }
 0x106   :  { %7488 = vpow2.f32 %v5349_v47  ;;  %v8488_v47 = vld [vmem:[#allocation7 + $0x38] sm:$0xff] }
 0x107   :  { %7490 = vrcp.f32 %v902_v34  ;;  %v8499_v34 = vld [vmem:[#allocation7 + $0x30] sm:$0xff] }
 0x113   :  { %v7489_v41 = vpop.eup %7488 }
 0x114   :  { %v7491_v28 = vpop.eup %7490  ;;  %v908_v24 = vadd.f32 1.0, %v7489_v41  ;;  %v8508_v41 = vld [vmem:[%s10728_s7 + $0x28] sm:$0xff] }
 0x115   :  { %v912_v26 = vmul.f32 %v7491_v28, %v896_v32  ;;  %v10910_v32 = vmov 0.0   ;;  %v8510_v28 = vld [vmem:[#allocation7 + $0x28] sm:$0xff] }
 0x116   :  { %7492 = vrcp.f32 %v908_v24  ;;  %v8519_v24 = vld [vmem:[%s10728_s7 + $0x20] sm:$0xff] }
 0x117   :  { %v913_v22 = vadd.f32 %v912_v26, %v911_v20  ;;  %v8521_v26 = vld [vmem:[#allocation7 + $0x20] sm:$0xff]  ;;  %v8530_v20 = vld [vmem:[%s10728_s7 + $0x18] sm:$0xff] }
 0x119   :  { %7494 = vtanh.f32 %v913_v22  ;;  %v8532_v22 = vld [vmem:[#allocation7 + $0x18] sm:$0xff] }
 0x123   :  { %v7493_v36 = vpop.eup %7492 }
 0x124   :  { %v915_v37 = vsub.f32 1.0, %v7493_v36  ;;  %v917_v40 = vmul.f32 0.0, %v7493_v36  ;;  %v8541_v36 = vld [vmem:[%s10728_s7 + $0x10] sm:$0xff] }
 0x126   :  { %v7495_v38 = vpop.eup %7494 }
 0x127   :  { %v916_v43 = vmul.f32 %v7495_v38, %v915_v37  ;;  %v8543_v37 = vld [vmem:[#allocation7 + $0x10] sm:$0xff]  ;;  %v8552_v38 = vld [vmem:[%s10728_s7 + $0x8] sm:$0xff] }
 0x129   :  { %v8481_v45 = vadd.f32 %v917_v40, %v916_v43  ;;  %v8554_v40 = vld [vmem:[#allocation7 + $0x8] sm:$0xff]  ;;  %v8563_v43 = vld [vmem:[%s10728_s7] sm:$0xff] }
 0x12b   :  { %6230 = vmatmul.mubr.msk.f32.vlgmr.msra.gmra.mxu0 %vm680_vm4, %v8481_v45  ;;  %6265 = vmatmul.mubr.msk.f32.vlgmr.msra.gmra.mxu1 %vm680_vm4, %v8481_v45 }
 0x12c   :  { %6268 = vmatpush3.msra.mxu0 %v8486_v51  ;;  %6287 = vmatpush3.msra.mxu1 %v8488_v47 }
 0x12d   :  { %6269 = vmatprep.subr.mxu0 %v10910_v32  ;;  %6288 = vmatprep.subr.mxu1 %v10910_v32 }
 0x12e   :  { %6270 = vmatpush3.msra.mxu0 %v8497_v49  ;;  %6289 = vmatpush3.msra.mxu1 %v8499_v34 }
 0x12f   :  { %6271 = vmatprep.subr.mxu0 %v10910_v32  ;;  %6290 = vmatprep.subr.mxu1 %v10910_v32 }
 0x130   :  { %6272 = vmatpush3.msra.mxu0 %v8508_v41  ;;  %6291 = vmatpush3.msra.mxu1 %v8510_v28 }
 0x131   :  { %6273 = vmatprep.subr.mxu0 %v10910_v32  ;;  %6292 = vmatprep.subr.mxu1 %v10910_v32 }
 0x132   :  { %6274 = vmatpush3.msra.mxu0 %v8519_v24  ;;  %6293 = vmatpush3.msra.mxu1 %v8521_v26 }
 0x133   :  { %6275 = vmatprep.subr.mxu0 %v10910_v32  ;;  %6294 = vmatprep.subr.mxu1 %v10910_v32 }
 0x134   :  { %6276 = vmatpush3.msra.mxu0 %v8530_v20  ;;  %6295 = vmatpush3.msra.mxu1 %v8532_v22 }
 0x135   :  { %6277 = vmatprep.subr.mxu0 %v10910_v32  ;;  %6296 = vmatprep.subr.mxu1 %v10910_v32 }
 0x136   :  { %6278 = vmatpush3.msra.mxu0 %v8541_v36  ;;  %6297 = vmatpush3.msra.mxu1 %v8543_v37 }
 0x137   :  { %6279 = vmatprep.subr.mxu0 %v10910_v32  ;;  %6298 = vmatprep.subr.mxu1 %v10910_v32 }
 0x138   :  { %6280 = vmatpush3.msra.mxu0 %v8552_v38  ;;  %6299 = vmatpush3.msra.mxu1 %v8554_v40 }
 0x139   :  { %6281 = vmatprep.subr.mxu0 %v10910_v32  ;;  %6300 = vmatprep.subr.mxu1 %v10910_v32 }
 0x13a   :  { %6282 = vmatpush3.msra.mxu0 %v8563_v43  ;;  %6283 = vmatprep.mubr.msk.f32.mxu0 %vm7831_vm2, %v10910_v32 }
 0x13b   :  { %6301 = vmatpush3.msra.mxu1 %v8567_v16  ;;  %6284 = vmatmul.mubr.msk.f32.vlgmr.msra.gmra.mxu0 %vm680_vm4, %v8481_v45 }
 0x13c   :  { %6302 = vmatprep.mubr.msk.f32.mxu1 %vm7831_vm2, %v10910_v32  ;;  %6305 = vmatprep.subr.mxu0 %v10910_v32 }
 0x13d   :  { %6324 = vmatprep.subr.mxu1 %v10910_v32  ;;  %6303 = vmatmul.mubr.f32.vlgmr.msra.gmra.mxu1 %v10910_v32 }
 0x13e   :  { %6306 = vmatpush3.msra.mxu0 %v7990_v39  ;;  %6325 = vmatpush3.msra.mxu1 %v8068_v54  ;;  %v10911_v39 = vld [vmem:[#allocation11_spill] sm:$0xff]  ;;  %v10919_v54 = vld [vmem:[#allocation16_spill] sm:$0xff] }
 0x13f   :  { %6307 = vmatprep.subr.mxu0 %v10910_v32  ;;  %6326 = vmatprep.subr.mxu1 %v10910_v32 }
 0x140   :  { %6308 = vmatpush3.msra.mxu0 %v8002_v42  ;;  %6327 = vmatpush3.msra.mxu1 %v8078_v55  ;;  %v10912_v42 = vld [vmem:[#allocation18_spill] sm:$0xff]  ;;  %v10920_v55 = vld [vmem:[#allocation17_spill] sm:$0xff] }
 0x141   :  { %6309 = vmatprep.subr.mxu0 %v10910_v32  ;;  %6328 = vmatprep.subr.mxu1 %v10910_v32 }
 0x142   :  { %6310 = vmatpush3.msra.mxu0 %v8013_v44  ;;  %6329 = vmatpush3.msra.mxu1 %v8091_v57  ;;  %v10913_v44 = vld [vmem:[#allocation12_spill] sm:$0xff]  ;;  %v10922_v57 = vld [vmem:[#allocation21_spill] sm:$0xff] }
 0x143   :  { %6311 = vmatprep.subr.mxu0 %v10910_v32  ;;  %6330 = vmatprep.subr.mxu1 %v10910_v32 }
 0x144   :  { %6312 = vmatpush3.msra.mxu0 %v8023_v46  ;;  %6331 = vmatpush3.msra.mxu1 %v8106_v59  ;;  %v10914_v46 = vld [vmem:[#allocation20_spill] sm:$0xff]  ;;  %v8713_v59 = vld [vmem:[%s10727_s6] ss:$0 sm:$0xff] }
 0x145   :  { %6313 = vmatprep.subr.mxu0 %v10910_v32  ;;  %6332 = vmatprep.subr.mxu1 %v10910_v32  ;;  %10924 = vst [vmem:[#allocation11_spill] sm:$0xff] %v8713_v59 }
 0x146   :  { %6314 = vmatpush3.msra.mxu0 %v8033_v48  ;;  %6333 = vmatpush3.msra.mxu1 %v8120_v61  ;;  %v10915_v48 = vld [vmem:[#allocation13_spill] sm:$0xff] }
 0x147   :  { %6315 = vmatprep.subr.mxu0 %v10910_v32  ;;  %6334 = vmatprep.subr.mxu1 %v10910_v32 }
 0x148   :  { %6316 = vmatpush3.msra.mxu0 %v8043_v50  ;;  %6335 = vmatpush3.msra.mxu1 %v8134_v63  ;;  %v10916_v50 = vld [vmem:[#allocation22_spill] sm:$0xff] }
 0x149   :  { %6317 = vmatprep.subr.mxu0 %v10910_v32  ;;  %6336 = vmatprep.subr.mxu1 %v10910_v32 }
 0x14a   :  { %6318 = vmatpush3.msra.mxu0 %v8053_v52  ;;  %6337 = vmatpush3.msra.mxu1 %v8148_v1  ;;  %v10917_v52 = vld [vmem:[#allocation14_spill] sm:$0xff] }
 0x14b   :  { %6319 = vmatprep.subr.mxu0 %v10910_v32  ;;  %6338 = vmatprep.subr.mxu1 %v10910_v32 }
 0x14c   :  { %6320 = vmatpush3.msra.mxu0 %v8061_v53  ;;  %6321 = vmatprep.mubr.msk.f32.mxu0 %vm7831_vm2, %v10910_v32  ;;  %v10918_v53 = vld [vmem:[#allocation15_spill] sm:$0xff] }
 0x14d   :  { %6339 = vmatpush3.msra.mxu1 %v8162_v3  ;;  %6340 = vmatprep.mubr.msk.f32.mxu1 %vm7831_vm2, %v10910_v32 }
 0x14e   :  { %6322 = vmatmul.mubr.msk.f32.vlgmr.msra.gmra.mxu0 %vm680_vm4, %v8481_v45  ;;  %6341 = vmatmul.mubr.msk.f32.vlgmr.msra.gmra.mxu1 %vm680_vm4, %v8481_v45 }
 0x14f   :  { %6343 = vmatprep.subr.mxu0 %v10910_v32  ;;  %6359 = vmatprep.mubr.msk.f32.mxu0 %vm7831_vm2, %v10910_v32 }
 0x150   :  { %6344 = vmatpush3.msra.mxu0 %v8085_v56  ;;  %6362 = vmatprep.subr.mxu1 %v10910_v32  ;;  %v10921_v56 = vld [vmem:[#allocation19_spill] sm:$0xff] }
 0x151   :  { %6345 = vmatprep.subr.mxu0 %v10910_v32  ;;  %6363 = vmatpush3.msra.mxu1 %v8197_v6 }
 0x152   :  { %6346 = vmatpush3.msra.mxu0 %v8100_v58  ;;  %6364 = vmatprep.subr.mxu1 %v10910_v32  ;;  %v10923_v58 = vld [vmem:[#allocation23_spill] sm:$0xff] }
 0x153   :  { %6347 = vmatprep.subr.mxu0 %v10910_v32  ;;  %6365 = vmatpush3.msra.mxu1 %v8211_v8 }
 0x154   :  { %6348 = vmatpush3.msra.mxu0 %v8114_v60  ;;  %6366 = vmatprep.subr.mxu1 %v10910_v32 }
 0x155   :  { %6349 = vmatprep.subr.mxu0 %v10910_v32  ;;  %6367 = vmatpush3.msra.mxu1 %v8225_v10 }
 0x156   :  { %6350 = vmatpush3.msra.mxu0 %v8128_v62  ;;  %6368 = vmatprep.subr.mxu1 %v10910_v32 }
 0x157   :  { %6351 = vmatprep.subr.mxu0 %v10910_v32  ;;  %6369 = vmatpush3.msra.mxu1 %v8239_v12  ;;  %v8725_v12 = vld [vmem:[%s10731_s10] ss:$0 sm:$0xff] }
 0x158   :  { %6352 = vmatpush3.msra.mxu0 %v8142_v0  ;;  %6370 = vmatprep.subr.mxu1 %v10910_v32 }
 0x159   :  { %6353 = vmatprep.subr.mxu0 %v10910_v32  ;;  %6371 = vmatpush3.msra.mxu1 %v8253_v14 }
 0x15a   :  { %6354 = vmatpush3.msra.mxu0 %v8156_v2  ;;  %6372 = vmatprep.subr.mxu1 %v10910_v32  ;;  %v8719_v2 = vld [vmem:[%s10727_s6 + $0x1] ss:$0 sm:$0xff] }
 0x15b   :  { %6355 = vmatprep.subr.mxu0 %v10910_v32  ;;  %6373 = vmatpush3.msra.mxu1 %v8267_v17  ;;  %10925 = vst [vmem:[#allocation18_spill] sm:$0xff] %v8719_v2 }
 0x15c   :  { %6356 = vmatpush3.msra.mxu0 %v8170_v4  ;;  %6374 = vmatprep.subr.mxu1 %v10910_v32 }
 0x15d   :  { %6357 = vmatprep.subr.mxu0 %v10910_v32  ;;  %6375 = vmatpush3.msra.mxu1 %v8281_v19 }
 0x15e   :  { %6358 = vmatpush3.msra.mxu0 %v8179_v5  ;;  %6376 = vmatprep.subr.mxu1 %v10910_v32 }
 0x15f   :  { %6360 = vmatmul.mubr.msk.f32.vlgmr.msra.gmra.mxu0 %vm680_vm4, %v8481_v45  ;;  %6397 = vmatprep.subr.mxu0 %v10910_v32 }
 0x160   :  { %6398 = vmatpush3.msra.mxu0 %v8202_v7  ;;  %6377 = vmatpush3.msra.mxu1 %v8295_v21  ;;  %v1224_v21 = vld [vmem:[#allocation2 + $0x2] sm:$0x3] }
 0x161   :  { %6399 = vmatprep.subr.mxu0 %v10910_v32  ;;  %6378 = vmatprep.subr.mxu1 %v10910_v32 }
 0x162   :  { %6400 = vmatpush3.msra.mxu0 %v8216_v9  ;;  %6379 = vmatpush3.msra.mxu1 %v8309_v23 }
 0x163   :  { %6401 = vmatprep.subr.mxu0 %v10910_v32  ;;  %6380 = vmatprep.subr.mxu1 %v10910_v32 }
 0x164   :  { %6402 = vmatpush3.msra.mxu0 %v8230_v11  ;;  %6381 = vmatpush3.msra.mxu1 %v8323_v25 }
 0x165   :  { %6403 = vmatprep.subr.mxu0 %v10910_v32  ;;  %6382 = vmatprep.subr.mxu1 %v10910_v32 }
 0x166   :  { %6404 = vmatpush3.msra.mxu0 %v8244_v13  ;;  %6383 = vmatpush3.msra.mxu1 %v8337_v27 }
 0x167   :  { %6405 = vmatprep.subr.mxu0 %v10910_v32  ;;  %6384 = vmatprep.subr.mxu1 %v10910_v32 }
 0x168   :  { %6406 = vmatpush3.msra.mxu0 %v8258_v15  ;;  %6385 = vmatpush3.msra.mxu1 %v8351_v29  ;;  %v8731_v15 = vld [vmem:[%s10729_s8] ss:$0 sm:$0xff] }
 0x169   :  { %6407 = vmatprep.subr.mxu0 %v10910_v32  ;;  %6386 = vmatprep.subr.mxu1 %v10910_v32  ;;  %10926 = vst [vmem:[#allocation12_spill] sm:$0xff] %v8731_v15 }
 0x16a   :  { %6408 = vmatpush3.msra.mxu0 %v8272_v18  ;;  %6387 = vmatpush3.msra.mxu1 %v8365_v31 }
 0x16b   :  { %6409 = vmatprep.subr.mxu0 %v10910_v32  ;;  %6388 = vmatprep.subr.mxu1 %v10910_v32 }
 0x16c   :  { %6410 = vmatpush3.msra.mxu0 %v10911_v39  ;;  %6389 = vmatpush3.msra.mxu1 %v10912_v42 }
 0x16d   :  { %6411 = vmatprep.subr.mxu0 %v10910_v32  ;;  %6390 = vmatprep.subr.mxu1 %v10910_v32 }
 0x16e   :  { %6412 = vmatpush3.msra.mxu0 %v10913_v44  ;;  %6391 = vmatpush3.msra.mxu1 %v10914_v46 }
 0x16f   :  { %6413 = vmatprep.subr.mxu0 %v10910_v32  ;;  %6392 = vmatprep.subr.mxu1 %v10910_v32 }
 0x170   :  { %6414 = vmatpush3.msra.mxu0 %v10915_v48  ;;  %6393 = vmatpush3.msra.mxu1 %v10916_v50 }
 0x171   :  { %6415 = vmatprep.subr.mxu0 %v10910_v32  ;;  %6394 = vmatprep.mubr.msk.f32.mxu1 %vm7831_vm2, %v10910_v32 }
 0x172   :  { %6416 = vmatpush3.msra.mxu0 %v10917_v52  ;;  %6429 = vmatprep.mubr.msk.f32.mxu0 %vm7831_vm2, %v10910_v32 }
 0x173   :  { %6417 = vmatprep.subr.mxu0 %v10910_v32  ;;  %6432 = vmatprep.subr.mxu1 %v10910_v32 }
 0x174   :  { %6418 = vmatpush3.msra.mxu0 %v10918_v53  ;;  %v1298_v53 = vld [vmem:[#allocation3 + $0x2] sm:$0x3] }
 0x175   :  { %6419 = vmatprep.subr.mxu0 %v10910_v32 }
 0x176   :  { %6420 = vmatpush3.msra.mxu0 %v10919_v54 }
 0x177   :  { %6421 = vmatprep.subr.mxu0 %v10910_v32 }
 0x178   :  { %6422 = vmatpush3.msra.mxu0 %v10920_v55 }
 0x179   :  { %6423 = vmatprep.subr.mxu0 %v10910_v32 }
 0x17a   :  { %6424 = vmatpush3.msra.mxu0 %v10921_v56 }
 0x17b   :  { %6425 = vmatprep.subr.mxu0 %v10910_v32 }
 0x17c   :  { %6426 = vmatpush3.msra.mxu0 %v10922_v57 }
 0x17d   :  { %6427 = vmatprep.subr.mxu0 %v10910_v32 }
 0x17e   :  { %6428 = vmatpush3.msra.mxu0 %v10923_v58 }
 0x17f   :  { %6451 = vmatprep.subr.mxu0 %v10910_v32 }
 0x1eb   :  { %v986_v60 = vpop.f32.mrf.mxu0  ;;  %v1062_v61 = vpop.f32.mrf.mxu1 }
 0x1ec   :  { %v987_v62 = vadd.f32 %v8713_v59, %v986_v60  ;;  %v1063_v3 = vadd.f32 %v8719_v2, %v1062_v61 }
 0x1ed   :  { %v6231_v63 = vpop.f32.mrf.mxu0  ;;  %v6266_v0 = vpop.f32.mrf.mxu1 }
 0x1ee   :  { %v5351_v1 = vmul.f32 -1.442695, %v987_v62  ;;  %v5353_v4 = vmul.f32 -1.442695, %v1063_v3 }
 0x1f0   :  { %7496 = vpow2.f32 %v5351_v1 }
 0x1f1   :  { %7498 = vpow2.f32 %v5353_v4 }
 0x1fb   :  { %v1141_v5 = vpop.f32.mrf.mxu0 }
 0x1fc   :  { %v1142_v18 = vadd.f32 %v8731_v15, %v1141_v5 }
 0x1fd   :  { %v7497_v6 = vpop.eup %7496  ;;  %v6285_v7 = vpop.f32.mrf.mxu0 }
 0x1fe   :  { %v1211_v8 = vpop.f32.mrf.mxu1  ;;  %v993_v9 = vadd.f32 1.0, %v7497_v6  ;;  %v7499_v11 = vpop.eup %7498 }
 0x1ff   :  { %v1069_v13 = vadd.f32 1.0, %v7499_v11  ;;  %v1212_v14 = vadd.f32 %v8725_v12, %v1211_v8  ;;  %v1454_v11 = vld [vmem:[#allocation4 + $0x2] sm:$0x3] }
 0x200   :  { %v6304_v10 = vpop.f32.mrf.mxu1  ;;  %7500 = vrcp.f32 %v993_v9 }
 0x201   :  { %7502 = vrcp.f32 %v1069_v13 }
 0x20d   :  { %v7501_v17 = vpop.eup %7500 }
 0x20e   :  { %v1215_v19 = vmul.f32 %v7501_v17, %v1212_v14  ;;  %v1291_v23 = vpop.f32.mrf.mxu0  ;;  %v1365_v25 = vpop.f32.mrf.mxu1 }
 0x20f   :  { %v1295_v27 = vadd.f32 %v1291_v23, %v1224_v21  ;;  %v1369_v55 = vadd.f32 %v1365_v25, %v1298_v53  ;;  %v7503_v57 = vpop.eup %7502  ;;  %v8825_v53 = vld [vmem:[%s10724_s3 + $0x68] sm:$0xff] }
 0x210   :  { %v1216_v39 = vadd.f32 %v1215_v19, %v1142_v18  ;;  %v6323_v44 = vpop.f32.mrf.mxu0  ;;  %v6342_v48 = vpop.f32.mrf.mxu1  ;;  %v1218_v60 = vsub.f32 1.0, %v7503_v57  ;;  %v1220_v0 = vmul.f32 0.0, %v7503_v57  ;;  %v8853_v57 = vld [vmem:[%s10724_s3 + $0x58] sm:$0xff] }
 0x211   :  { %v1296_v52 = vadd.f32 %v8454_v35, %v1295_v27  ;;  %v1370_v56 = vadd.f32 %v8472_v33, %v1369_v55  ;;  %v8805_v44 = vld [vmem:[%s10724_s3 + $0x30] sm:$0xff]  ;;  %v8839_v55 = vld [vmem:[%s10724_s3 + $0x60] sm:$0xff] }
 0x212   :  { %7504 = vtanh.f32 %v1216_v39  ;;  %v8797_v39 = vld [vmem:[%s10724_s3 + $0x78] sm:$0xff]  ;;  %v8811_v48 = vld [vmem:[%s10724_s3 + $0x70] sm:$0xff] }
 0x213   :  { %v5358_v54 = vmul.f32 -1.442695, %v1296_v52  ;;  %v5359_v58 = vmul.f32 -1.442695, %v1370_v56  ;;  %v8819_v52 = vld [vmem:[%s10724_s3 + $0x28] sm:$0xff]  ;;  %v8847_v56 = vld [vmem:[%s10724_s3 + $0x18] sm:$0xff] }
 0x215   :  { %7506 = vpow2.f32 %v5358_v54  ;;  %v8833_v54 = vld [vmem:[%s10724_s3 + $0x20] sm:$0xff] }
 0x216   :  { %7508 = vpow2.f32 %v5359_v58  ;;  %v8861_v58 = vld [vmem:[%s10724_s3 + $0x10] sm:$0xff] }
 0x21f   :  { %v7505_v61 = vpop.eup %7504  ;;  %v1437_v62 = vpop.f32.mrf.mxu0 }
 0x220   :  { %v1219_v63 = vmul.f32 %v7505_v61, %v1218_v60  ;;  %v1438_v8 = vadd.f32 %v8478_v30, %v1437_v62  ;;  %v8867_v60 = vld [vmem:[%s10724_s3 + $0x50] sm:$0xff]  ;;  %v8875_v61 = vld [vmem:[%s10724_s3 + $0x8] sm:$0xff] }
 0x221   :  { %v6361_v1 = vpop.f32.mrf.mxu0  ;;  %v8881_v62 = vld [vmem:[%s10724_s3 + $0x48] sm:$0xff] }
 0x222   :  { %v7507_v3 = vpop.eup %7506  ;;  %v8736_v4 = vadd.f32 %v1220_v0, %v1219_v63  ;;  %v8889_v63 = vld [vmem:[%s10724_s3] sm:$0xff]  ;;  %v8912_v1 = vld [vmem:[%s10724_s3 + $0xb8] sm:$0xff] }
 0x223   :  { %v1444_v5 = vadd.f32 1.0, %v7507_v3  ;;  %v7509_v6 = vpop.eup %7508  ;;  %v8897_v0 = vld [vmem:[%s10724_s3 + $0x40] sm:$0xff]  ;;  %v8920_v3 = vld [vmem:[%s10726_s5 + $0x78] sm:$0xff] }
 0x224   :  { %1463 = vrot.lane.b32.xlu0 %v8736_v4, %s7832_s22  ;;  %1222 = vst.msk [vmem:[#allocation5] sm:$0x3] %vm251_vm3, %v8736_v4  ;;  %v1450_v7 = vadd.f32 1.0, %v7509_v6  ;;  %v8934_v6 = vld [vmem:[%s10726_s5 + $0x70] sm:$0xff] }
 0x225   :  { %7510 = vrcp.f32 %v1444_v5  ;;  %v8926_v5 = vld [vmem:[%s10724_s3 + $0xb0] sm:$0xff] }
 0x226   :  { %7512 = vrcp.f32 %v1450_v7  ;;  %v8940_v7 = vld [vmem:[%s10724_s3 + $0xa8] sm:$0xff] }
 0x232   :  { %v7511_v9 = vpop.eup %7510 }
 0x233   :  { %v1455_v10 = vmul.f32 %v7511_v9, %v1438_v8  ;;  %v7513_v14 = vpop.eup %7512  ;;  %v8948_v8 = vld [vmem:[%s10726_s5 + $0x68] sm:$0xff]  ;;  %v8954_v9 = vld [vmem:[%s10724_s3 + $0xa0] sm:$0xff] }
 0x234   :  { %v1458_v17 = vsub.f32 1.0, %v7513_v14  ;;  %v1460_v19 = vmul.f32 %v7513_v14, %v8481_v45  ;;  %v8791_v45 = vld [vmem:[%s10724_s3 + $0x38] sm:$0xff]  ;;  %10927 = vst [vmem:[#allocation20_spill] sm:$0xff] %v8948_v8  ;;  %10928 = vst [vmem:[#allocation13_spill] sm:$0xff] %v8954_v9  ;;  %v8982_v14 = vld [vmem:[%s10724_s3 + $0x90] sm:$0xff] }
 0x235   :  { %v1456_v13 = vadd.f32 %v1455_v10, %v1454_v11  ;;  %v8962_v10 = vld [vmem:[%s10726_s5 + $0x60] sm:$0xff]  ;;  %v8968_v11 = vld [vmem:[%s10724_s3 + $0x98] sm:$0xff]  ;;  %10932 = vst [vmem:[#allocation16_spill] sm:$0xff] %v8982_v14 }
 0x236   :  { %10929 = vst [vmem:[#allocation22_spill] sm:$0xff] %v8962_v10  ;;  %10930 = vst [vmem:[#allocation14_spill] sm:$0xff] %v8968_v11 }
 0x237   :  { %7514 = vtanh.f32 %v1456_v13  ;;  %v8976_v13 = vld [vmem:[%s10726_s5 + $0x58] sm:$0xff] }
 0x238   :  { %10931 = vst [vmem:[#allocation15_spill] sm:$0xff] %v8976_v13 }
 0x244   :  { %v7515_v18 = vpop.eup %7514 }
 0x245   :  { %v1459_v21 = vmul.f32 %v7515_v18, %v1458_v17  ;;  %v8990_v17 = vld [vmem:[%s10726_s5 + $0x50] sm:$0xff]  ;;  %v8996_v18 = vld [vmem:[%s10724_s3 + $0x88] sm:$0xff] }
 0x246   :  { %10933 = vst [vmem:[#allocation17_spill] sm:$0xff] %v8990_v17  ;;  %10934 = vst [vmem:[#allocation19_spill] sm:$0xff] %v8996_v18 }
 0x247   :  { %v8744_v23 = vadd.f32 %v1460_v19, %v1459_v21  ;;  %v9004_v19 = vld [vmem:[%s10726_s5 + $0x48] sm:$0xff]  ;;  %v9010_v21 = vld [vmem:[%s10724_s3 + $0x80] sm:$0xff] }
 0x248   :  { %10935 = vst [vmem:[#allocation21_spill] sm:$0xff] %v9004_v19  ;;  %10936 = vst [vmem:[#allocation23_spill] sm:$0xff] %v9010_v21 }
 0x296   :  { %v1464_v25 = vpop.permute.xlu0 %1463 }
 0x297   :  { %v1466_v27 = vsel %vm680_vm4, %v8744_v23, %v1464_v25  ;;  %v9020_v25 = vld [vmem:[%s10726_s5 + $0xf8] sm:$0xff] }
 0x298   :  { %6395 = vmatmul.mubr.f32.vlgmr.msra.gmra.mxu1 %v1466_v27  ;;  %6430 = vmatmul.mubr.f32.vlgmr.msra.gmra.mxu0 %v1466_v27  ;;  %10937 = vst [vmem:[#allocation24_spill] sm:$0xff] %v9020_v25  ;;  %v9026_v27 = vld [vmem:[%s10726_s5 + $0x40] sm:$0xff] }
 0x299   :  { %6433 = vmatpush3.msra.mxu1 %v8486_v51  ;;  %6452 = vmatpush3.msra.mxu0 %v8488_v47  ;;  %10938 = vst [vmem:[#allocation25_spill] sm:$0xff] %v9026_v27 }
 0x29a   :  { %6434 = vmatprep.subr.mxu1 %v10910_v32  ;;  %6453 = vmatprep.subr.mxu0 %v10910_v32 }
 0x29b   :  { %6435 = vmatpush3.msra.mxu1 %v8497_v49  ;;  %6454 = vmatpush3.msra.mxu0 %v8499_v34 }
 0x29c   :  { %6436 = vmatprep.subr.mxu1 %v10910_v32  ;;  %6455 = vmatprep.subr.mxu0 %v10910_v32 }
 0x29d   :  { %6437 = vmatpush3.msra.mxu1 %v8508_v41  ;;  %6456 = vmatpush3.msra.mxu0 %v8510_v28 }
 0x29e   :  { %6438 = vmatprep.subr.mxu1 %v10910_v32  ;;  %6457 = vmatprep.subr.mxu0 %v10910_v32 }
 0x29f   :  { %6439 = vmatpush3.msra.mxu1 %v8519_v24  ;;  %6458 = vmatpush3.msra.mxu0 %v8521_v26 }
 0x2a0   :  { %6440 = vmatprep.subr.mxu1 %v10910_v32  ;;  %6459 = vmatprep.subr.mxu0 %v10910_v32 }
 0x2a1   :  { %6441 = vmatpush3.msra.mxu1 %v8530_v20  ;;  %6460 = vmatpush3.msra.mxu0 %v8532_v22 }
 0x2a2   :  { %6442 = vmatprep.subr.mxu1 %v10910_v32  ;;  %6461 = vmatprep.subr.mxu0 %v10910_v32 }
 0x2a3   :  { %6443 = vmatpush3.msra.mxu1 %v8541_v36  ;;  %6462 = vmatpush3.msra.mxu0 %v8543_v37 }
 0x2a4   :  { %6444 = vmatprep.subr.mxu1 %v10910_v32  ;;  %6463 = vmatprep.subr.mxu0 %v10910_v32 }
 0x2a5   :  { %6445 = vmatpush3.msra.mxu1 %v8552_v38  ;;  %6464 = vmatpush3.msra.mxu0 %v8554_v40 }
 0x2a6   :  { %6446 = vmatprep.subr.mxu1 %v10910_v32  ;;  %6465 = vmatprep.subr.mxu0 %v10910_v32 }
 0x2a7   :  { %6447 = vmatpush3.msra.mxu1 %v8563_v43  ;;  %6448 = vmatprep.mubr.msk.f32.mxu1 %vm7831_vm2, %v10910_v32 }
 0x2a8   :  { %6466 = vmatpush3.msra.mxu0 %v8567_v16  ;;  %6467 = vmatprep.mubr.msk.f32.mxu0 %vm7831_vm2, %v10910_v32 }
 0x2a9   :  { %6449 = vmatmul.mubr.msk.f32.vlgmr.msra.gmra.mxu1 %vm680_vm4, %v8744_v23  ;;  %6468 = vmatmul.mubr.msk.f32.vlgmr.msra.gmra.mxu0 %vm680_vm4, %v8736_v4 }
 0x2aa   :  { %6470 = vmatprep.subr.mxu1 %v10910_v32  ;;  %6489 = vmatprep.subr.mxu0 %v10910_v32 }
 0x2ab   :  { %6471 = vmatpush3.msra.mxu1 %v8791_v45  ;;  %6490 = vmatpush3.msra.mxu0 %v8797_v39 }
 0x2ac   :  { %6472 = vmatprep.subr.mxu1 %v10910_v32  ;;  %6491 = vmatprep.subr.mxu0 %v10910_v32 }
 0x2ad   :  { %6473 = vmatpush3.msra.mxu1 %v8805_v44  ;;  %6492 = vmatpush3.msra.mxu0 %v8811_v48 }
 0x2ae   :  { %6474 = vmatprep.subr.mxu1 %v10910_v32  ;;  %6493 = vmatprep.subr.mxu0 %v10910_v32 }
 0x2af   :  { %6475 = vmatpush3.msra.mxu1 %v8819_v52  ;;  %6494 = vmatpush3.msra.mxu0 %v8825_v53 }
 0x2b0   :  { %6476 = vmatprep.subr.mxu1 %v10910_v32  ;;  %6495 = vmatprep.subr.mxu0 %v10910_v32 }
 0x2b1   :  { %6477 = vmatpush3.msra.mxu1 %v8833_v54  ;;  %6496 = vmatpush3.msra.mxu0 %v8839_v55 }
 0x2b2   :  { %6478 = vmatprep.subr.mxu1 %v10910_v32  ;;  %6497 = vmatprep.subr.mxu0 %v10910_v32 }
 0x2b3   :  { %6479 = vmatpush3.msra.mxu1 %v8847_v56  ;;  %6498 = vmatpush3.msra.mxu0 %v8853_v57 }
 0x2b4   :  { %6480 = vmatprep.subr.mxu1 %v10910_v32  ;;  %6499 = vmatprep.subr.mxu0 %v10910_v32 }
 0x2b5   :  { %6481 = vmatpush3.msra.mxu1 %v8861_v58  ;;  %6500 = vmatpush3.msra.mxu0 %v8867_v60 }
 0x2b6   :  { %6482 = vmatprep.subr.mxu1 %v10910_v32  ;;  %6501 = vmatprep.subr.mxu0 %v10910_v32 }
 0x2b7   :  { %6483 = vmatpush3.msra.mxu1 %v8875_v61  ;;  %6502 = vmatpush3.msra.mxu0 %v8881_v62 }
 0x2b8   :  { %6484 = vmatprep.subr.mxu1 %v10910_v32  ;;  %6503 = vmatprep.subr.mxu0 %v10910_v32 }
 0x2b9   :  { %6485 = vmatpush3.msra.mxu1 %v8889_v63  ;;  %6486 = vmatprep.mubr.msk.f32.mxu1 %vm7831_vm2, %v10910_v32 }
 0x2ba   :  { %6504 = vmatpush3.msra.mxu0 %v8897_v0  ;;  %6505 = vmatprep.mubr.msk.f32.mxu0 %vm7831_vm2, %v10910_v32 }
 0x2bb   :  { %6487 = vmatmul.mubr.msk.f32.vlgmr.msra.gmra.mxu1 %vm680_vm4, %v8744_v23  ;;  %6506 = vmatmul.mubr.msk.f32.vlgmr.msra.gmra.mxu0 %vm680_vm4, %v8744_v23 }
 0x2bc   :  { %6508 = vmatprep.subr.mxu1 %v10910_v32  ;;  %6524 = vmatprep.mubr.msk.f32.mxu1 %vm7831_vm2, %v10910_v32 }
 0x2bd   :  { %6509 = vmatpush3.msra.mxu1 %v8912_v1  ;;  %6527 = vmatprep.subr.mxu0 %v10910_v32 }
 0x2be   :  { %6510 = vmatprep.subr.mxu1 %v10910_v32  ;;  %6528 = vmatpush3.msra.mxu0 %v8920_v3 }
 0x2bf   :  { %6511 = vmatpush3.msra.mxu1 %v8926_v5  ;;  %6529 = vmatprep.subr.mxu0 %v10910_v32 }
 0x2c0   :  { %6512 = vmatprep.subr.mxu1 %v10910_v32  ;;  %6530 = vmatpush3.msra.mxu0 %v8934_v6 }
 0x2c1   :  { %6513 = vmatpush3.msra.mxu1 %v8940_v7  ;;  %6531 = vmatprep.subr.mxu0 %v10910_v32 }
 0x2c2   :  { %6514 = vmatprep.subr.mxu1 %v10910_v32  ;;  %6532 = vmatpush3.msra.mxu0 %v8948_v8 }
 0x2c3   :  { %6515 = vmatpush3.msra.mxu1 %v8954_v9  ;;  %6533 = vmatprep.subr.mxu0 %v10910_v32 }
 0x2c4   :  { %6516 = vmatprep.subr.mxu1 %v10910_v32  ;;  %6534 = vmatpush3.msra.mxu0 %v8962_v10 }
 0x2c5   :  { %6517 = vmatpush3.msra.mxu1 %v8968_v11  ;;  %6535 = vmatprep.subr.mxu0 %v10910_v32 }
 0x2c6   :  { %6518 = vmatprep.subr.mxu1 %v10910_v32  ;;  %6536 = vmatpush3.msra.mxu0 %v8976_v13 }
 0x2c7   :  { %6519 = vmatpush3.msra.mxu1 %v8982_v14  ;;  %6537 = vmatprep.subr.mxu0 %v10910_v32 }
 0x2c8   :  { %6520 = vmatprep.subr.mxu1 %v10910_v32  ;;  %6538 = vmatpush3.msra.mxu0 %v8990_v17 }
 0x2c9   :  { %6521 = vmatpush3.msra.mxu1 %v8996_v18  ;;  %6539 = vmatprep.subr.mxu0 %v10910_v32 }
 0x2ca   :  { %6522 = vmatprep.subr.mxu1 %v10910_v32  ;;  %6540 = vmatpush3.msra.mxu0 %v9004_v19 }
 0x2cb   :  { %6523 = vmatpush3.msra.mxu1 %v9010_v21  ;;  %6541 = vmatprep.subr.mxu0 %v10910_v32  ;;  %v9034_v21 = vld [vmem:[%s10726_s5 + $0xf0] sm:$0xff] }
 0x2cc   :  { %6525 = vmatmul.mubr.msk.f32.vlgmr.msra.gmra.mxu1 %vm680_vm4, %v8744_v23  ;;  %6562 = vmatprep.subr.mxu1 %v10910_v32  ;;  %10939 = vst [vmem:[#allocation26_spill] sm:$0xff] %v9034_v21 }
 0x2cd   :  { %6563 = vmatpush3.msra.mxu1 %v9020_v25  ;;  %6542 = vmatpush3.msra.mxu0 %v9026_v27  ;;  %v9040_v25 = vld [vmem:[%s10726_s5 + $0x38] sm:$0xff]  ;;  %v9048_v27 = vld [vmem:[%s10726_s5 + $0xe8] sm:$0xff] }
 0x2ce   :  { %6564 = vmatprep.subr.mxu1 %v10910_v32  ;;  %6543 = vmatprep.subr.mxu0 %v10910_v32  ;;  %10940 = vst [vmem:[#allocation27_spill] sm:$0xff] %v9040_v25  ;;  %10941 = vst [vmem:[#allocation28_spill] sm:$0xff] %v9048_v27 }
 0x2cf   :  { %6565 = vmatpush3.msra.mxu1 %v9034_v21  ;;  %6544 = vmatpush3.msra.mxu0 %v9040_v25  ;;  %v9054_v21 = vld [vmem:[%s10726_s5 + $0x30] sm:$0xff]  ;;  %v9062_v25 = vld [vmem:[%s10726_s5 + $0xe0] sm:$0xff] }
 0x2d0   :  { %6566 = vmatprep.subr.mxu1 %v10910_v32  ;;  %6545 = vmatprep.subr.mxu0 %v10910_v32  ;;  %10942 = vst [vmem:[#allocation29_spill] sm:$0xff] %v9054_v21  ;;  %10943 = vst [vmem:[#allocation30_spill] sm:$0xff] %v9062_v25 }
 0x2d1   :  { %6567 = vmatpush3.msra.mxu1 %v9048_v27  ;;  %6546 = vmatpush3.msra.mxu0 %v9054_v21  ;;  %v9068_v27 = vld [vmem:[%s10726_s5 + $0x28] sm:$0xff]  ;;  %v9076_v21 = vld [vmem:[%s10726_s5 + $0xd8] sm:$0xff] }
 0x2d2   :  { %6568 = vmatprep.subr.mxu1 %v10910_v32  ;;  %6547 = vmatprep.subr.mxu0 %v10910_v32  ;;  %10944 = vst [vmem:[#allocation31_spill] sm:$0xff] %v9068_v27  ;;  %10945 = vst [vmem:[#allocation32_spill] sm:$0xff] %v9076_v21 }
 0x2d3   :  { %6569 = vmatpush3.msra.mxu1 %v9062_v25  ;;  %6548 = vmatpush3.msra.mxu0 %v9068_v27  ;;  %v9085_v27 = vld [vmem:[%s10726_s5 + $0xd0] sm:$0xff] }
 0x2d4   :  { %6570 = vmatprep.subr.mxu1 %v10910_v32  ;;  %6549 = vmatprep.subr.mxu0 %v10910_v32  ;;  %10946 = vst [vmem:[#allocation33_spill] sm:$0xff] %v9085_v27 }
 0x2d5   :  { %6571 = vmatpush3.msra.mxu1 %v9076_v21  ;;  %6550 = vmatpush3.msra.mxu0 %v8351_v29  ;;  %v9094_v29 = vld [vmem:[%s10726_s5 + $0xc8] sm:$0xff] }
 0x2d6   :  { %6572 = vmatprep.subr.mxu1 %v10910_v32  ;;  %6551 = vmatprep.subr.mxu0 %v10910_v32  ;;  %10947 = vst [vmem:[#allocation34_spill] sm:$0xff] %v9094_v29 }
 0x2d7   :  { %6573 = vmatpush3.msra.mxu1 %v9085_v27  ;;  %6552 = vmatpush3.msra.mxu0 %v8365_v31  ;;  %v9103_v31 = vld [vmem:[%s10726_s5 + $0xc0] sm:$0xff] }
 0x2d8   :  { %6574 = vmatprep.subr.mxu1 %v10910_v32  ;;  %6553 = vmatprep.subr.mxu0 %v10910_v32  ;;  %10948 = vst [vmem:[#allocation35_spill] sm:$0xff] %v9103_v31 }
 0x2d9   :  { %6575 = vmatpush3.msra.mxu1 %v9094_v29  ;;  %6554 = vmatpush3.msra.mxu0 %v10912_v42  ;;  %v9112_v42 = vld [vmem:[%s10726_s5 + $0xb8] sm:$0xff] }
 0x2da   :  { %6576 = vmatprep.subr.mxu1 %v10910_v32  ;;  %6555 = vmatprep.subr.mxu0 %v10910_v32  ;;  %10949 = vst [vmem:[#allocation36_spill] sm:$0xff] %v9112_v42 }
 0x2db   :  { %6577 = vmatpush3.msra.mxu1 %v9103_v31  ;;  %6556 = vmatpush3.msra.mxu0 %v10914_v46  ;;  %v9122_v46 = vld [vmem:[%s10726_s5 + $0xb0] sm:$0xff] }
 0x2dc   :  { %6578 = vmatprep.subr.mxu1 %v10910_v32  ;;  %6557 = vmatprep.subr.mxu0 %v10910_v32  ;;  %10950 = vst [vmem:[#allocation37_spill] sm:$0xff] %v9122_v46 }
 0x2dd   :  { %6579 = vmatpush3.msra.mxu1 %v9112_v42  ;;  %6558 = vmatpush3.msra.mxu0 %v10916_v50  ;;  %v9132_v50 = vld [vmem:[%s10726_s5 + $0xa8] sm:$0xff]  ;;  %v9146_v42 = vld [vmem:[%s10726_s5 + $0x98] sm:$0xff] }
 0x2de   :  { %6580 = vmatprep.subr.mxu1 %v10910_v32  ;;  %6559 = vmatprep.mubr.msk.f32.mxu0 %vm7831_vm2, %v10910_v32  ;;  %10951 = vst [vmem:[#allocation38_spill] sm:$0xff] %v9132_v50  ;;  %10953 = vst [vmem:[#allocation40_spill] sm:$0xff] %v9146_v42 }
 0x2df   :  { %6581 = vmatpush3.msra.mxu1 %v9122_v46  ;;  %6594 = vmatprep.mubr.msk.f32.mxu1 %vm7831_vm2, %v10910_v32  ;;  %v9139_v46 = vld [vmem:[%s10726_s5 + $0xa0] sm:$0xff] }
 0x2e0   :  { %6582 = vmatprep.subr.mxu1 %v10910_v32  ;;  %6597 = vmatprep.subr.mxu0 %v10910_v32  ;;  %10952 = vst [vmem:[#allocation39_spill] sm:$0xff] %v9139_v46 }
 0x2e1   :  { %6583 = vmatpush3.msra.mxu1 %v9132_v50  ;;  %v9153_v50 = vld [vmem:[%s10726_s5 + $0x90] sm:$0xff] }
 0x2e2   :  { %6584 = vmatprep.subr.mxu1 %v10910_v32  ;;  %10954 = vst [vmem:[#allocation41_spill] sm:$0xff] %v9153_v50 }
 0x2e3   :  { %6585 = vmatpush3.msra.mxu1 %v9139_v46  ;;  %v9160_v46 = vld [vmem:[%s10726_s5 + $0x88] sm:$0xff] }
 0x2e4   :  { %6586 = vmatprep.subr.mxu1 %v10910_v32  ;;  %10955 = vst [vmem:[#allocation42_spill] sm:$0xff] %v9160_v46 }
 0x2e5   :  { %6587 = vmatpush3.msra.mxu1 %v9146_v42  ;;  %v9167_v42 = vld [vmem:[%s10726_s5 + $0x80] sm:$0xff] }
 0x2e6   :  { %6588 = vmatprep.subr.mxu1 %v10910_v32  ;;  %10956 = vst [vmem:[#allocation43_spill] sm:$0xff] %v9167_v42 }
 0x2e7   :  { %6589 = vmatpush3.msra.mxu1 %v9153_v50 }
 0x2e8   :  { %6590 = vmatprep.subr.mxu1 %v10910_v32 }
 0x2e9   :  { %6591 = vmatpush3.msra.mxu1 %v9160_v46 }
 0x2ea   :  { %6592 = vmatprep.subr.mxu1 %v10910_v32 }
 0x2eb   :  { %6593 = vmatpush3.msra.mxu1 %v9167_v42 }
 0x2ec   :  { %6616 = vmatprep.subr.mxu1 %v10910_v32 }
 0x358   :  { %v1533_v50 = vpop.f32.mrf.mxu1  ;;  %v1609_v31 = vpop.f32.mrf.mxu0 }
 0x359   :  { %v1534_v29 = vadd.f32 %v8713_v59, %v1533_v50  ;;  %v1610_v46 = vadd.f32 %v8719_v2, %v1609_v31 }
 0x35a   :  { %v6396_v27 = vpop.f32.mrf.mxu1  ;;  %v6431_v21 = vpop.f32.mrf.mxu0 }
 0x35b   :  { %v5360_v25 = vmul.f32 -1.442695, %v1534_v29  ;;  %v5361_v19 = vmul.f32 -1.442695, %v1610_v46  ;;  %v1774_v27 = vld [vmem:[#allocation2 + $0x4] sm:$0x3] }
 0x35d   :  { %7516 = vpow2.f32 %v5360_v25 }
 0x35e   :  { %7518 = vpow2.f32 %v5361_v19 }
 0x369   :  { %v1688_v18 = vpop.f32.mrf.mxu1  ;;  %v1760_v17 = vpop.f32.mrf.mxu0 }
 0x36a   :  { %v7517_v14 = vpop.eup %7516  ;;  %v1761_v8 = vadd.f32 %v8725_v12, %v1760_v17  ;;  %v1689_v21 = vadd.f32 %v8731_v15, %v1688_v18 }
 0x36b   :  { %v1540_v13 = vadd.f32 1.0, %v7517_v14  ;;  %v6450_v11 = vpop.f32.mrf.mxu1  ;;  %v6469_v42 = vpop.f32.mrf.mxu0 }
 0x36c   :  { %v7519_v10 = vpop.eup %7518 }
 0x36d   :  { %7520 = vrcp.f32 %v1540_v13  ;;  %v1616_v9 = vadd.f32 1.0, %v7519_v10  ;;  %v1848_v13 = vld [vmem:[#allocation3 + $0x4] sm:$0x3] }
 0x36f   :  { %7522 = vrcp.f32 %v1616_v9 }
 0x37a   :  { %v7521_v50 = vpop.eup %7520 }
 0x37b   :  { %v1764_v25 = vmul.f32 %v7521_v50, %v1761_v8  ;;  %v1841_v29 = vpop.f32.mrf.mxu1  ;;  %v1915_v31 = vpop.f32.mrf.mxu0 }
 0x37c   :  { %v1845_v19 = vadd.f32 %v1841_v29, %v1774_v27  ;;  %v1919_v10 = vadd.f32 %v1915_v31, %v1848_v13  ;;  %v7523_v9 = vpop.eup %7522 }
 0x37d   :  { %v1765_v46 = vadd.f32 %v1764_v25, %v1689_v21  ;;  %v6488_v2 = vpop.f32.mrf.mxu1  ;;  %v6507_v59 = vpop.f32.mrf.mxu0  ;;  %v1767_v18 = vsub.f32 1.0, %v7523_v9  ;;  %v1769_v21 = vmul.f32 %v7523_v9, %v8736_v4  ;;  %v2004_v4 = vld [vmem:[#allocation4 + $0x4] sm:$0x3] }
 0x37e   :  { %v1846_v11 = vadd.f32 %v8454_v35, %v1845_v19  ;;  %v1920_v17 = vadd.f32 %v8472_v33, %v1919_v10 }
 0x37f   :  { %7524 = vtanh.f32 %v1765_v46 }
 0x380   :  { %v5367_v14 = vmul.f32 -1.442695, %v1846_v11  ;;  %v5368_v42 = vmul.f32 -1.442695, %v1920_v17 }
 0x382   :  { %7526 = vpow2.f32 %v5367_v14 }
 0x383   :  { %7528 = vpow2.f32 %v5368_v42 }
 0x38c   :  { %v7525_v8 = vpop.eup %7524  ;;  %v1987_v50 = vpop.f32.mrf.mxu1 }
 0x38d   :  { %v1768_v15 = vmul.f32 %v7525_v8, %v1767_v18  ;;  %v1988_v29 = vadd.f32 %v8478_v30, %v1987_v50  ;;  %v10958_v30 = vld [vmem:[#allocation13_spill] sm:$0xff]  ;;  %v10975_v18 = vld [vmem:[#allocation32_spill] sm:$0xff]  ;;  %v9324_v8 = vld [vmem:[%s10726_s5 + $0x20] sm:$0xff] }
 0x38e   :  { %v6526_v2 = vpop.f32.mrf.mxu1  ;;  %v10977_v50 = vld [vmem:[#allocation33_spill] sm:$0xff] }
 0x38f   :  { %v7527_v59 = vpop.eup %7526  ;;  %v9178_v25 = vadd.f32 %v1769_v21, %v1768_v15  ;;  %v9333_v21 = vld [vmem:[%s10726_s5 + $0x18] sm:$0xff]  ;;  %v10979_v2 = vld [vmem:[#allocation34_spill] sm:$0xff] }
 0x390   :  { %v1994_v35 = vadd.f32 1.0, %v7527_v59  ;;  %v7529_v33 = vpop.eup %7528  ;;  %10978 = vst [vmem:[#allocation13_spill] sm:$0xff] %v9333_v21  ;;  %v9342_v59 = vld [vmem:[%s10726_s5 + $0x10] sm:$0xff] }
 0x391   :  { %2013 = vrot.lane.b32.xlu0 %v9178_v25, %s7832_s22  ;;  %1772 = vst.msk [vmem:[#allocation5 + $0x2] sm:$0x3] %vm251_vm3, %v9178_v25  ;;  %v2000_v27 = vadd.f32 1.0, %v7529_v33  ;;  %v9351_v33 = vld [vmem:[%s10726_s5 + $0x8] sm:$0xff] }
 0x392   :  { %7530 = vrcp.f32 %v1994_v35  ;;  %v10981_v35 = vld [vmem:[#allocation35_spill] sm:$0xff] }
 0x393   :  { %7532 = vrcp.f32 %v2000_v27  ;;  %v10983_v27 = vld [vmem:[#allocation36_spill] sm:$0xff] }
 0x39f   :  { %v7531_v31 = vpop.eup %7530 }
 0x3a0   :  { %v2005_v19 = vmul.f32 %v7531_v31, %v1988_v29  ;;  %v7533_v15 = vpop.eup %7532  ;;  %v9360_v29 = vld [vmem:[%s10726_s5] sm:$0xff]  ;;  %v10985_v31 = vld [vmem:[#allocation37_spill] sm:$0xff] }
 0x3a1   :  { %v2008_v11 = vsub.f32 1.0, %v7533_v15  ;;  %v2010_v14 = vmul.f32 %v7533_v15, %v8744_v23  ;;  %v10974_v23 = vld [vmem:[#allocation31_spill] sm:$0xff]  ;;  %v10989_v15 = vld [vmem:[#allocation41_spill] sm:$0xff] }
 0x3a2   :  { %v2006_v46 = vadd.f32 %v2005_v19, %v2004_v4  ;;  %v10986_v19 = vld [vmem:[#allocation38_spill] sm:$0xff]  ;;  %v10987_v4 = vld [vmem:[#allocation39_spill] sm:$0xff] }
 0x3a4   :  { %7534 = vtanh.f32 %v2006_v46  ;;  %v10988_v46 = vld [vmem:[#allocation40_spill] sm:$0xff] }
 0x3b1   :  { %v7535_v13 = vpop.eup %7534 }
 0x3b2   :  { %v2009_v10 = vmul.f32 %v7535_v13, %v2008_v11  ;;  %v10990_v11 = vld [vmem:[#allocation42_spill] sm:$0xff]  ;;  %v10991_v13 = vld [vmem:[#allocation43_spill] sm:$0xff] }
 0x3b4   :  { %v9186_v17 = vadd.f32 %v2010_v14, %v2009_v10 }
 0x403   :  { %v2014_v9 = vpop.permute.xlu0 %2013 }
 0x404   :  { %v2016_v42 = vsel %vm680_vm4, %v9186_v17, %v2014_v9  ;;  %v10992_v9 = vld [vmem:[#allocation11_spill] sm:$0xff] }
 0x405   :  { %6560 = vmatmul.mubr.f32.vlgmr.msra.gmra.mxu0 %v2016_v42  ;;  %6595 = vmatmul.mubr.f32.vlgmr.msra.gmra.mxu1 %v2016_v42 }
 0x406   :  { %6598 = vmatpush3.msra.mxu0 %v8486_v51  ;;  %6617 = vmatpush3.msra.mxu1 %v8488_v47  ;;  %v10959_v51 = vld [vmem:[#allocation22_spill] sm:$0xff] }
 0x407   :  { %6599 = vmatprep.subr.mxu0 %v10910_v32  ;;  %6618 = vmatprep.subr.mxu1 %v10910_v32  ;;  %v10960_v47 = vld [vmem:[#allocation14_spill] sm:$0xff]  ;;  %10980 = vst [vmem:[#allocation22_spill] sm:$0xff] %v9342_v59 }
 0x408   :  { %6600 = vmatpush3.msra.mxu0 %v8497_v49  ;;  %6619 = vmatpush3.msra.mxu1 %v8499_v34  ;;  %v10961_v49 = vld [vmem:[#allocation15_spill] sm:$0xff]  ;;  %v10962_v34 = vld [vmem:[#allocation16_spill] sm:$0xff]  ;;  %10982 = vst [vmem:[#allocation14_spill] sm:$0xff] %v9351_v33 }
 0x409   :  { %6601 = vmatprep.subr.mxu0 %v10910_v32  ;;  %6620 = vmatprep.subr.mxu1 %v10910_v32  ;;  %10984 = vst [vmem:[#allocation15_spill] sm:$0xff] %v9360_v29 }
 0x40a   :  { %6602 = vmatpush3.msra.mxu0 %v8508_v41  ;;  %6621 = vmatpush3.msra.mxu1 %v8510_v28  ;;  %v10963_v41 = vld [vmem:[#allocation17_spill] sm:$0xff]  ;;  %v10964_v28 = vld [vmem:[#allocation19_spill] sm:$0xff] }
 0x40b   :  { %6603 = vmatprep.subr.mxu0 %v10910_v32  ;;  %6622 = vmatprep.subr.mxu1 %v10910_v32 }
 0x40c   :  { %6604 = vmatpush3.msra.mxu0 %v8519_v24  ;;  %6623 = vmatpush3.msra.mxu1 %v8521_v26  ;;  %v10965_v24 = vld [vmem:[#allocation21_spill] sm:$0xff]  ;;  %v10966_v26 = vld [vmem:[#allocation23_spill] sm:$0xff] }
 0x40d   :  { %6605 = vmatprep.subr.mxu0 %v10910_v32  ;;  %6624 = vmatprep.subr.mxu1 %v10910_v32 }
 0x40e   :  { %6606 = vmatpush3.msra.mxu0 %v8530_v20  ;;  %6625 = vmatpush3.msra.mxu1 %v8532_v22  ;;  %v10967_v20 = vld [vmem:[#allocation24_spill] sm:$0xff]  ;;  %v10968_v22 = vld [vmem:[#allocation25_spill] sm:$0xff] }
 0x40f   :  { %6607 = vmatprep.subr.mxu0 %v10910_v32  ;;  %6626 = vmatprep.subr.mxu1 %v10910_v32 }
 0x410   :  { %6608 = vmatpush3.msra.mxu0 %v8541_v36  ;;  %6627 = vmatpush3.msra.mxu1 %v8543_v37  ;;  %v10969_v36 = vld [vmem:[#allocation26_spill] sm:$0xff]  ;;  %v10970_v37 = vld [vmem:[#allocation27_spill] sm:$0xff] }
 0x411   :  { %6609 = vmatprep.subr.mxu0 %v10910_v32  ;;  %6628 = vmatprep.subr.mxu1 %v10910_v32 }
 0x412   :  { %6610 = vmatpush3.msra.mxu0 %v8552_v38  ;;  %6629 = vmatpush3.msra.mxu1 %v8554_v40  ;;  %v10971_v38 = vld [vmem:[#allocation28_spill] sm:$0xff]  ;;  %v10972_v40 = vld [vmem:[#allocation29_spill] sm:$0xff] }
 0x413   :  { %6611 = vmatprep.subr.mxu0 %v10910_v32  ;;  %6630 = vmatprep.subr.mxu1 %v10910_v32 }
 0x414   :  { %6612 = vmatpush3.msra.mxu0 %v8563_v43  ;;  %6613 = vmatprep.mubr.msk.f32.mxu0 %vm7831_vm2, %v10910_v32  ;;  %v10973_v43 = vld [vmem:[#allocation30_spill] sm:$0xff] }
 0x415   :  { %6631 = vmatpush3.msra.mxu1 %v8567_v16  ;;  %6632 = vmatprep.mubr.msk.f32.mxu1 %vm7831_vm2, %v10910_v32  ;;  %v10957_v16 = vld [vmem:[#allocation20_spill] sm:$0xff] }
 0x416   :  { %6614 = vmatmul.mubr.msk.f32.vlgmr.msra.gmra.mxu0 %vm680_vm4, %v9186_v17  ;;  %6633 = vmatmul.mubr.msk.f32.vlgmr.msra.gmra.mxu1 %vm680_vm4, %v9178_v25  ;;  %10976 = vst [vmem:[#allocation20_spill] sm:$0xff] %v9324_v8 }
 0x417   :  { %6635 = vmatprep.subr.mxu0 %v10910_v32  ;;  %6654 = vmatprep.subr.mxu1 %v10910_v32 }
 0x418   :  { %6636 = vmatpush3.msra.mxu0 %v8791_v45  ;;  %6655 = vmatpush3.msra.mxu1 %v8797_v39 }
 0x419   :  { %6637 = vmatprep.subr.mxu0 %v10910_v32  ;;  %6656 = vmatprep.subr.mxu1 %v10910_v32 }
 0x41a   :  { %6638 = vmatpush3.msra.mxu0 %v8805_v44  ;;  %6657 = vmatpush3.msra.mxu1 %v8811_v48 }
 0x41b   :  { %6639 = vmatprep.subr.mxu0 %v10910_v32  ;;  %6658 = vmatprep.subr.mxu1 %v10910_v32 }
 0x41c   :  { %6640 = vmatpush3.msra.mxu0 %v8819_v52  ;;  %6659 = vmatpush3.msra.mxu1 %v8825_v53 }
 0x41d   :  { %6641 = vmatprep.subr.mxu0 %v10910_v32  ;;  %6660 = vmatprep.subr.mxu1 %v10910_v32 }
 0x41e   :  { %6642 = vmatpush3.msra.mxu0 %v8833_v54  ;;  %6661 = vmatpush3.msra.mxu1 %v8839_v55 }
 0x41f   :  { %6643 = vmatprep.subr.mxu0 %v10910_v32  ;;  %6662 = vmatprep.subr.mxu1 %v10910_v32 }
 0x420   :  { %6644 = vmatpush3.msra.mxu0 %v8847_v56  ;;  %6663 = vmatpush3.msra.mxu1 %v8853_v57 }
 0x421   :  { %6645 = vmatprep.subr.mxu0 %v10910_v32  ;;  %6664 = vmatprep.subr.mxu1 %v10910_v32 }
 0x422   :  { %6646 = vmatpush3.msra.mxu0 %v8861_v58  ;;  %6665 = vmatpush3.msra.mxu1 %v8867_v60 }
 0x423   :  { %6647 = vmatprep.subr.mxu0 %v10910_v32  ;;  %6666 = vmatprep.subr.mxu1 %v10910_v32 }
 0x424   :  { %6648 = vmatpush3.msra.mxu0 %v8875_v61  ;;  %6667 = vmatpush3.msra.mxu1 %v8881_v62 }
 0x425   :  { %6649 = vmatprep.subr.mxu0 %v10910_v32  ;;  %6668 = vmatprep.subr.mxu1 %v10910_v32 }
 0x426   :  { %6650 = vmatpush3.msra.mxu0 %v8889_v63  ;;  %6651 = vmatprep.mubr.msk.f32.mxu0 %vm7831_vm2, %v10910_v32 }
 0x427   :  { %6669 = vmatpush3.msra.mxu1 %v8897_v0  ;;  %6670 = vmatprep.mubr.msk.f32.mxu1 %vm7831_vm2, %v10910_v32 }
 0x428   :  { %6652 = vmatmul.mubr.msk.f32.vlgmr.msra.gmra.mxu0 %vm680_vm4, %v9186_v17  ;;  %6671 = vmatmul.mubr.msk.f32.vlgmr.msra.gmra.mxu1 %vm680_vm4, %v9186_v17 }
 0x429   :  { %6673 = vmatprep.subr.mxu0 %v10910_v32  ;;  %6689 = vmatprep.mubr.msk.f32.mxu0 %vm7831_vm2, %v10910_v32 }
 0x42a   :  { %6674 = vmatpush3.msra.mxu0 %v8912_v1  ;;  %6692 = vmatprep.subr.mxu1 %v10910_v32 }
 0x42b   :  { %6675 = vmatprep.subr.mxu0 %v10910_v32  ;;  %6693 = vmatpush3.msra.mxu1 %v8920_v3 }
 0x42c   :  { %6676 = vmatpush3.msra.mxu0 %v8926_v5  ;;  %6694 = vmatprep.subr.mxu1 %v10910_v32 }
 0x42d   :  { %6677 = vmatprep.subr.mxu0 %v10910_v32  ;;  %6695 = vmatpush3.msra.mxu1 %v8934_v6 }
 0x42e   :  { %6678 = vmatpush3.msra.mxu0 %v8940_v7  ;;  %6696 = vmatprep.subr.mxu1 %v10910_v32 }
 0x42f   :  { %6679 = vmatprep.subr.mxu0 %v10910_v32  ;;  %6697 = vmatpush3.msra.mxu1 %v10957_v16 }
 0x430   :  { %6680 = vmatpush3.msra.mxu0 %v10958_v30  ;;  %6698 = vmatprep.subr.mxu1 %v10910_v32 }
 0x431   :  { %6681 = vmatprep.subr.mxu0 %v10910_v32  ;;  %6699 = vmatpush3.msra.mxu1 %v10959_v51 }
 0x432   :  { %6682 = vmatpush3.msra.mxu0 %v10960_v47  ;;  %6700 = vmatprep.subr.mxu1 %v10910_v32 }
 0x433   :  { %6683 = vmatprep.subr.mxu0 %v10910_v32  ;;  %6701 = vmatpush3.msra.mxu1 %v10961_v49 }
 0x434   :  { %6684 = vmatpush3.msra.mxu0 %v10962_v34  ;;  %6702 = vmatprep.subr.mxu1 %v10910_v32 }
 0x435   :  { %6685 = vmatprep.subr.mxu0 %v10910_v32  ;;  %6703 = vmatpush3.msra.mxu1 %v10963_v41 }
 0x436   :  { %6686 = vmatpush3.msra.mxu0 %v10964_v28  ;;  %6704 = vmatprep.subr.mxu1 %v10910_v32 }
 0x437   :  { %6687 = vmatprep.subr.mxu0 %v10910_v32  ;;  %6705 = vmatpush3.msra.mxu1 %v10965_v24 }
 0x438   :  { %6688 = vmatpush3.msra.mxu0 %v10966_v26  ;;  %6706 = vmatprep.subr.mxu1 %v10910_v32 }
 0x439   :  { %6690 = vmatmul.mubr.msk.f32.vlgmr.msra.gmra.mxu0 %vm680_vm4, %v9186_v17  ;;  %6727 = vmatprep.subr.mxu0 %v10910_v32 }
 0x43a   :  { %6728 = vmatpush3.msra.mxu0 %v10967_v20  ;;  %6707 = vmatpush3.msra.mxu1 %v10968_v22 }
 0x43b   :  { %6729 = vmatprep.subr.mxu0 %v10910_v32  ;;  %6708 = vmatprep.subr.mxu1 %v10910_v32 }
 0x43c   :  { %6730 = vmatpush3.msra.mxu0 %v10969_v36  ;;  %6709 = vmatpush3.msra.mxu1 %v10970_v37 }
 0x43d   :  { %6731 = vmatprep.subr.mxu0 %v10910_v32  ;;  %6710 = vmatprep.subr.mxu1 %v10910_v32 }
 0x43e   :  { %6732 = vmatpush3.msra.mxu0 %v10971_v38  ;;  %6711 = vmatpush3.msra.mxu1 %v10972_v40 }
 0x43f   :  { %6733 = vmatprep.subr.mxu0 %v10910_v32  ;;  %6712 = vmatprep.subr.mxu1 %v10910_v32 }
 0x440   :  { %6734 = vmatpush3.msra.mxu0 %v10973_v43  ;;  %6713 = vmatpush3.msra.mxu1 %v10974_v23 }
 0x441   :  { %6735 = vmatprep.subr.mxu0 %v10910_v32  ;;  %6714 = vmatprep.subr.mxu1 %v10910_v32 }
 0x442   :  { %6736 = vmatpush3.msra.mxu0 %v10975_v18  ;;  %6715 = vmatpush3.msra.mxu1 %v9324_v8 }
 0x443   :  { %6737 = vmatprep.subr.mxu0 %v10910_v32  ;;  %6716 = vmatprep.subr.mxu1 %v10910_v32 }
 0x444   :  { %6738 = vmatpush3.msra.mxu0 %v10977_v50  ;;  %6717 = vmatpush3.msra.mxu1 %v9333_v21 }
 0x445   :  { %6739 = vmatprep.subr.mxu0 %v10910_v32  ;;  %6718 = vmatprep.subr.mxu1 %v10910_v32 }
 0x446   :  { %6740 = vmatpush3.msra.mxu0 %v10979_v2  ;;  %6719 = vmatpush3.msra.mxu1 %v9342_v59 }
 0x447   :  { %6741 = vmatprep.subr.mxu0 %v10910_v32  ;;  %6720 = vmatprep.subr.mxu1 %v10910_v32 }
 0x448   :  { %6742 = vmatpush3.msra.mxu0 %v10981_v35  ;;  %6721 = vmatpush3.msra.mxu1 %v9351_v33 }
 0x449   :  { %6743 = vmatprep.subr.mxu0 %v10910_v32  ;;  %6722 = vmatprep.subr.mxu1 %v10910_v32 }
 0x44a   :  { %6744 = vmatpush3.msra.mxu0 %v10983_v27  ;;  %6723 = vmatpush3.msra.mxu1 %v9360_v29 }
 0x44b   :  { %6745 = vmatprep.subr.mxu0 %v10910_v32  ;;  %6724 = vmatprep.mubr.msk.f32.mxu1 %vm7831_vm2, %v10910_v32 }
 0x44c   :  { %6746 = vmatpush3.msra.mxu0 %v10985_v31  ;;  %6759 = vmatprep.mubr.msk.f32.mxu0 %vm7831_vm2, %v10910_v32  ;;  %v10993_v31 = vld [vmem:[#allocation18_spill] sm:$0xff] }
 0x44d   :  { %6747 = vmatprep.subr.mxu0 %v10910_v32  ;;  %6762 = vmatprep.subr.mxu1 %v10910_v32 }
 0x44e   :  { %6748 = vmatpush3.msra.mxu0 %v10986_v19 }
 0x44f   :  { %6749 = vmatprep.subr.mxu0 %v10910_v32 }
 0x450   :  { %6750 = vmatpush3.msra.mxu0 %v10987_v4 }
 0x451   :  { %6751 = vmatprep.subr.mxu0 %v10910_v32 }
 0x452   :  { %6752 = vmatpush3.msra.mxu0 %v10988_v46 }
 0x453   :  { %6753 = vmatprep.subr.mxu0 %v10910_v32 }
 0x454   :  { %6754 = vmatpush3.msra.mxu0 %v10989_v15 }
 0x455   :  { %6755 = vmatprep.subr.mxu0 %v10910_v32 }
 0x456   :  { %6756 = vmatpush3.msra.mxu0 %v10990_v11 }
 0x457   :  { %6757 = vmatprep.subr.mxu0 %v10910_v32 }
 0x458   :  { %6758 = vmatpush3.msra.mxu0 %v10991_v13 }
 0x459   :  { %6781 = vmatprep.subr.mxu0 %v10910_v32 }
 0x4c5   :  { %v2083_v14 = vpop.f32.mrf.mxu0  ;;  %v2159_v10 = vpop.f32.mrf.mxu1 }
 0x4c6   :  { %v2084_v42 = vadd.f32 %v10992_v9, %v2083_v14  ;;  %v2160_v15 = vadd.f32 %v10993_v31, %v2159_v10  ;;  %v2324_v9 = vld [vmem:[#allocation2 + $0x6] sm:$0x3] }
 0x4c7   :  { %v6561_v4 = vpop.f32.mrf.mxu0  ;;  %v6596_v46 = vpop.f32.mrf.mxu1 }
 0x4c8   :  { %v5369_v19 = vmul.f32 -1.442695, %v2084_v42  ;;  %v5370_v29 = vmul.f32 -1.442695, %v2160_v15  ;;  %v10994_v4 = vld [vmem:[#allocation12_spill] sm:$0xff] }
 0x4ca   :  { %7536 = vpow2.f32 %v5369_v19 }
 0x4cb   :  { %7538 = vpow2.f32 %v5370_v29 }
 0x4d6   :  { %v2238_v27 = vpop.f32.mrf.mxu0  ;;  %v2310_v11 = vpop.f32.mrf.mxu1 }
 0x4d7   :  { %v7537_v33 = vpop.eup %7536  ;;  %v2311_v50 = vadd.f32 %v8725_v12, %v2310_v11  ;;  %v2239_v46 = vadd.f32 %v10994_v4, %v2238_v27  ;;  %v2398_v12 = vld [vmem:[#allocation3 + $0x6] sm:$0x3] }
 0x4d8   :  { %v2090_v35 = vadd.f32 1.0, %v7537_v33  ;;  %v6615_v59 = vpop.f32.mrf.mxu0  ;;  %v6634_v13 = vpop.f32.mrf.mxu1 }
 0x4d9   :  { %v7539_v2 = vpop.eup %7538  ;;  %v9390_v59 = vld [vmem:[%s10725_s4] ss:$0 sm:$0xff] }
 0x4da   :  { %7540 = vrcp.f32 %v2090_v35  ;;  %v2166_v21 = vadd.f32 1.0, %v7539_v2 }
 0x4dc   :  { %7542 = vrcp.f32 %v2166_v21 }
 0x4e7   :  { %v7541_v14 = vpop.eup %7540 }
 0x4e8   :  { %v2314_v19 = vmul.f32 %v7541_v14, %v2311_v50  ;;  %v2391_v31 = vpop.f32.mrf.mxu0  ;;  %v2465_v15 = vpop.f32.mrf.mxu1  ;;  %v9396_v50 = vld [vmem:[%s10725_s4 + $0x1] ss:$0 sm:$0xff] }
 0x4e9   :  { %v2395_v29 = vadd.f32 %v2391_v31, %v2324_v9  ;;  %v2469_v35 = vadd.f32 %v2465_v15, %v2398_v12 }
 0x4ea   :  { %v2315_v10 = vadd.f32 %v2314_v19, %v2239_v46  ;;  %v6653_v42 = vpop.f32.mrf.mxu0  ;;  %v6672_v8 = vpop.f32.mrf.mxu1 }
 0x4eb   :  { %v2396_v2 = vadd.f32 %v9390_v59, %v2395_v29  ;;  %v2470_v33 = vadd.f32 %v9396_v50, %v2469_v35  ;;  %v7543_v8 = vpop.eup %7542  ;;  %v9409_v42 = vld [vmem:[%s10725_s4 + $0x2] ss:$0 sm:$0xff] }
 0x4ec   :  { %7544 = vtanh.f32 %v2315_v10  ;;  %v2317_v11 = vsub.f32 1.0, %v7543_v8  ;;  %v2319_v46 = vmul.f32 %v7543_v8, %v9178_v25 }
 0x4ed   :  { %v5376_v21 = vmul.f32 -1.442695, %v2396_v2  ;;  %v5377_v27 = vmul.f32 -1.442695, %v2470_v33 }
 0x4ef   :  { %7546 = vpow2.f32 %v5376_v21  ;;  %v2554_v21 = vld [vmem:[#allocation4 + $0x6] sm:$0x3] }
 0x4f0   :  { %7548 = vpow2.f32 %v5377_v27 }
 0x4f9   :  { %v7545_v13 = vpop.eup %7544  ;;  %v2537_v14 = vpop.f32.mrf.mxu0 }
 0x4fa   :  { %v2318_v4 = vmul.f32 %v7545_v13, %v2317_v11  ;;  %v2538_v25 = vadd.f32 %v9409_v42, %v2537_v14  ;;  %v9420_v14 = vld [vmem:[%s10728_s7 + $0x38] sm:$0xff] }
 0x4fb   :  { %v6691_v19 = vpop.f32.mrf.mxu0 }
 0x4fc   :  { %v7547_v9 = vpop.eup %7546  ;;  %v9400_v31 = vadd.f32 %v2319_v46, %v2318_v4 }
 0x4fd   :  { %v2544_v15 = vadd.f32 1.0, %v7547_v9  ;;  %v7549_v29 = vpop.eup %7548  ;;  %v9423_v9 = vld [vmem:[#allocation7 + $0x38] sm:$0xff] }
 0x4fe   :  { %2563 = vrot.lane.b32.xlu1 %v9400_v31, %s7832_s22  ;;  %2322 = vst.msk [vmem:[#allocation5 + $0x4] sm:$0x3] %vm251_vm3, %v9400_v31  ;;  %v2550_v10 = vadd.f32 1.0, %v7549_v29  ;;  %v9442_v29 = vld [vmem:[%s10728_s7 + $0x28] sm:$0xff] }
 0x4ff   :  { %7550 = vrcp.f32 %v2544_v15  ;;  %v9434_v15 = vld [vmem:[#allocation7 + $0x30] sm:$0xff] }
 0x500   :  { %7552 = vrcp.f32 %v2550_v10  ;;  %v9445_v10 = vld [vmem:[#allocation7 + $0x28] sm:$0xff] }
 0x50c   :  { %v7551_v2 = vpop.eup %7550 }
 0x50d   :  { %v2555_v12 = vmul.f32 %v7551_v2, %v2538_v25  ;;  %v7553_v33 = vpop.eup %7552  ;;  %v9453_v25 = vld [vmem:[%s10728_s7 + $0x20] sm:$0xff] }
 0x50e   :  { %v2558_v8 = vsub.f32 1.0, %v7553_v33  ;;  %v2560_v11 = vmul.f32 %v7553_v33, %v9186_v17  ;;  %v9431_v17 = vld [vmem:[%s10728_s7 + $0x30] sm:$0xff]  ;;  %v9456_v2 = vld [vmem:[#allocation7 + $0x20] sm:$0xff] }
 0x50f   :  { %v2556_v35 = vadd.f32 %v2555_v12, %v2554_v21  ;;  %v9464_v12 = vld [vmem:[%s10728_s7 + $0x18] sm:$0xff]  ;;  %v9478_v33 = vld [vmem:[#allocation7 + $0x10] sm:$0xff] }
 0x510   :  { %v9467_v21 = vld [vmem:[#allocation7 + $0x18] sm:$0xff] }
 0x511   :  { %7554 = vtanh.f32 %v2556_v35  ;;  %v9475_v35 = vld [vmem:[%s10728_s7 + $0x10] sm:$0xff] }
 0x51e   :  { %v7555_v27 = vpop.eup %7554 }
 0x51f   :  { %v2559_v13 = vmul.f32 %v7555_v27, %v2558_v8  ;;  %v9486_v8 = vld [vmem:[%s10728_s7 + $0x8] sm:$0xff] }
 0x520   :  { %v9489_v27 = vld [vmem:[#allocation7 + $0x8] sm:$0xff] }
 0x521   :  { %v9413_v4 = vadd.f32 %v2560_v11, %v2559_v13  ;;  %v9497_v11 = vld [vmem:[%s10728_s7] sm:$0xff] }
 0x522   :  { %v9502_v13 = vld [vmem:[#allocation7] sm:$0xff] }
 0x570   :  { %v2564_v46 = vpop.permute.xlu1 %2563 }
 0x571   :  { %v2566_v19 = vsel %vm680_vm4, %v9413_v4, %v2564_v46  ;;  %v2874_v46 = vld [vmem:[#allocation2 + $0x8] sm:$0x3] }
 0x572   :  { %6725 = vmatmul.mubr.f32.vlgmr.msra.gmra.mxu1 %v2566_v19  ;;  %6760 = vmatmul.mubr.f32.vlgmr.msra.gmra.mxu0 %v2566_v19 }
 0x573   :  { %6763 = vmatpush3.msra.mxu1 %v9420_v14  ;;  %6782 = vmatpush3.msra.mxu0 %v9423_v9 }
 0x574   :  { %6764 = vmatprep.subr.mxu1 %v10910_v32  ;;  %6783 = vmatprep.subr.mxu0 %v10910_v32 }
 0x575   :  { %6765 = vmatpush3.msra.mxu1 %v9431_v17  ;;  %6784 = vmatpush3.msra.mxu0 %v9434_v15 }
 0x576   :  { %6766 = vmatprep.subr.mxu1 %v10910_v32  ;;  %6785 = vmatprep.subr.mxu0 %v10910_v32 }
 0x577   :  { %6767 = vmatpush3.msra.mxu1 %v9442_v29  ;;  %6786 = vmatpush3.msra.mxu0 %v9445_v10 }
 0x578   :  { %6768 = vmatprep.subr.mxu1 %v10910_v32  ;;  %6787 = vmatprep.subr.mxu0 %v10910_v32 }
 0x579   :  { %6769 = vmatpush3.msra.mxu1 %v9453_v25  ;;  %6788 = vmatpush3.msra.mxu0 %v9456_v2 }
 0x57a   :  { %6770 = vmatprep.subr.mxu1 %v10910_v32  ;;  %6789 = vmatprep.subr.mxu0 %v10910_v32 }
 0x57b   :  { %6771 = vmatpush3.msra.mxu1 %v9464_v12  ;;  %6790 = vmatpush3.msra.mxu0 %v9467_v21 }
 0x57c   :  { %6772 = vmatprep.subr.mxu1 %v10910_v32  ;;  %6791 = vmatprep.subr.mxu0 %v10910_v32 }
 0x57d   :  { %6773 = vmatpush3.msra.mxu1 %v9475_v35  ;;  %6792 = vmatpush3.msra.mxu0 %v9478_v33 }
 0x57e   :  { %6774 = vmatprep.subr.mxu1 %v10910_v32  ;;  %6793 = vmatprep.subr.mxu0 %v10910_v32 }
 0x57f   :  { %6775 = vmatpush3.msra.mxu1 %v9486_v8  ;;  %6794 = vmatpush3.msra.mxu0 %v9489_v27 }
 0x580   :  { %6776 = vmatprep.subr.mxu1 %v10910_v32  ;;  %6795 = vmatprep.subr.mxu0 %v10910_v32 }
 0x581   :  { %6777 = vmatpush3.msra.mxu1 %v9497_v11  ;;  %6778 = vmatprep.mubr.msk.f32.mxu1 %vm7831_vm2, %v10910_v32 }
 0x582   :  { %6796 = vmatpush3.msra.mxu0 %v9502_v13  ;;  %6797 = vmatprep.mubr.msk.f32.mxu0 %vm7831_vm2, %v10910_v32 }
 0x583   :  { %6779 = vmatmul.mubr.msk.f32.vlgmr.msra.gmra.mxu1 %vm680_vm4, %v9413_v4  ;;  %6798 = vmatmul.mubr.msk.f32.vlgmr.msra.gmra.mxu0 %vm680_vm4, %v9400_v31 }
 0x584   :  { %6800 = vmatprep.subr.mxu1 %v10910_v32  ;;  %6819 = vmatprep.subr.mxu0 %v10910_v32 }
 0x585   :  { %6801 = vmatpush3.msra.mxu1 %v8791_v45  ;;  %6820 = vmatpush3.msra.mxu0 %v8797_v39  ;;  %v10995_v45 = vld [vmem:[#allocation20_spill] sm:$0xff]  ;;  %v10996_v39 = vld [vmem:[#allocation33_spill] sm:$0xff] }
 0x586   :  { %6802 = vmatprep.subr.mxu1 %v10910_v32  ;;  %6821 = vmatprep.subr.mxu0 %v10910_v32 }
 0x587   :  { %6803 = vmatpush3.msra.mxu1 %v8805_v44  ;;  %6822 = vmatpush3.msra.mxu0 %v8811_v48  ;;  %v10997_v44 = vld [vmem:[#allocation13_spill] sm:$0xff]  ;;  %v10998_v48 = vld [vmem:[#allocation34_spill] sm:$0xff] }
 0x588   :  { %6804 = vmatprep.subr.mxu1 %v10910_v32  ;;  %6823 = vmatprep.subr.mxu0 %v10910_v32 }
 0x589   :  { %6805 = vmatpush3.msra.mxu1 %v8819_v52  ;;  %6824 = vmatpush3.msra.mxu0 %v8825_v53  ;;  %v10999_v52 = vld [vmem:[#allocation22_spill] sm:$0xff]  ;;  %v11000_v53 = vld [vmem:[#allocation35_spill] sm:$0xff] }
 0x58a   :  { %6806 = vmatprep.subr.mxu1 %v10910_v32  ;;  %6825 = vmatprep.subr.mxu0 %v10910_v32 }
 0x58b   :  { %6807 = vmatpush3.msra.mxu1 %v8833_v54  ;;  %6826 = vmatpush3.msra.mxu0 %v8839_v55  ;;  %v11001_v54 = vld [vmem:[#allocation14_spill] sm:$0xff]  ;;  %v11002_v55 = vld [vmem:[#allocation36_spill] sm:$0xff] }
 0x58c   :  { %6808 = vmatprep.subr.mxu1 %v10910_v32  ;;  %6827 = vmatprep.subr.mxu0 %v10910_v32 }
 0x58d   :  { %6809 = vmatpush3.msra.mxu1 %v8847_v56  ;;  %6828 = vmatpush3.msra.mxu0 %v8853_v57  ;;  %v11003_v56 = vld [vmem:[#allocation15_spill] sm:$0xff]  ;;  %v11004_v57 = vld [vmem:[#allocation37_spill] sm:$0xff] }
 0x58e   :  { %6810 = vmatprep.subr.mxu1 %v10910_v32  ;;  %6829 = vmatprep.subr.mxu0 %v10910_v32 }
 0x58f   :  { %6811 = vmatpush3.msra.mxu1 %v8861_v58  ;;  %6830 = vmatpush3.msra.mxu0 %v8867_v60  ;;  %v11005_v58 = vld [vmem:[#allocation38_spill] sm:$0xff]  ;;  %v11006_v60 = vld [vmem:[#allocation39_spill] sm:$0xff] }
 0x590   :  { %6812 = vmatprep.subr.mxu1 %v10910_v32  ;;  %6831 = vmatprep.subr.mxu0 %v10910_v32 }
 0x591   :  { %6813 = vmatpush3.msra.mxu1 %v8875_v61  ;;  %6832 = vmatpush3.msra.mxu0 %v8881_v62  ;;  %v11007_v61 = vld [vmem:[#allocation40_spill] sm:$0xff]  ;;  %v11008_v62 = vld [vmem:[#allocation41_spill] sm:$0xff] }
 0x592   :  { %6814 = vmatprep.subr.mxu1 %v10910_v32  ;;  %6833 = vmatprep.subr.mxu0 %v10910_v32 }
 0x593   :  { %6815 = vmatpush3.msra.mxu1 %v8889_v63  ;;  %6816 = vmatprep.mubr.msk.f32.mxu1 %vm7831_vm2, %v10910_v32  ;;  %v11009_v63 = vld [vmem:[#allocation42_spill] sm:$0xff] }
 0x594   :  { %6834 = vmatpush3.msra.mxu0 %v8897_v0  ;;  %6835 = vmatprep.mubr.msk.f32.mxu0 %vm7831_vm2, %v10910_v32  ;;  %v11010_v0 = vld [vmem:[#allocation43_spill] sm:$0xff] }
 0x595   :  { %6817 = vmatmul.mubr.msk.f32.vlgmr.msra.gmra.mxu1 %vm680_vm4, %v9413_v4  ;;  %6836 = vmatmul.mubr.msk.f32.vlgmr.msra.gmra.mxu0 %vm680_vm4, %v9413_v4 }
 0x596   :  { %6838 = vmatprep.subr.mxu1 %v10910_v32  ;;  %6854 = vmatprep.mubr.msk.f32.mxu1 %vm7831_vm2, %v10910_v32 }
 0x597   :  { %6839 = vmatpush3.msra.mxu1 %v8912_v1  ;;  %6857 = vmatprep.subr.mxu0 %v10910_v32 }
 0x598   :  { %6840 = vmatprep.subr.mxu1 %v10910_v32  ;;  %6858 = vmatpush3.msra.mxu0 %v8920_v3 }
 0x599   :  { %6841 = vmatpush3.msra.mxu1 %v8926_v5  ;;  %6859 = vmatprep.subr.mxu0 %v10910_v32  ;;  %v9644_v5 = vld [vmem:[%s10727_s6] ss:$0 sm:$0xff] }
 0x59a   :  { %6842 = vmatprep.subr.mxu1 %v10910_v32  ;;  %6860 = vmatpush3.msra.mxu0 %v8934_v6  ;;  %11011 = vst [vmem:[#allocation16_spill] sm:$0xff] %v9644_v5 }
 0x59b   :  { %6843 = vmatpush3.msra.mxu1 %v8940_v7  ;;  %6861 = vmatprep.subr.mxu0 %v10910_v32 }
 0x59c   :  { %6844 = vmatprep.subr.mxu1 %v10910_v32  ;;  %6862 = vmatpush3.msra.mxu0 %v10957_v16 }
 0x59d   :  { %6845 = vmatpush3.msra.mxu1 %v10958_v30  ;;  %6863 = vmatprep.subr.mxu0 %v10910_v32 }
 0x59e   :  { %6846 = vmatprep.subr.mxu1 %v10910_v32  ;;  %6864 = vmatpush3.msra.mxu0 %v10959_v51  ;;  %v9650_v51 = vld [vmem:[%s10727_s6 + $0x1] ss:$0 sm:$0xff] }
 0x59f   :  { %6847 = vmatpush3.msra.mxu1 %v10960_v47  ;;  %6865 = vmatprep.subr.mxu0 %v10910_v32  ;;  %11012 = vst [vmem:[#allocation17_spill] sm:$0xff] %v9650_v51 }
 0x5a0   :  { %6848 = vmatprep.subr.mxu1 %v10910_v32  ;;  %6866 = vmatpush3.msra.mxu0 %v10961_v49 }
 0x5a1   :  { %6849 = vmatpush3.msra.mxu1 %v10962_v34  ;;  %6867 = vmatprep.subr.mxu0 %v10910_v32 }
 0x5a2   :  { %6850 = vmatprep.subr.mxu1 %v10910_v32  ;;  %6868 = vmatpush3.msra.mxu0 %v10963_v41 }
 0x5a3   :  { %6851 = vmatpush3.msra.mxu1 %v10964_v28  ;;  %6869 = vmatprep.subr.mxu0 %v10910_v32 }
 0x5a4   :  { %6852 = vmatprep.subr.mxu1 %v10910_v32  ;;  %6870 = vmatpush3.msra.mxu0 %v10965_v24 }
 0x5a5   :  { %6853 = vmatpush3.msra.mxu1 %v10966_v26  ;;  %6871 = vmatprep.subr.mxu0 %v10910_v32 }
 0x5a6   :  { %6855 = vmatmul.mubr.msk.f32.vlgmr.msra.gmra.mxu1 %vm680_vm4, %v9413_v4  ;;  %6892 = vmatprep.subr.mxu1 %v10910_v32 }
 0x5a7   :  { %6893 = vmatpush3.msra.mxu1 %v10967_v20  ;;  %6872 = vmatpush3.msra.mxu0 %v10968_v22 }
 0x5a8   :  { %6894 = vmatprep.subr.mxu1 %v10910_v32  ;;  %6873 = vmatprep.subr.mxu0 %v10910_v32 }
 0x5a9   :  { %6895 = vmatpush3.msra.mxu1 %v10969_v36  ;;  %6874 = vmatpush3.msra.mxu0 %v10970_v37  ;;  %v9656_v37 = vld [vmem:[%s10731_s10] ss:$0 sm:$0xff] }
 0x5aa   :  { %6896 = vmatprep.subr.mxu1 %v10910_v32  ;;  %6875 = vmatprep.subr.mxu0 %v10910_v32 }
 0x5ab   :  { %6897 = vmatpush3.msra.mxu1 %v10971_v38  ;;  %6876 = vmatpush3.msra.mxu0 %v10972_v40 }
 0x5ac   :  { %6898 = vmatprep.subr.mxu1 %v10910_v32  ;;  %6877 = vmatprep.subr.mxu0 %v10910_v32 }
 0x5ad   :  { %6899 = vmatpush3.msra.mxu1 %v10973_v43  ;;  %6878 = vmatpush3.msra.mxu0 %v10974_v23  ;;  %v9662_v43 = vld [vmem:[%s10729_s8] ss:$0 sm:$0xff] }
 0x5ae   :  { %6900 = vmatprep.subr.mxu1 %v10910_v32  ;;  %6879 = vmatprep.subr.mxu0 %v10910_v32  ;;  %11013 = vst [vmem:[#allocation19_spill] sm:$0xff] %v9662_v43 }
 0x5af   :  { %6901 = vmatpush3.msra.mxu1 %v10975_v18  ;;  %6880 = vmatpush3.msra.mxu0 %v10995_v45 }
 0x5b0   :  { %6902 = vmatprep.subr.mxu1 %v10910_v32  ;;  %6881 = vmatprep.subr.mxu0 %v10910_v32 }
 0x5b1   :  { %6903 = vmatpush3.msra.mxu1 %v10996_v39  ;;  %6882 = vmatpush3.msra.mxu0 %v10997_v44 }
 0x5b2   :  { %6904 = vmatprep.subr.mxu1 %v10910_v32  ;;  %6883 = vmatprep.subr.mxu0 %v10910_v32 }
 0x5b3   :  { %6905 = vmatpush3.msra.mxu1 %v10998_v48  ;;  %6884 = vmatpush3.msra.mxu0 %v10999_v52 }
 0x5b4   :  { %6906 = vmatprep.subr.mxu1 %v10910_v32  ;;  %6885 = vmatprep.subr.mxu0 %v10910_v32 }
 0x5b5   :  { %6907 = vmatpush3.msra.mxu1 %v11000_v53  ;;  %6886 = vmatpush3.msra.mxu0 %v11001_v54 }
 0x5b6   :  { %6908 = vmatprep.subr.mxu1 %v10910_v32  ;;  %6887 = vmatprep.subr.mxu0 %v10910_v32 }
 0x5b7   :  { %6909 = vmatpush3.msra.mxu1 %v11002_v55  ;;  %6888 = vmatpush3.msra.mxu0 %v11003_v56 }
 0x5b8   :  { %6910 = vmatprep.subr.mxu1 %v10910_v32  ;;  %6889 = vmatprep.mubr.msk.f32.mxu0 %vm7831_vm2, %v10910_v32 }
 0x5b9   :  { %6911 = vmatpush3.msra.mxu1 %v11004_v57  ;;  %6924 = vmatprep.mubr.msk.f32.mxu1 %vm7831_vm2, %v10910_v32 }
 0x5ba   :  { %6912 = vmatprep.subr.mxu1 %v10910_v32  ;;  %6927 = vmatprep.subr.mxu0 %v10910_v32 }
 0x5bb   :  { %6913 = vmatpush3.msra.mxu1 %v11005_v58 }
 0x5bc   :  { %6914 = vmatprep.subr.mxu1 %v10910_v32 }
 0x5bd   :  { %6915 = vmatpush3.msra.mxu1 %v11006_v60  ;;  %v2948_v60 = vld [vmem:[#allocation3 + $0x8] sm:$0x3] }
 0x5be   :  { %6916 = vmatprep.subr.mxu1 %v10910_v32 }
 0x5bf   :  { %6917 = vmatpush3.msra.mxu1 %v11007_v61 }
 0x5c0   :  { %6918 = vmatprep.subr.mxu1 %v10910_v32 }
 0x5c1   :  { %6919 = vmatpush3.msra.mxu1 %v11008_v62 }
 0x5c2   :  { %6920 = vmatprep.subr.mxu1 %v10910_v32 }
 0x5c3   :  { %6921 = vmatpush3.msra.mxu1 %v11009_v63 }
 0x5c4   :  { %6922 = vmatprep.subr.mxu1 %v10910_v32 }
 0x5c5   :  { %6923 = vmatpush3.msra.mxu1 %v11010_v0 }
 0x5c6   :  { %6946 = vmatprep.subr.mxu1 %v10910_v32 }
 0x632   :  { %v2633_v1 = vpop.f32.mrf.mxu1  ;;  %v2709_v3 = vpop.f32.mrf.mxu0 }
 0x633   :  { %v2634_v6 = vadd.f32 %v9644_v5, %v2633_v1  ;;  %v2710_v47 = vadd.f32 %v9650_v51, %v2709_v3 }
 0x634   :  { %v6726_v7 = vpop.f32.mrf.mxu1  ;;  %v6761_v16 = vpop.f32.mrf.mxu0 }
 0x635   :  { %v5378_v30 = vmul.f32 -1.442695, %v2634_v6  ;;  %v5379_v49 = vmul.f32 -1.442695, %v2710_v47 }
 0x637   :  { %7556 = vpow2.f32 %v5378_v30 }
 0x638   :  { %7558 = vpow2.f32 %v5379_v49 }
 0x643   :  { %v2788_v34 = vpop.f32.mrf.mxu1  ;;  %v2860_v41 = vpop.f32.mrf.mxu0 }
 0x644   :  { %v7557_v28 = vpop.eup %7556  ;;  %v2861_v38 = vadd.f32 %v9656_v37, %v2860_v41  ;;  %v2789_v23 = vadd.f32 %v9662_v43, %v2788_v34 }
 0x645   :  { %v2640_v24 = vadd.f32 1.0, %v7557_v28  ;;  %v6780_v26 = vpop.f32.mrf.mxu1  ;;  %v6799_v20 = vpop.f32.mrf.mxu0 }
 0x646   :  { %v7559_v22 = vpop.eup %7558 }
 0x647   :  { %7560 = vrcp.f32 %v2640_v24  ;;  %v2716_v36 = vadd.f32 1.0, %v7559_v22 }
 0x649   :  { %7562 = vrcp.f32 %v2716_v36 }
 0x654   :  { %v7561_v40 = vpop.eup %7560 }
 0x655   :  { %v2864_v18 = vmul.f32 %v7561_v40, %v2861_v38  ;;  %v2941_v19 = vpop.f32.mrf.mxu1  ;;  %v3015_v39 = vpop.f32.mrf.mxu0 }
 0x656   :  { %v2945_v48 = vadd.f32 %v2941_v19, %v2874_v46  ;;  %v3019_v62 = vadd.f32 %v3015_v39, %v2948_v60  ;;  %v7563_v0 = vpop.eup %7562  ;;  %v9757_v60 = vld [vmem:[%s10724_s3 + $0x68] sm:$0xff] }
 0x657   :  { %v2865_v53 = vadd.f32 %v2864_v18, %v2789_v23  ;;  %v6818_v55 = vpop.f32.mrf.mxu1  ;;  %v6837_v57 = vpop.f32.mrf.mxu0  ;;  %v2867_v3 = vsub.f32 1.0, %v7563_v0  ;;  %v2869_v30 = vmul.f32 %v7563_v0, %v9400_v31  ;;  %v3104_v31 = vld [vmem:[#allocation4 + $0x8] sm:$0x3]  ;;  %v9785_v0 = vld [vmem:[%s10724_s3 + $0x58] sm:$0xff] }
 0x658   :  { %v2946_v58 = vadd.f32 %v9390_v59, %v2945_v48  ;;  %v3020_v63 = vadd.f32 %v9396_v50, %v3019_v62  ;;  %v9737_v55 = vld [vmem:[%s10724_s3 + $0x30] sm:$0xff]  ;;  %v9771_v62 = vld [vmem:[%s10724_s3 + $0x60] sm:$0xff] }
 0x659   :  { %7564 = vtanh.f32 %v2865_v53  ;;  %v9729_v53 = vld [vmem:[%s10724_s3 + $0x78] sm:$0xff]  ;;  %v9743_v57 = vld [vmem:[%s10724_s3 + $0x70] sm:$0xff] }
 0x65a   :  { %v5385_v61 = vmul.f32 -1.442695, %v2946_v58  ;;  %v5386_v1 = vmul.f32 -1.442695, %v3020_v63  ;;  %v9751_v58 = vld [vmem:[%s10724_s3 + $0x28] sm:$0xff]  ;;  %v9779_v63 = vld [vmem:[%s10724_s3 + $0x18] sm:$0xff] }
 0x65c   :  { %7566 = vpow2.f32 %v5385_v61  ;;  %v9765_v61 = vld [vmem:[%s10724_s3 + $0x20] sm:$0xff] }
 0x65d   :  { %7568 = vpow2.f32 %v5386_v1  ;;  %v9793_v1 = vld [vmem:[%s10724_s3 + $0x10] sm:$0xff] }
 0x666   :  { %v7565_v6 = vpop.eup %7564  ;;  %v3087_v7 = vpop.f32.mrf.mxu1 }
 0x667   :  { %v2868_v16 = vmul.f32 %v7565_v6, %v2867_v3  ;;  %v3088_v26 = vadd.f32 %v9409_v42, %v3087_v7  ;;  %v9799_v3 = vld [vmem:[%s10724_s3 + $0x50] sm:$0xff]  ;;  %v9807_v6 = vld [vmem:[%s10724_s3 + $0x8] sm:$0xff] }
 0x668   :  { %v6856_v47 = vpop.f32.mrf.mxu1  ;;  %v9813_v7 = vld [vmem:[%s10724_s3 + $0x48] sm:$0xff] }
 0x669   :  { %v7567_v49 = vpop.eup %7566  ;;  %v9668_v34 = vadd.f32 %v2869_v30, %v2868_v16  ;;  %v9821_v16 = vld [vmem:[%s10724_s3] sm:$0xff]  ;;  %v9844_v47 = vld [vmem:[%s10724_s3 + $0xb8] sm:$0xff] }
 0x66a   :  { %v3094_v41 = vadd.f32 1.0, %v7567_v49  ;;  %v7569_v28 = vpop.eup %7568  ;;  %v9829_v30 = vld [vmem:[%s10724_s3 + $0x40] sm:$0xff]  ;;  %v9852_v49 = vld [vmem:[%s10726_s5 + $0x78] sm:$0xff] }
 0x66b   :  { %3113 = vrot.lane.b32.xlu1 %v9668_v34, %s7832_s22  ;;  %2872 = vst.msk [vmem:[#allocation5 + $0x6] sm:$0x3] %vm251_vm3, %v9668_v34  ;;  %v3100_v24 = vadd.f32 1.0, %v7569_v28  ;;  %v9866_v28 = vld [vmem:[%s10726_s5 + $0x70] sm:$0xff] }
 0x66c   :  { %7570 = vrcp.f32 %v3094_v41  ;;  %v9858_v41 = vld [vmem:[%s10724_s3 + $0xb0] sm:$0xff] }
 0x66d   :  { %7572 = vrcp.f32 %v3100_v24  ;;  %v9872_v24 = vld [vmem:[%s10724_s3 + $0xa8] sm:$0xff] }
 0x679   :  { %v7571_v20 = vpop.eup %7570 }
 0x67a   :  { %v3105_v22 = vmul.f32 %v7571_v20, %v3088_v26  ;;  %v7573_v38 = vpop.eup %7572  ;;  %v9880_v26 = vld [vmem:[%s10726_s5 + $0x68] sm:$0xff]  ;;  %v9886_v20 = vld [vmem:[%s10724_s3 + $0xa0] sm:$0xff] }
 0x67b   :  { %v3108_v40 = vsub.f32 1.0, %v7573_v38  ;;  %v3110_v18 = vmul.f32 %v7573_v38, %v9413_v4  ;;  %v9723_v4 = vld [vmem:[%s10724_s3 + $0x38] sm:$0xff]  ;;  %11014 = vst [vmem:[#allocation21_spill] sm:$0xff] %v9880_v26  ;;  %11015 = vst [vmem:[#allocation23_spill] sm:$0xff] %v9886_v20  ;;  %v9914_v38 = vld [vmem:[%s10724_s3 + $0x90] sm:$0xff] }
 0x67c   :  { %v3106_v36 = vadd.f32 %v3105_v22, %v3104_v31  ;;  %v9894_v22 = vld [vmem:[%s10726_s5 + $0x60] sm:$0xff]  ;;  %v9900_v31 = vld [vmem:[%s10724_s3 + $0x98] sm:$0xff]  ;;  %11019 = vst [vmem:[#allocation27_spill] sm:$0xff] %v9914_v38 }
 0x67d   :  { %11016 = vst [vmem:[#allocation24_spill] sm:$0xff] %v9894_v22  ;;  %11017 = vst [vmem:[#allocation25_spill] sm:$0xff] %v9900_v31 }
 0x67e   :  { %7574 = vtanh.f32 %v3106_v36  ;;  %v9908_v36 = vld [vmem:[%s10726_s5 + $0x58] sm:$0xff] }
 0x67f   :  { %11018 = vst [vmem:[#allocation26_spill] sm:$0xff] %v9908_v36 }
 0x68b   :  { %v7575_v23 = vpop.eup %7574 }
 0x68c   :  { %v3109_v46 = vmul.f32 %v7575_v23, %v3108_v40  ;;  %v9922_v40 = vld [vmem:[%s10726_s5 + $0x50] sm:$0xff]  ;;  %v9928_v23 = vld [vmem:[%s10724_s3 + $0x88] sm:$0xff] }
 0x68d   :  { %11020 = vst [vmem:[#allocation28_spill] sm:$0xff] %v9922_v40  ;;  %11021 = vst [vmem:[#allocation29_spill] sm:$0xff] %v9928_v23 }
 0x68e   :  { %v9676_v19 = vadd.f32 %v3110_v18, %v3109_v46  ;;  %v9936_v18 = vld [vmem:[%s10726_s5 + $0x48] sm:$0xff]  ;;  %v9942_v46 = vld [vmem:[%s10724_s3 + $0x80] sm:$0xff] }
 0x68f   :  { %11022 = vst [vmem:[#allocation30_spill] sm:$0xff] %v9936_v18  ;;  %11023 = vst [vmem:[#allocation31_spill] sm:$0xff] %v9942_v46 }
 0x6dd   :  { %v3114_v39 = vpop.permute.xlu1 %3113 }
 0x6de   :  { %v3116_v48 = vsel %vm680_vm4, %v9676_v19, %v3114_v39  ;;  %v9952_v39 = vld [vmem:[%s10726_s5 + $0xf8] sm:$0xff] }
 0x6df   :  { %6890 = vmatmul.mubr.f32.vlgmr.msra.gmra.mxu0 %v3116_v48  ;;  %6925 = vmatmul.mubr.f32.vlgmr.msra.gmra.mxu1 %v3116_v48  ;;  %11024 = vst [vmem:[#allocation32_spill] sm:$0xff] %v9952_v39  ;;  %v9958_v48 = vld [vmem:[%s10726_s5 + $0x40] sm:$0xff] }
 0x6e0   :  { %6928 = vmatpush3.msra.mxu0 %v9420_v14  ;;  %6947 = vmatpush3.msra.mxu1 %v9423_v9  ;;  %11025 = vst [vmem:[#allocation11_spill] sm:$0xff] %v9958_v48 }
 0x6e1   :  { %6929 = vmatprep.subr.mxu0 %v10910_v32  ;;  %6948 = vmatprep.subr.mxu1 %v10910_v32 }
 0x6e2   :  { %6930 = vmatpush3.msra.mxu0 %v9431_v17  ;;  %6949 = vmatpush3.msra.mxu1 %v9434_v15 }
 0x6e3   :  { %6931 = vmatprep.subr.mxu0 %v10910_v32  ;;  %6950 = vmatprep.subr.mxu1 %v10910_v32 }
 0x6e4   :  { %6932 = vmatpush3.msra.mxu0 %v9442_v29  ;;  %6951 = vmatpush3.msra.mxu1 %v9445_v10 }
 0x6e5   :  { %6933 = vmatprep.subr.mxu0 %v10910_v32  ;;  %6952 = vmatprep.subr.mxu1 %v10910_v32 }
 0x6e6   :  { %6934 = vmatpush3.msra.mxu0 %v9453_v25  ;;  %6953 = vmatpush3.msra.mxu1 %v9456_v2 }
 0x6e7   :  { %6935 = vmatprep.subr.mxu0 %v10910_v32  ;;  %6954 = vmatprep.subr.mxu1 %v10910_v32 }
 0x6e8   :  { %6936 = vmatpush3.msra.mxu0 %v9464_v12  ;;  %6955 = vmatpush3.msra.mxu1 %v9467_v21 }
 0x6e9   :  { %6937 = vmatprep.subr.mxu0 %v10910_v32  ;;  %6956 = vmatprep.subr.mxu1 %v10910_v32 }
 0x6ea   :  { %6938 = vmatpush3.msra.mxu0 %v9475_v35  ;;  %6957 = vmatpush3.msra.mxu1 %v9478_v33 }
 0x6eb   :  { %6939 = vmatprep.subr.mxu0 %v10910_v32  ;;  %6958 = vmatprep.subr.mxu1 %v10910_v32 }
 0x6ec   :  { %6940 = vmatpush3.msra.mxu0 %v9486_v8  ;;  %6959 = vmatpush3.msra.mxu1 %v9489_v27 }
 0x6ed   :  { %6941 = vmatprep.subr.mxu0 %v10910_v32  ;;  %6960 = vmatprep.subr.mxu1 %v10910_v32 }
 0x6ee   :  { %6942 = vmatpush3.msra.mxu0 %v9497_v11  ;;  %6943 = vmatprep.mubr.msk.f32.mxu0 %vm7831_vm2, %v10910_v32 }
 0x6ef   :  { %6961 = vmatpush3.msra.mxu1 %v9502_v13  ;;  %6962 = vmatprep.mubr.msk.f32.mxu1 %vm7831_vm2, %v10910_v32 }
 0x6f0   :  { %6944 = vmatmul.mubr.msk.f32.vlgmr.msra.gmra.mxu0 %vm680_vm4, %v9676_v19  ;;  %6963 = vmatmul.mubr.msk.f32.vlgmr.msra.gmra.mxu1 %vm680_vm4, %v9668_v34 }
 0x6f1   :  { %6965 = vmatprep.subr.mxu0 %v10910_v32  ;;  %6984 = vmatprep.subr.mxu1 %v10910_v32 }
 0x6f2   :  { %6966 = vmatpush3.msra.mxu0 %v9723_v4  ;;  %6985 = vmatpush3.msra.mxu1 %v9729_v53 }
 0x6f3   :  { %6967 = vmatprep.subr.mxu0 %v10910_v32  ;;  %6986 = vmatprep.subr.mxu1 %v10910_v32 }
 0x6f4   :  { %6968 = vmatpush3.msra.mxu0 %v9737_v55  ;;  %6987 = vmatpush3.msra.mxu1 %v9743_v57 }
 0x6f5   :  { %6969 = vmatprep.subr.mxu0 %v10910_v32  ;;  %6988 = vmatprep.subr.mxu1 %v10910_v32 }
 0x6f6   :  { %6970 = vmatpush3.msra.mxu0 %v9751_v58  ;;  %6989 = vmatpush3.msra.mxu1 %v9757_v60 }
 0x6f7   :  { %6971 = vmatprep.subr.mxu0 %v10910_v32  ;;  %6990 = vmatprep.subr.mxu1 %v10910_v32 }
 0x6f8   :  { %6972 = vmatpush3.msra.mxu0 %v9765_v61  ;;  %6991 = vmatpush3.msra.mxu1 %v9771_v62 }
 0x6f9   :  { %6973 = vmatprep.subr.mxu0 %v10910_v32  ;;  %6992 = vmatprep.subr.mxu1 %v10910_v32 }
 0x6fa   :  { %6974 = vmatpush3.msra.mxu0 %v9779_v63  ;;  %6993 = vmatpush3.msra.mxu1 %v9785_v0 }
 0x6fb   :  { %6975 = vmatprep.subr.mxu0 %v10910_v32  ;;  %6994 = vmatprep.subr.mxu1 %v10910_v32 }
 0x6fc   :  { %6976 = vmatpush3.msra.mxu0 %v9793_v1  ;;  %6995 = vmatpush3.msra.mxu1 %v9799_v3 }
 0x6fd   :  { %6977 = vmatprep.subr.mxu0 %v10910_v32  ;;  %6996 = vmatprep.subr.mxu1 %v10910_v32 }
 0x6fe   :  { %6978 = vmatpush3.msra.mxu0 %v9807_v6  ;;  %6997 = vmatpush3.msra.mxu1 %v9813_v7 }
 0x6ff   :  { %6979 = vmatprep.subr.mxu0 %v10910_v32  ;;  %6998 = vmatprep.subr.mxu1 %v10910_v32 }
 0x700   :  { %6980 = vmatpush3.msra.mxu0 %v9821_v16  ;;  %6981 = vmatprep.mubr.msk.f32.mxu0 %vm7831_vm2, %v10910_v32 }
 0x701   :  { %6999 = vmatpush3.msra.mxu1 %v9829_v30  ;;  %7000 = vmatprep.mubr.msk.f32.mxu1 %vm7831_vm2, %v10910_v32 }
 0x702   :  { %6982 = vmatmul.mubr.msk.f32.vlgmr.msra.gmra.mxu0 %vm680_vm4, %v9676_v19  ;;  %7001 = vmatmul.mubr.msk.f32.vlgmr.msra.gmra.mxu1 %vm680_vm4, %v9676_v19 }
 0x703   :  { %7003 = vmatprep.subr.mxu0 %v10910_v32  ;;  %7019 = vmatprep.mubr.msk.f32.mxu0 %vm7831_vm2, %v10910_v32 }
 0x704   :  { %7004 = vmatpush3.msra.mxu0 %v9844_v47  ;;  %7022 = vmatprep.subr.mxu1 %v10910_v32 }
 0x705   :  { %7005 = vmatprep.subr.mxu0 %v10910_v32  ;;  %7023 = vmatpush3.msra.mxu1 %v9852_v49 }
 0x706   :  { %7006 = vmatpush3.msra.mxu0 %v9858_v41  ;;  %7024 = vmatprep.subr.mxu1 %v10910_v32 }
 0x707   :  { %7007 = vmatprep.subr.mxu0 %v10910_v32  ;;  %7025 = vmatpush3.msra.mxu1 %v9866_v28 }
 0x708   :  { %7008 = vmatpush3.msra.mxu0 %v9872_v24  ;;  %7026 = vmatprep.subr.mxu1 %v10910_v32 }
 0x709   :  { %7009 = vmatprep.subr.mxu0 %v10910_v32  ;;  %7027 = vmatpush3.msra.mxu1 %v9880_v26 }
 0x70a   :  { %7010 = vmatpush3.msra.mxu0 %v9886_v20  ;;  %7028 = vmatprep.subr.mxu1 %v10910_v32 }
 0x70b   :  { %7011 = vmatprep.subr.mxu0 %v10910_v32  ;;  %7029 = vmatpush3.msra.mxu1 %v9894_v22 }
 0x70c   :  { %7012 = vmatpush3.msra.mxu0 %v9900_v31  ;;  %7030 = vmatprep.subr.mxu1 %v10910_v32 }
 0x70d   :  { %7013 = vmatprep.subr.mxu0 %v10910_v32  ;;  %7031 = vmatpush3.msra.mxu1 %v9908_v36 }
 0x70e   :  { %7014 = vmatpush3.msra.mxu0 %v9914_v38  ;;  %7032 = vmatprep.subr.mxu1 %v10910_v32 }
 0x70f   :  { %7015 = vmatprep.subr.mxu0 %v10910_v32  ;;  %7033 = vmatpush3.msra.mxu1 %v9922_v40 }
 0x710   :  { %7016 = vmatpush3.msra.mxu0 %v9928_v23  ;;  %7034 = vmatprep.subr.mxu1 %v10910_v32 }
 0x711   :  { %7017 = vmatprep.subr.mxu0 %v10910_v32  ;;  %7035 = vmatpush3.msra.mxu1 %v9936_v18 }
 0x712   :  { %7018 = vmatpush3.msra.mxu0 %v9942_v46  ;;  %7036 = vmatprep.subr.mxu1 %v10910_v32  ;;  %v9966_v46 = vld [vmem:[%s10726_s5 + $0xf0] sm:$0xff] }
 0x713   :  { %7020 = vmatmul.mubr.msk.f32.vlgmr.msra.gmra.mxu0 %vm680_vm4, %v9676_v19  ;;  %7057 = vmatprep.subr.mxu0 %v10910_v32  ;;  %11026 = vst [vmem:[#allocation18_spill] sm:$0xff] %v9966_v46 }
 0x714   :  { %7058 = vmatpush3.msra.mxu0 %v9952_v39  ;;  %7037 = vmatpush3.msra.mxu1 %v9958_v48  ;;  %v9972_v39 = vld [vmem:[%s10726_s5 + $0x38] sm:$0xff]  ;;  %v9980_v48 = vld [vmem:[%s10726_s5 + $0xe8] sm:$0xff] }
 0x715   :  { %7059 = vmatprep.subr.mxu0 %v10910_v32  ;;  %7038 = vmatprep.subr.mxu1 %v10910_v32  ;;  %11027 = vst [vmem:[#allocation12_spill] sm:$0xff] %v9972_v39  ;;  %11028 = vst [vmem:[#allocation20_spill] sm:$0xff] %v9980_v48 }
 0x716   :  { %7060 = vmatpush3.msra.mxu0 %v9966_v46  ;;  %7039 = vmatpush3.msra.mxu1 %v9972_v39  ;;  %v9986_v46 = vld [vmem:[%s10726_s5 + $0x30] sm:$0xff]  ;;  %v9994_v39 = vld [vmem:[%s10726_s5 + $0xe0] sm:$0xff] }
 0x717   :  { %7061 = vmatprep.subr.mxu0 %v10910_v32  ;;  %7040 = vmatprep.subr.mxu1 %v10910_v32  ;;  %11029 = vst [vmem:[#allocation33_spill] sm:$0xff] %v9986_v46  ;;  %11030 = vst [vmem:[#allocation13_spill] sm:$0xff] %v9994_v39 }
 0x718   :  { %7062 = vmatpush3.msra.mxu0 %v9980_v48  ;;  %7041 = vmatpush3.msra.mxu1 %v9986_v46  ;;  %v10000_v48 = vld [vmem:[%s10726_s5 + $0x28] sm:$0xff]  ;;  %v10008_v46 = vld [vmem:[%s10726_s5 + $0xd8] sm:$0xff] }
 0x719   :  { %7063 = vmatprep.subr.mxu0 %v10910_v32  ;;  %7042 = vmatprep.subr.mxu1 %v10910_v32  ;;  %11031 = vst [vmem:[#allocation34_spill] sm:$0xff] %v10000_v48  ;;  %11032 = vst [vmem:[#allocation22_spill] sm:$0xff] %v10008_v46 }
 0x71a   :  { %7064 = vmatpush3.msra.mxu0 %v9994_v39  ;;  %7043 = vmatpush3.msra.mxu1 %v10000_v48  ;;  %v10017_v48 = vld [vmem:[%s10726_s5 + $0xd0] sm:$0xff] }
 0x71b   :  { %7065 = vmatprep.subr.mxu0 %v10910_v32  ;;  %7044 = vmatprep.subr.mxu1 %v10910_v32  ;;  %11033 = vst [vmem:[#allocation35_spill] sm:$0xff] %v10017_v48 }
 0x71c   :  { %7066 = vmatpush3.msra.mxu0 %v10008_v46  ;;  %7045 = vmatpush3.msra.mxu1 %v10995_v45  ;;  %v10026_v45 = vld [vmem:[%s10726_s5 + $0xc8] sm:$0xff] }
 0x71d   :  { %7067 = vmatprep.subr.mxu0 %v10910_v32  ;;  %7046 = vmatprep.subr.mxu1 %v10910_v32  ;;  %11034 = vst [vmem:[#allocation14_spill] sm:$0xff] %v10026_v45 }
 0x71e   :  { %7068 = vmatpush3.msra.mxu0 %v10017_v48  ;;  %7047 = vmatpush3.msra.mxu1 %v10997_v44  ;;  %v10035_v44 = vld [vmem:[%s10726_s5 + $0xc0] sm:$0xff] }
 0x71f   :  { %7069 = vmatprep.subr.mxu0 %v10910_v32  ;;  %7048 = vmatprep.subr.mxu1 %v10910_v32  ;;  %11035 = vst [vmem:[#allocation36_spill] sm:$0xff] %v10035_v44 }
 0x720   :  { %7070 = vmatpush3.msra.mxu0 %v10026_v45  ;;  %7049 = vmatpush3.msra.mxu1 %v10999_v52  ;;  %v10044_v52 = vld [vmem:[%s10726_s5 + $0xb8] sm:$0xff] }
 0x721   :  { %7071 = vmatprep.subr.mxu0 %v10910_v32  ;;  %7050 = vmatprep.subr.mxu1 %v10910_v32  ;;  %11036 = vst [vmem:[#allocation15_spill] sm:$0xff] %v10044_v52 }
 0x722   :  { %7072 = vmatpush3.msra.mxu0 %v10035_v44  ;;  %7051 = vmatpush3.msra.mxu1 %v11001_v54  ;;  %v10054_v54 = vld [vmem:[%s10726_s5 + $0xb0] sm:$0xff] }
 0x723   :  { %7073 = vmatprep.subr.mxu0 %v10910_v32  ;;  %7052 = vmatprep.subr.mxu1 %v10910_v32  ;;  %11037 = vst [vmem:[#allocation37_spill] sm:$0xff] %v10054_v54 }
 0x724   :  { %7074 = vmatpush3.msra.mxu0 %v10044_v52  ;;  %7053 = vmatpush3.msra.mxu1 %v11003_v56  ;;  %v10064_v56 = vld [vmem:[%s10726_s5 + $0xa8] sm:$0xff]  ;;  %v10078_v52 = vld [vmem:[%s10726_s5 + $0x98] sm:$0xff] }
 0x725   :  { %7075 = vmatprep.subr.mxu0 %v10910_v32  ;;  %7054 = vmatprep.mubr.msk.f32.mxu1 %vm7831_vm2, %v10910_v32  ;;  %11038 = vst [vmem:[#allocation38_spill] sm:$0xff] %v10064_v56  ;;  %11040 = vst [vmem:[#allocation40_spill] sm:$0xff] %v10078_v52 }
 0x726   :  { %7076 = vmatpush3.msra.mxu0 %v10054_v54  ;;  %7089 = vmatprep.mubr.msk.f32.mxu0 %vm7831_vm2, %v10910_v32  ;;  %v10071_v54 = vld [vmem:[%s10726_s5 + $0xa0] sm:$0xff] }
 0x727   :  { %7077 = vmatprep.subr.mxu0 %v10910_v32  ;;  %7092 = vmatprep.subr.mxu1 %v10910_v32  ;;  %11039 = vst [vmem:[#allocation39_spill] sm:$0xff] %v10071_v54 }
 0x728   :  { %7078 = vmatpush3.msra.mxu0 %v10064_v56  ;;  %v10085_v56 = vld [vmem:[%s10726_s5 + $0x90] sm:$0xff] }
 0x729   :  { %7079 = vmatprep.subr.mxu0 %v10910_v32  ;;  %11041 = vst [vmem:[#allocation41_spill] sm:$0xff] %v10085_v56 }
 0x72a   :  { %7080 = vmatpush3.msra.mxu0 %v10071_v54  ;;  %v10092_v54 = vld [vmem:[%s10726_s5 + $0x88] sm:$0xff] }
 0x72b   :  { %7081 = vmatprep.subr.mxu0 %v10910_v32  ;;  %11042 = vst [vmem:[#allocation42_spill] sm:$0xff] %v10092_v54 }
 0x72c   :  { %7082 = vmatpush3.msra.mxu0 %v10078_v52  ;;  %v10099_v52 = vld [vmem:[%s10726_s5 + $0x80] sm:$0xff] }
 0x72d   :  { %7083 = vmatprep.subr.mxu0 %v10910_v32  ;;  %11043 = vst [vmem:[#allocation43_spill] sm:$0xff] %v10099_v52 }
 0x72e   :  { %7084 = vmatpush3.msra.mxu0 %v10085_v56 }
 0x72f   :  { %7085 = vmatprep.subr.mxu0 %v10910_v32 }
 0x730   :  { %7086 = vmatpush3.msra.mxu0 %v10092_v54 }
 0x731   :  { %7087 = vmatprep.subr.mxu0 %v10910_v32 }
 0x732   :  { %7088 = vmatpush3.msra.mxu0 %v10099_v52 }
 0x733   :  { %7111 = vmatprep.subr.mxu0 %v10910_v32 }
 0x79f   :  { %v3183_v56 = vpop.f32.mrf.mxu0  ;;  %v3259_v44 = vpop.f32.mrf.mxu1 }
 0x7a0   :  { %v3184_v45 = vadd.f32 %v9644_v5, %v3183_v56  ;;  %v3260_v54 = vadd.f32 %v9650_v51, %v3259_v44 }
 0x7a1   :  { %v6891_v48 = vpop.f32.mrf.mxu0  ;;  %v6926_v46 = vpop.f32.mrf.mxu1 }
 0x7a2   :  { %v5387_v39 = vmul.f32 -1.442695, %v3184_v45  ;;  %v5388_v18 = vmul.f32 -1.442695, %v3260_v54  ;;  %v3424_v48 = vld [vmem:[#allocation2 + $0xa] sm:$0x3] }
 0x7a4   :  { %7576 = vpow2.f32 %v5387_v39 }
 0x7a5   :  { %7578 = vpow2.f32 %v5388_v18 }
 0x7b0   :  { %v3338_v23 = vpop.f32.mrf.mxu0  ;;  %v3410_v40 = vpop.f32.mrf.mxu1 }
 0x7b1   :  { %v7577_v38 = vpop.eup %7576  ;;  %v3411_v26 = vadd.f32 %v9656_v37, %v3410_v40  ;;  %v3339_v46 = vadd.f32 %v9662_v43, %v3338_v23 }
 0x7b2   :  { %v3190_v36 = vadd.f32 1.0, %v7577_v38  ;;  %v6945_v31 = vpop.f32.mrf.mxu0  ;;  %v6964_v52 = vpop.f32.mrf.mxu1 }
 0x7b3   :  { %v7579_v22 = vpop.eup %7578 }
 0x7b4   :  { %7580 = vrcp.f32 %v3190_v36  ;;  %v3266_v20 = vadd.f32 1.0, %v7579_v22  ;;  %v3498_v36 = vld [vmem:[#allocation3 + $0xa] sm:$0x3] }
 0x7b6   :  { %7582 = vrcp.f32 %v3266_v20 }
 0x7c1   :  { %v7581_v56 = vpop.eup %7580 }
 0x7c2   :  { %v3414_v39 = vmul.f32 %v7581_v56, %v3411_v26  ;;  %v3491_v45 = vpop.f32.mrf.mxu0  ;;  %v3565_v44 = vpop.f32.mrf.mxu1 }
 0x7c3   :  { %v3495_v18 = vadd.f32 %v3491_v45, %v3424_v48  ;;  %v3569_v22 = vadd.f32 %v3565_v44, %v3498_v36  ;;  %v7583_v20 = vpop.eup %7582 }
 0x7c4   :  { %v3415_v54 = vadd.f32 %v3414_v39, %v3339_v46  ;;  %v6983_v51 = vpop.f32.mrf.mxu0  ;;  %v7002_v5 = vpop.f32.mrf.mxu1  ;;  %v3417_v23 = vsub.f32 1.0, %v7583_v20  ;;  %v3419_v46 = vmul.f32 %v7583_v20, %v9668_v34  ;;  %v3654_v34 = vld [vmem:[#allocation4 + $0xa] sm:$0x3] }
 0x7c5   :  { %v3496_v31 = vadd.f32 %v9390_v59, %v3495_v18  ;;  %v3570_v40 = vadd.f32 %v9396_v50, %v3569_v22 }
 0x7c6   :  { %7584 = vtanh.f32 %v3415_v54 }
 0x7c7   :  { %v5394_v38 = vmul.f32 -1.442695, %v3496_v31  ;;  %v5395_v52 = vmul.f32 -1.442695, %v3570_v40 }
 0x7c9   :  { %7586 = vpow2.f32 %v5394_v38 }
 0x7ca   :  { %7588 = vpow2.f32 %v5395_v52 }
 0x7d3   :  { %v7585_v26 = vpop.eup %7584  ;;  %v3637_v56 = vpop.f32.mrf.mxu0 }
 0x7d4   :  { %v3418_v43 = vmul.f32 %v7585_v26, %v3417_v23  ;;  %v3638_v45 = vadd.f32 %v9409_v42, %v3637_v56  ;;  %v11044_v42 = vld [vmem:[#allocation21_spill] sm:$0xff]  ;;  %v11062_v23 = vld [vmem:[#allocation22_spill] sm:$0xff]  ;;  %v11064_v56 = vld [vmem:[#allocation35_spill] sm:$0xff] }
 0x7d5   :  { %v7021_v51 = vpop.f32.mrf.mxu0  ;;  %v10256_v26 = vld [vmem:[%s10726_s5 + $0x20] sm:$0xff] }
 0x7d6   :  { %v7587_v5 = vpop.eup %7586  ;;  %v10110_v39 = vadd.f32 %v3419_v46, %v3418_v43  ;;  %11063 = vst [vmem:[#allocation21_spill] sm:$0xff] %v10256_v26  ;;  %v10265_v46 = vld [vmem:[%s10726_s5 + $0x18] sm:$0xff]  ;;  %v11066_v51 = vld [vmem:[#allocation14_spill] sm:$0xff] }
 0x7d7   :  { %v3644_v59 = vadd.f32 1.0, %v7587_v5  ;;  %v7589_v50 = vpop.eup %7588  ;;  %v10274_v5 = vld [vmem:[%s10726_s5 + $0x10] sm:$0xff] }
 0x7d8   :  { %3663 = vrot.lane.b32.xlu0 %v10110_v39, %s7832_s22  ;;  %3422 = vst.msk [vmem:[#allocation5 + $0x8] sm:$0x3] %vm251_vm3, %v10110_v39  ;;  %v3650_v48 = vadd.f32 1.0, %v7589_v50  ;;  %v10283_v50 = vld [vmem:[%s10726_s5 + $0x8] sm:$0xff] }
 0x7d9   :  { %7590 = vrcp.f32 %v3644_v59  ;;  %v11068_v59 = vld [vmem:[#allocation36_spill] sm:$0xff] }
 0x7da   :  { %7592 = vrcp.f32 %v3650_v48  ;;  %v11070_v48 = vld [vmem:[#allocation15_spill] sm:$0xff] }
 0x7e6   :  { %v7591_v44 = vpop.eup %7590 }
 0x7e7   :  { %v3655_v18 = vmul.f32 %v7591_v44, %v3638_v45  ;;  %v7593_v43 = vpop.eup %7592  ;;  %v10292_v45 = vld [vmem:[%s10726_s5] sm:$0xff]  ;;  %v11072_v44 = vld [vmem:[#allocation37_spill] sm:$0xff] }
 0x7e8   :  { %v3658_v31 = vsub.f32 1.0, %v7593_v43  ;;  %v3660_v38 = vmul.f32 %v7593_v43, %v9676_v19  ;;  %v11061_v19 = vld [vmem:[#allocation34_spill] sm:$0xff]  ;;  %v11076_v43 = vld [vmem:[#allocation41_spill] sm:$0xff] }
 0x7e9   :  { %v3656_v54 = vadd.f32 %v3655_v18, %v3654_v34  ;;  %v11073_v18 = vld [vmem:[#allocation38_spill] sm:$0xff]  ;;  %v11074_v34 = vld [vmem:[#allocation39_spill] sm:$0xff] }
 0x7eb   :  { %7594 = vtanh.f32 %v3656_v54  ;;  %v11075_v54 = vld [vmem:[#allocation40_spill] sm:$0xff] }
 0x7f8   :  { %v7595_v36 = vpop.eup %7594 }
 0x7f9   :  { %v3659_v22 = vmul.f32 %v7595_v36, %v3658_v31  ;;  %v11077_v31 = vld [vmem:[#allocation42_spill] sm:$0xff]  ;;  %v11078_v36 = vld [vmem:[#allocation43_spill] sm:$0xff] }
 0x7fb   :  { %v10118_v40 = vadd.f32 %v3660_v38, %v3659_v22 }
 0x84a   :  { %v3664_v20 = vpop.permute.xlu0 %3663 }
 0x84b   :  { %v3666_v52 = vsel %vm680_vm4, %v10118_v40, %v3664_v20  ;;  %v11079_v20 = vld [vmem:[#allocation16_spill] sm:$0xff] }
 0x84c   :  { %7055 = vmatmul.mubr.f32.vlgmr.msra.gmra.mxu1 %v3666_v52  ;;  %7090 = vmatmul.mubr.f32.vlgmr.msra.gmra.mxu0 %v3666_v52 }
 0x84d   :  { %7093 = vmatpush3.msra.mxu1 %v9420_v14  ;;  %7112 = vmatpush3.msra.mxu0 %v9423_v9  ;;  %v11045_v14 = vld [vmem:[#allocation23_spill] sm:$0xff]  ;;  %v11046_v9 = vld [vmem:[#allocation24_spill] sm:$0xff] }
 0x84e   :  { %7094 = vmatprep.subr.mxu1 %v10910_v32  ;;  %7113 = vmatprep.subr.mxu0 %v10910_v32  ;;  %11065 = vst [vmem:[#allocation23_spill] sm:$0xff] %v10265_v46  ;;  %11067 = vst [vmem:[#allocation24_spill] sm:$0xff] %v10274_v5 }
 0x84f   :  { %7095 = vmatpush3.msra.mxu1 %v9431_v17  ;;  %7114 = vmatpush3.msra.mxu0 %v9434_v15  ;;  %v11047_v17 = vld [vmem:[#allocation25_spill] sm:$0xff]  ;;  %v11048_v15 = vld [vmem:[#allocation26_spill] sm:$0xff] }
 0x850   :  { %7096 = vmatprep.subr.mxu1 %v10910_v32  ;;  %7115 = vmatprep.subr.mxu0 %v10910_v32  ;;  %11069 = vst [vmem:[#allocation25_spill] sm:$0xff] %v10283_v50  ;;  %11071 = vst [vmem:[#allocation26_spill] sm:$0xff] %v10292_v45 }
 0x851   :  { %7097 = vmatpush3.msra.mxu1 %v9442_v29  ;;  %7116 = vmatpush3.msra.mxu0 %v9445_v10  ;;  %v11049_v29 = vld [vmem:[#allocation27_spill] sm:$0xff]  ;;  %v11050_v10 = vld [vmem:[#allocation28_spill] sm:$0xff] }
 0x852   :  { %7098 = vmatprep.subr.mxu1 %v10910_v32  ;;  %7117 = vmatprep.subr.mxu0 %v10910_v32 }
 0x853   :  { %7099 = vmatpush3.msra.mxu1 %v9453_v25  ;;  %7118 = vmatpush3.msra.mxu0 %v9456_v2  ;;  %v11051_v25 = vld [vmem:[#allocation29_spill] sm:$0xff]  ;;  %v11052_v2 = vld [vmem:[#allocation30_spill] sm:$0xff] }
 0x854   :  { %7100 = vmatprep.subr.mxu1 %v10910_v32  ;;  %7119 = vmatprep.subr.mxu0 %v10910_v32 }
 0x855   :  { %7101 = vmatpush3.msra.mxu1 %v9464_v12  ;;  %7120 = vmatpush3.msra.mxu0 %v9467_v21  ;;  %v11053_v12 = vld [vmem:[#allocation31_spill] sm:$0xff]  ;;  %v11054_v21 = vld [vmem:[#allocation32_spill] sm:$0xff] }
 0x856   :  { %7102 = vmatprep.subr.mxu1 %v10910_v32  ;;  %7121 = vmatprep.subr.mxu0 %v10910_v32 }
 0x857   :  { %7103 = vmatpush3.msra.mxu1 %v9475_v35  ;;  %7122 = vmatpush3.msra.mxu0 %v9478_v33  ;;  %v11055_v35 = vld [vmem:[#allocation11_spill] sm:$0xff]  ;;  %v11056_v33 = vld [vmem:[#allocation18_spill] sm:$0xff] }
 0x858   :  { %7104 = vmatprep.subr.mxu1 %v10910_v32  ;;  %7123 = vmatprep.subr.mxu0 %v10910_v32 }
 0x859   :  { %7105 = vmatpush3.msra.mxu1 %v9486_v8  ;;  %7124 = vmatpush3.msra.mxu0 %v9489_v27  ;;  %v11057_v8 = vld [vmem:[#allocation12_spill] sm:$0xff] }
 0x85a   :  { %7106 = vmatprep.subr.mxu1 %v10910_v32  ;;  %7125 = vmatprep.subr.mxu0 %v10910_v32  ;;  %v11058_v27 = vld [vmem:[#allocation20_spill] sm:$0xff] }
 0x85b   :  { %7107 = vmatpush3.msra.mxu1 %v9497_v11  ;;  %7108 = vmatprep.mubr.msk.f32.mxu1 %vm7831_vm2, %v10910_v32  ;;  %v11059_v11 = vld [vmem:[#allocation33_spill] sm:$0xff] }
 0x85c   :  { %7126 = vmatpush3.msra.mxu0 %v9502_v13  ;;  %7127 = vmatprep.mubr.msk.f32.mxu0 %vm7831_vm2, %v10910_v32  ;;  %v11060_v13 = vld [vmem:[#allocation13_spill] sm:$0xff] }
 0x85d   :  { %7109 = vmatmul.mubr.msk.f32.vlgmr.msra.gmra.mxu1 %vm680_vm4, %v10118_v40  ;;  %7128 = vmatmul.mubr.msk.f32.vlgmr.msra.gmra.mxu0 %vm680_vm4, %v10110_v39 }
 0x85e   :  { %7130 = vmatprep.subr.mxu1 %v10910_v32  ;;  %7149 = vmatprep.subr.mxu0 %v10910_v32 }
 0x85f   :  { %7131 = vmatpush3.msra.mxu1 %v9723_v4  ;;  %7150 = vmatpush3.msra.mxu0 %v9729_v53 }
 0x860   :  { %7132 = vmatprep.subr.mxu1 %v10910_v32  ;;  %7151 = vmatprep.subr.mxu0 %v10910_v32 }
 0x861   :  { %7133 = vmatpush3.msra.mxu1 %v9737_v55  ;;  %7152 = vmatpush3.msra.mxu0 %v9743_v57 }
 0x862   :  { %7134 = vmatprep.subr.mxu1 %v10910_v32  ;;  %7153 = vmatprep.subr.mxu0 %v10910_v32 }
 0x863   :  { %7135 = vmatpush3.msra.mxu1 %v9751_v58  ;;  %7154 = vmatpush3.msra.mxu0 %v9757_v60 }
 0x864   :  { %7136 = vmatprep.subr.mxu1 %v10910_v32  ;;  %7155 = vmatprep.subr.mxu0 %v10910_v32 }
 0x865   :  { %7137 = vmatpush3.msra.mxu1 %v9765_v61  ;;  %7156 = vmatpush3.msra.mxu0 %v9771_v62 }
 0x866   :  { %7138 = vmatprep.subr.mxu1 %v10910_v32  ;;  %7157 = vmatprep.subr.mxu0 %v10910_v32 }
 0x867   :  { %7139 = vmatpush3.msra.mxu1 %v9779_v63  ;;  %7158 = vmatpush3.msra.mxu0 %v9785_v0 }
 0x868   :  { %7140 = vmatprep.subr.mxu1 %v10910_v32  ;;  %7159 = vmatprep.subr.mxu0 %v10910_v32 }
 0x869   :  { %7141 = vmatpush3.msra.mxu1 %v9793_v1  ;;  %7160 = vmatpush3.msra.mxu0 %v9799_v3 }
 0x86a   :  { %7142 = vmatprep.subr.mxu1 %v10910_v32  ;;  %7161 = vmatprep.subr.mxu0 %v10910_v32 }
 0x86b   :  { %7143 = vmatpush3.msra.mxu1 %v9807_v6  ;;  %7162 = vmatpush3.msra.mxu0 %v9813_v7 }
 0x86c   :  { %7144 = vmatprep.subr.mxu1 %v10910_v32  ;;  %7163 = vmatprep.subr.mxu0 %v10910_v32 }
 0x86d   :  { %7145 = vmatpush3.msra.mxu1 %v9821_v16  ;;  %7146 = vmatprep.mubr.msk.f32.mxu1 %vm7831_vm2, %v10910_v32 }
 0x86e   :  { %7164 = vmatpush3.msra.mxu0 %v9829_v30  ;;  %7165 = vmatprep.mubr.msk.f32.mxu0 %vm7831_vm2, %v10910_v32 }
 0x86f   :  { %7147 = vmatmul.mubr.msk.f32.vlgmr.msra.gmra.mxu1 %vm680_vm4, %v10118_v40  ;;  %7166 = vmatmul.mubr.msk.f32.vlgmr.msra.gmra.mxu0 %vm680_vm4, %v10118_v40 }
 0x870   :  { %7168 = vmatprep.subr.mxu1 %v10910_v32  ;;  %7184 = vmatprep.mubr.msk.f32.mxu1 %vm7831_vm2, %v10910_v32 }
 0x871   :  { %7169 = vmatpush3.msra.mxu1 %v9844_v47  ;;  %7187 = vmatprep.subr.mxu0 %v10910_v32 }
 0x872   :  { %7170 = vmatprep.subr.mxu1 %v10910_v32  ;;  %7188 = vmatpush3.msra.mxu0 %v9852_v49 }
 0x873   :  { %7171 = vmatpush3.msra.mxu1 %v9858_v41  ;;  %7189 = vmatprep.subr.mxu0 %v10910_v32 }
 0x874   :  { %7172 = vmatprep.subr.mxu1 %v10910_v32  ;;  %7190 = vmatpush3.msra.mxu0 %v9866_v28 }
 0x875   :  { %7173 = vmatpush3.msra.mxu1 %v9872_v24  ;;  %7191 = vmatprep.subr.mxu0 %v10910_v32 }
 0x876   :  { %7174 = vmatprep.subr.mxu1 %v10910_v32  ;;  %7192 = vmatpush3.msra.mxu0 %v11044_v42 }
 0x877   :  { %7175 = vmatpush3.msra.mxu1 %v11045_v14  ;;  %7193 = vmatprep.subr.mxu0 %v10910_v32 }
 0x878   :  { %7176 = vmatprep.subr.mxu1 %v10910_v32  ;;  %7194 = vmatpush3.msra.mxu0 %v11046_v9 }
 0x879   :  { %7177 = vmatpush3.msra.mxu1 %v11047_v17  ;;  %7195 = vmatprep.subr.mxu0 %v10910_v32 }
 0x87a   :  { %7178 = vmatprep.subr.mxu1 %v10910_v32  ;;  %7196 = vmatpush3.msra.mxu0 %v11048_v15 }
 0x87b   :  { %7179 = vmatpush3.msra.mxu1 %v11049_v29  ;;  %7197 = vmatprep.subr.mxu0 %v10910_v32 }
 0x87c   :  { %7180 = vmatprep.subr.mxu1 %v10910_v32  ;;  %7198 = vmatpush3.msra.mxu0 %v11050_v10 }
 0x87d   :  { %7181 = vmatpush3.msra.mxu1 %v11051_v25  ;;  %7199 = vmatprep.subr.mxu0 %v10910_v32 }
 0x87e   :  { %7182 = vmatprep.subr.mxu1 %v10910_v32  ;;  %7200 = vmatpush3.msra.mxu0 %v11052_v2 }
 0x87f   :  { %7183 = vmatpush3.msra.mxu1 %v11053_v12  ;;  %7201 = vmatprep.subr.mxu0 %v10910_v32 }
 0x880   :  { %7185 = vmatmul.mubr.msk.f32.vlgmr.msra.gmra.mxu1 %vm680_vm4, %v10118_v40  ;;  %7222 = vmatprep.subr.mxu1 %v10910_v32 }
 0x881   :  { %7223 = vmatpush3.msra.mxu1 %v11054_v21  ;;  %7202 = vmatpush3.msra.mxu0 %v11055_v35 }
 0x882   :  { %7224 = vmatprep.subr.mxu1 %v10910_v32  ;;  %7203 = vmatprep.subr.mxu0 %v10910_v32 }
 0x883   :  { %7225 = vmatpush3.msra.mxu1 %v11056_v33  ;;  %7204 = vmatpush3.msra.mxu0 %v11057_v8 }
 0x884   :  { %7226 = vmatprep.subr.mxu1 %v10910_v32  ;;  %7205 = vmatprep.subr.mxu0 %v10910_v32 }
 0x885   :  { %7227 = vmatpush3.msra.mxu1 %v11058_v27  ;;  %7206 = vmatpush3.msra.mxu0 %v11059_v11 }
 0x886   :  { %7228 = vmatprep.subr.mxu1 %v10910_v32  ;;  %7207 = vmatprep.subr.mxu0 %v10910_v32 }
 0x887   :  { %7229 = vmatpush3.msra.mxu1 %v11060_v13  ;;  %7208 = vmatpush3.msra.mxu0 %v11061_v19 }
 0x888   :  { %7230 = vmatprep.subr.mxu1 %v10910_v32  ;;  %7209 = vmatprep.subr.mxu0 %v10910_v32 }
 0x889   :  { %7231 = vmatpush3.msra.mxu1 %v11062_v23  ;;  %7210 = vmatpush3.msra.mxu0 %v10256_v26 }
 0x88a   :  { %7232 = vmatprep.subr.mxu1 %v10910_v32  ;;  %7211 = vmatprep.subr.mxu0 %v10910_v32 }
 0x88b   :  { %7233 = vmatpush3.msra.mxu1 %v11064_v56  ;;  %7212 = vmatpush3.msra.mxu0 %v10265_v46 }
 0x88c   :  { %7234 = vmatprep.subr.mxu1 %v10910_v32  ;;  %7213 = vmatprep.subr.mxu0 %v10910_v32 }
 0x88d   :  { %7235 = vmatpush3.msra.mxu1 %v11066_v51  ;;  %7214 = vmatpush3.msra.mxu0 %v10274_v5 }
 0x88e   :  { %7236 = vmatprep.subr.mxu1 %v10910_v32  ;;  %7215 = vmatprep.subr.mxu0 %v10910_v32 }
 0x88f   :  { %7237 = vmatpush3.msra.mxu1 %v11068_v59  ;;  %7216 = vmatpush3.msra.mxu0 %v10283_v50 }
 0x890   :  { %7238 = vmatprep.subr.mxu1 %v10910_v32  ;;  %7217 = vmatprep.subr.mxu0 %v10910_v32 }
 0x891   :  { %7239 = vmatpush3.msra.mxu1 %v11070_v48  ;;  %7218 = vmatpush3.msra.mxu0 %v10292_v45 }
 0x892   :  { %7240 = vmatprep.subr.mxu1 %v10910_v32  ;;  %7219 = vmatprep.mubr.msk.f32.mxu0 %vm7831_vm2, %v10910_v32 }
 0x893   :  { %7241 = vmatpush3.msra.mxu1 %v11072_v44  ;;  %7254 = vmatprep.mubr.msk.f32.mxu1 %vm7831_vm2, %v10910_v32  ;;  %v11080_v44 = vld [vmem:[#allocation17_spill] sm:$0xff] }
 0x894   :  { %7242 = vmatprep.subr.mxu1 %v10910_v32  ;;  %7257 = vmatprep.subr.mxu0 %v10910_v32 }
 0x895   :  { %7243 = vmatpush3.msra.mxu1 %v11073_v18 }
 0x896   :  { %7244 = vmatprep.subr.mxu1 %v10910_v32 }
 0x897   :  { %7245 = vmatpush3.msra.mxu1 %v11074_v34 }
 0x898   :  { %7246 = vmatprep.subr.mxu1 %v10910_v32 }
 0x899   :  { %7247 = vmatpush3.msra.mxu1 %v11075_v54 }
 0x89a   :  { %7248 = vmatprep.subr.mxu1 %v10910_v32 }
 0x89b   :  { %7249 = vmatpush3.msra.mxu1 %v11076_v43 }
 0x89c   :  { %7250 = vmatprep.subr.mxu1 %v10910_v32 }
 0x89d   :  { %7251 = vmatpush3.msra.mxu1 %v11077_v31 }
 0x89e   :  { %7252 = vmatprep.subr.mxu1 %v10910_v32 }
 0x89f   :  { %7253 = vmatpush3.msra.mxu1 %v11078_v36 }
 0x8a0   :  { %7276 = vmatprep.subr.mxu1 %v10910_v32 }
 0x90c   :  { %v3733_v38 = vpop.f32.mrf.mxu1  ;;  %v3809_v22 = vpop.f32.mrf.mxu0 }
 0x90d   :  { %v3734_v52 = vadd.f32 %v11079_v20, %v3733_v38  ;;  %v3810_v43 = vadd.f32 %v11080_v44, %v3809_v22  ;;  %v3974_v20 = vld [vmem:[#allocation2 + $0xc] sm:$0x3] }
 0x90e   :  { %v7056_v34 = vpop.f32.mrf.mxu1  ;;  %v7091_v54 = vpop.f32.mrf.mxu0 }
 0x90f   :  { %v5396_v18 = vmul.f32 -1.442695, %v3734_v52  ;;  %v5397_v45 = vmul.f32 -1.442695, %v3810_v43  ;;  %v11081_v34 = vld [vmem:[#allocation19_spill] sm:$0xff] }
 0x911   :  { %7596 = vpow2.f32 %v5396_v18 }
 0x912   :  { %7598 = vpow2.f32 %v5397_v45 }
 0x91d   :  { %v3888_v48 = vpop.f32.mrf.mxu1  ;;  %v3960_v31 = vpop.f32.mrf.mxu0 }
 0x91e   :  { %v7597_v50 = vpop.eup %7596  ;;  %v3961_v56 = vadd.f32 %v9656_v37, %v3960_v31  ;;  %v3889_v54 = vadd.f32 %v11081_v34, %v3888_v48  ;;  %v4048_v37 = vld [vmem:[#allocation3 + $0xc] sm:$0x3] }
 0x91f   :  { %v3740_v59 = vadd.f32 1.0, %v7597_v50  ;;  %v7110_v5 = vpop.f32.mrf.mxu1  ;;  %v7129_v36 = vpop.f32.mrf.mxu0 }
 0x920   :  { %v7599_v51 = vpop.eup %7598  ;;  %v10322_v5 = vld [vmem:[%s10725_s4] ss:$0 sm:$0xff] }
 0x921   :  { %7600 = vrcp.f32 %v3740_v59  ;;  %v3816_v46 = vadd.f32 1.0, %v7599_v51 }
 0x923   :  { %7602 = vrcp.f32 %v3816_v46 }
 0x92e   :  { %v7601_v38 = vpop.eup %7600 }
 0x92f   :  { %v3964_v18 = vmul.f32 %v7601_v38, %v3961_v56  ;;  %v4041_v44 = vpop.f32.mrf.mxu1  ;;  %v4115_v43 = vpop.f32.mrf.mxu0  ;;  %v10328_v56 = vld [vmem:[%s10725_s4 + $0x1] ss:$0 sm:$0xff] }
 0x930   :  { %v4045_v45 = vadd.f32 %v4041_v44, %v3974_v20  ;;  %v4119_v59 = vadd.f32 %v4115_v43, %v4048_v37 }
 0x931   :  { %v3965_v22 = vadd.f32 %v3964_v18, %v3889_v54  ;;  %v7148_v52 = vpop.f32.mrf.mxu1  ;;  %v7167_v26 = vpop.f32.mrf.mxu0 }
 0x932   :  { %v4046_v51 = vadd.f32 %v10322_v5, %v4045_v45  ;;  %v4120_v50 = vadd.f32 %v10328_v56, %v4119_v59  ;;  %v7603_v26 = vpop.eup %7602  ;;  %v10341_v52 = vld [vmem:[%s10725_s4 + $0x2] ss:$0 sm:$0xff] }
 0x933   :  { %7604 = vtanh.f32 %v3965_v22  ;;  %v3967_v31 = vsub.f32 1.0, %v7603_v26  ;;  %v3969_v54 = vmul.f32 %v7603_v26, %v10110_v39 }
 0x934   :  { %v5403_v46 = vmul.f32 -1.442695, %v4046_v51  ;;  %v5404_v48 = vmul.f32 -1.442695, %v4120_v50 }
 0x936   :  { %7606 = vpow2.f32 %v5403_v46  ;;  %v4204_v46 = vld [vmem:[#allocation4 + $0xc] sm:$0x3] }
 0x937   :  { %7608 = vpow2.f32 %v5404_v48 }
 0x940   :  { %v7605_v36 = vpop.eup %7604  ;;  %v4187_v38 = vpop.f32.mrf.mxu1 }
 0x941   :  { %v3968_v34 = vmul.f32 %v7605_v36, %v3967_v31  ;;  %v4188_v39 = vadd.f32 %v10341_v52, %v4187_v38  ;;  %v10352_v38 = vld [vmem:[%s10728_s7 + $0x38] sm:$0xff] }
 0x942   :  { %v7186_v18 = vpop.f32.mrf.mxu1 }
 0x943   :  { %v7607_v20 = vpop.eup %7606  ;;  %v10332_v44 = vadd.f32 %v3969_v54, %v3968_v34 }
 0x944   :  { %v4194_v43 = vadd.f32 1.0, %v7607_v20  ;;  %v7609_v45 = vpop.eup %7608  ;;  %v10355_v20 = vld [vmem:[#allocation7 + $0x38] sm:$0xff] }
 0x945   :  { %4213 = vrot.lane.b32.xlu1 %v10332_v44, %s7832_s22  ;;  %3972 = vst.msk [vmem:[#allocation5 + $0xa] sm:$0x3] %vm251_vm3, %v10332_v44  ;;  %v4200_v22 = vadd.f32 1.0, %v7609_v45  ;;  %v10374_v45 = vld [vmem:[%s10728_s7 + $0x28] sm:$0xff] }
 0x946   :  { %7610 = vrcp.f32 %v4194_v43  ;;  %v10366_v43 = vld [vmem:[#allocation7 + $0x30] sm:$0xff] }
 0x947   :  { %7612 = vrcp.f32 %v4200_v22  ;;  %v10377_v22 = vld [vmem:[#allocation7 + $0x28] sm:$0xff] }
 0x953   :  { %v7611_v51 = vpop.eup %7610 }
 0x954   :  { %v4205_v37 = vmul.f32 %v7611_v51, %v4188_v39  ;;  %v7613_v50 = vpop.eup %7612  ;;  %v10385_v39 = vld [vmem:[%s10728_s7 + $0x20] sm:$0xff] }
 0x955   :  { %v4208_v26 = vsub.f32 1.0, %v7613_v50  ;;  %v4210_v31 = vmul.f32 %v7613_v50, %v10118_v40  ;;  %v10363_v40 = vld [vmem:[%s10728_s7 + $0x30] sm:$0xff]  ;;  %v10388_v51 = vld [vmem:[#allocation7 + $0x20] sm:$0xff] }
 0x956   :  { %v4206_v59 = vadd.f32 %v4205_v37, %v4204_v46  ;;  %v10396_v37 = vld [vmem:[%s10728_s7 + $0x18] sm:$0xff]  ;;  %v10410_v50 = vld [vmem:[#allocation7 + $0x10] sm:$0xff] }
 0x957   :  { %v10399_v46 = vld [vmem:[#allocation7 + $0x18] sm:$0xff] }
 0x958   :  { %7614 = vtanh.f32 %v4206_v59  ;;  %v10407_v59 = vld [vmem:[%s10728_s7 + $0x10] sm:$0xff] }
 0x965   :  { %v7615_v48 = vpop.eup %7614 }
 0x966   :  { %v4209_v36 = vmul.f32 %v7615_v48, %v4208_v26  ;;  %v10418_v26 = vld [vmem:[%s10728_s7 + $0x8] sm:$0xff] }
 0x967   :  { %v10421_v48 = vld [vmem:[#allocation7 + $0x8] sm:$0xff] }
 0x968   :  { %v10345_v34 = vadd.f32 %v4210_v31, %v4209_v36  ;;  %v10429_v31 = vld [vmem:[%s10728_s7] sm:$0xff] }
 0x969   :  { %v10434_v36 = vld [vmem:[#allocation7] sm:$0xff] }
 0x9b7   :  { %v4214_v54 = vpop.permute.xlu1 %4213 }
 0x9b8   :  { %v4216_v18 = vsel %vm680_vm4, %v10345_v34, %v4214_v54  ;;  %v4524_v54 = vld [vmem:[#allocation2 + $0xe] sm:$0x3] }
 0x9b9   :  { %7220 = vmatmul.mubr.f32.vlgmr.msra.gmra.mxu0 %v4216_v18  ;;  %7255 = vmatmul.mubr.f32.vlgmr.msra.gmra.mxu1 %v4216_v18 }
 0x9ba   :  { %7258 = vmatpush3.msra.mxu0 %v10352_v38  ;;  %7277 = vmatpush3.msra.mxu1 %v10355_v20 }
 0x9bb   :  { %7259 = vmatprep.subr.mxu0 %v10910_v32  ;;  %7278 = vmatprep.subr.mxu1 %v10910_v32 }
 0x9bc   :  { %7260 = vmatpush3.msra.mxu0 %v10363_v40  ;;  %7279 = vmatpush3.msra.mxu1 %v10366_v43 }
 0x9bd   :  { %7261 = vmatprep.subr.mxu0 %v10910_v32  ;;  %7280 = vmatprep.subr.mxu1 %v10910_v32 }
 0x9be   :  { %7262 = vmatpush3.msra.mxu0 %v10374_v45  ;;  %7281 = vmatpush3.msra.mxu1 %v10377_v22 }
 0x9bf   :  { %7263 = vmatprep.subr.mxu0 %v10910_v32  ;;  %7282 = vmatprep.subr.mxu1 %v10910_v32 }
 0x9c0   :  { %7264 = vmatpush3.msra.mxu0 %v10385_v39  ;;  %7283 = vmatpush3.msra.mxu1 %v10388_v51 }
 0x9c1   :  { %7265 = vmatprep.subr.mxu0 %v10910_v32  ;;  %7284 = vmatprep.subr.mxu1 %v10910_v32 }
 0x9c2   :  { %7266 = vmatpush3.msra.mxu0 %v10396_v37  ;;  %7285 = vmatpush3.msra.mxu1 %v10399_v46 }
 0x9c3   :  { %7267 = vmatprep.subr.mxu0 %v10910_v32  ;;  %7286 = vmatprep.subr.mxu1 %v10910_v32 }
 0x9c4   :  { %7268 = vmatpush3.msra.mxu0 %v10407_v59  ;;  %7287 = vmatpush3.msra.mxu1 %v10410_v50 }
 0x9c5   :  { %7269 = vmatprep.subr.mxu0 %v10910_v32  ;;  %7288 = vmatprep.subr.mxu1 %v10910_v32 }
 0x9c6   :  { %7270 = vmatpush3.msra.mxu0 %v10418_v26  ;;  %7289 = vmatpush3.msra.mxu1 %v10421_v48 }
 0x9c7   :  { %7271 = vmatprep.subr.mxu0 %v10910_v32  ;;  %7290 = vmatprep.subr.mxu1 %v10910_v32 }
 0x9c8   :  { %7272 = vmatpush3.msra.mxu0 %v10429_v31  ;;  %7273 = vmatprep.mubr.msk.f32.mxu0 %vm7831_vm2, %v10910_v32 }
 0x9c9   :  { %7291 = vmatpush3.msra.mxu1 %v10434_v36  ;;  %7292 = vmatprep.mubr.msk.f32.mxu1 %vm7831_vm2, %v10910_v32 }
 0x9ca   :  { %7274 = vmatmul.mubr.msk.f32.vlgmr.msra.gmra.mxu0 %vm680_vm4, %v10345_v34  ;;  %7293 = vmatmul.mubr.msk.f32.vlgmr.msra.gmra.mxu1 %vm680_vm4, %v10332_v44 }
 0x9cb   :  { %7295 = vmatprep.subr.mxu0 %v10910_v32  ;;  %7314 = vmatprep.subr.mxu1 %v10910_v32 }
 0x9cc   :  { %7296 = vmatpush3.msra.mxu0 %v9723_v4  ;;  %7315 = vmatpush3.msra.mxu1 %v9729_v53  ;;  %v11082_v4 = vld [vmem:[#allocation21_spill] sm:$0xff]  ;;  %v11083_v53 = vld [vmem:[#allocation35_spill] sm:$0xff] }
 0x9cd   :  { %7297 = vmatprep.subr.mxu0 %v10910_v32  ;;  %7316 = vmatprep.subr.mxu1 %v10910_v32 }
 0x9ce   :  { %7298 = vmatpush3.msra.mxu0 %v9737_v55  ;;  %7317 = vmatpush3.msra.mxu1 %v9743_v57  ;;  %v11084_v55 = vld [vmem:[#allocation23_spill] sm:$0xff]  ;;  %v11085_v57 = vld [vmem:[#allocation14_spill] sm:$0xff] }
 0x9cf   :  { %7299 = vmatprep.subr.mxu0 %v10910_v32  ;;  %7318 = vmatprep.subr.mxu1 %v10910_v32 }
 0x9d0   :  { %7300 = vmatpush3.msra.mxu0 %v9751_v58  ;;  %7319 = vmatpush3.msra.mxu1 %v9757_v60  ;;  %v11086_v58 = vld [vmem:[#allocation24_spill] sm:$0xff] }
 0x9d1   :  { %7301 = vmatprep.subr.mxu0 %v10910_v32  ;;  %7320 = vmatprep.subr.mxu1 %v10910_v32  ;;  %v11087_v60 = vld [vmem:[#allocation36_spill] sm:$0xff] }
 0x9d2   :  { %7302 = vmatpush3.msra.mxu0 %v9765_v61  ;;  %7321 = vmatpush3.msra.mxu1 %v9771_v62  ;;  %v11088_v61 = vld [vmem:[#allocation25_spill] sm:$0xff]  ;;  %v11089_v62 = vld [vmem:[#allocation15_spill] sm:$0xff] }
 0x9d3   :  { %7303 = vmatprep.subr.mxu0 %v10910_v32  ;;  %7322 = vmatprep.subr.mxu1 %v10910_v32 }
 0x9d4   :  { %7304 = vmatpush3.msra.mxu0 %v9779_v63  ;;  %7323 = vmatpush3.msra.mxu1 %v9785_v0  ;;  %v11090_v63 = vld [vmem:[#allocation26_spill] sm:$0xff]  ;;  %v11091_v0 = vld [vmem:[#allocation37_spill] sm:$0xff] }
 0x9d5   :  { %7305 = vmatprep.subr.mxu0 %v10910_v32  ;;  %7324 = vmatprep.subr.mxu1 %v10910_v32 }
 0x9d6   :  { %7306 = vmatpush3.msra.mxu0 %v9793_v1  ;;  %7325 = vmatpush3.msra.mxu1 %v9799_v3  ;;  %v11092_v1 = vld [vmem:[#allocation38_spill] sm:$0xff]  ;;  %v11093_v3 = vld [vmem:[#allocation39_spill] sm:$0xff] }
 0x9d7   :  { %7307 = vmatprep.subr.mxu0 %v10910_v32  ;;  %7326 = vmatprep.subr.mxu1 %v10910_v32 }
 0x9d8   :  { %7308 = vmatpush3.msra.mxu0 %v9807_v6  ;;  %7327 = vmatpush3.msra.mxu1 %v9813_v7  ;;  %v11094_v6 = vld [vmem:[#allocation40_spill] sm:$0xff]  ;;  %v11095_v7 = vld [vmem:[#allocation41_spill] sm:$0xff] }
 0x9d9   :  { %7309 = vmatprep.subr.mxu0 %v10910_v32  ;;  %7328 = vmatprep.subr.mxu1 %v10910_v32 }
 0x9da   :  { %7310 = vmatpush3.msra.mxu0 %v9821_v16  ;;  %7311 = vmatprep.mubr.msk.f32.mxu0 %vm7831_vm2, %v10910_v32  ;;  %v11096_v16 = vld [vmem:[#allocation42_spill] sm:$0xff] }
 0x9db   :  { %7329 = vmatpush3.msra.mxu1 %v9829_v30  ;;  %7330 = vmatprep.mubr.msk.f32.mxu1 %vm7831_vm2, %v10910_v32  ;;  %v11097_v30 = vld [vmem:[#allocation43_spill] sm:$0xff] }
 0x9dc   :  { %7312 = vmatmul.mubr.msk.f32.vlgmr.msra.gmra.mxu0 %vm680_vm4, %v10345_v34  ;;  %7331 = vmatmul.mubr.msk.f32.vlgmr.msra.gmra.mxu1 %vm680_vm4, %v10345_v34 }
 0x9dd   :  { %7333 = vmatprep.subr.mxu0 %v10910_v32  ;;  %7349 = vmatprep.mubr.msk.f32.mxu0 %vm7831_vm2, %v10910_v32 }
 0x9de   :  { %7334 = vmatpush3.msra.mxu0 %v9844_v47  ;;  %7352 = vmatprep.subr.mxu1 %v10910_v32 }
 0x9df   :  { %7335 = vmatprep.subr.mxu0 %v10910_v32  ;;  %7353 = vmatpush3.msra.mxu1 %v9852_v49 }
 0x9e0   :  { %7336 = vmatpush3.msra.mxu0 %v9858_v41  ;;  %7354 = vmatprep.subr.mxu1 %v10910_v32  ;;  %v10576_v41 = vld [vmem:[%s10727_s6] ss:$0 sm:$0xff] }
 0x9e1   :  { %7337 = vmatprep.subr.mxu0 %v10910_v32  ;;  %7355 = vmatpush3.msra.mxu1 %v9866_v28 }
 0x9e2   :  { %7338 = vmatpush3.msra.mxu0 %v9872_v24  ;;  %7356 = vmatprep.subr.mxu1 %v10910_v32 }
 0x9e3   :  { %7339 = vmatprep.subr.mxu0 %v10910_v32  ;;  %7357 = vmatpush3.msra.mxu1 %v11044_v42 }
 0x9e4   :  { %7340 = vmatpush3.msra.mxu0 %v11045_v14  ;;  %7358 = vmatprep.subr.mxu1 %v10910_v32 }
 0x9e5   :  { %7341 = vmatprep.subr.mxu0 %v10910_v32  ;;  %7359 = vmatpush3.msra.mxu1 %v11046_v9  ;;  %v10582_v9 = vld [vmem:[%s10727_s6 + $0x1] ss:$0 sm:$0xff] }
 0x9e6   :  { %7342 = vmatpush3.msra.mxu0 %v11047_v17  ;;  %7360 = vmatprep.subr.mxu1 %v10910_v32 }
 0x9e7   :  { %7343 = vmatprep.subr.mxu0 %v10910_v32  ;;  %7361 = vmatpush3.msra.mxu1 %v11048_v15 }
 0x9e8   :  { %7344 = vmatpush3.msra.mxu0 %v11049_v29  ;;  %7362 = vmatprep.subr.mxu1 %v10910_v32 }
 0x9e9   :  { %7345 = vmatprep.subr.mxu0 %v10910_v32  ;;  %7363 = vmatpush3.msra.mxu1 %v11050_v10 }
 0x9ea   :  { %7346 = vmatpush3.msra.mxu0 %v11051_v25  ;;  %7364 = vmatprep.subr.mxu1 %v10910_v32 }
 0x9eb   :  { %7347 = vmatprep.subr.mxu0 %v10910_v32  ;;  %7365 = vmatpush3.msra.mxu1 %v11052_v2 }
 0x9ec   :  { %7348 = vmatpush3.msra.mxu0 %v11053_v12  ;;  %7366 = vmatprep.subr.mxu1 %v10910_v32 }
 0x9ed   :  { %7350 = vmatmul.mubr.msk.f32.vlgmr.msra.gmra.mxu0 %vm680_vm4, %v10345_v34  ;;  %7387 = vmatprep.subr.mxu0 %v10910_v32 }
 0x9ee   :  { %7388 = vmatpush3.msra.mxu0 %v11054_v21  ;;  %7367 = vmatpush3.msra.mxu1 %v11055_v35 }
 0x9ef   :  { %7389 = vmatprep.subr.mxu0 %v10910_v32  ;;  %7368 = vmatprep.subr.mxu1 %v10910_v32 }
 0x9f0   :  { %7390 = vmatpush3.msra.mxu0 %v11056_v33  ;;  %7369 = vmatpush3.msra.mxu1 %v11057_v8  ;;  %v10588_v8 = vld [vmem:[%s10731_s10] ss:$0 sm:$0xff] }
 0x9f1   :  { %7391 = vmatprep.subr.mxu0 %v10910_v32  ;;  %7370 = vmatprep.subr.mxu1 %v10910_v32 }
 0x9f2   :  { %7392 = vmatpush3.msra.mxu0 %v11058_v27  ;;  %7371 = vmatpush3.msra.mxu1 %v11059_v11 }
 0x9f3   :  { %7393 = vmatprep.subr.mxu0 %v10910_v32  ;;  %7372 = vmatprep.subr.mxu1 %v10910_v32 }
 0x9f4   :  { %7394 = vmatpush3.msra.mxu0 %v11060_v13  ;;  %7373 = vmatpush3.msra.mxu1 %v11061_v19  ;;  %v10594_v13 = vld [vmem:[%s10729_s8] ss:$0 sm:$0xff] }
 0x9f5   :  { %7395 = vmatprep.subr.mxu0 %v10910_v32  ;;  %7374 = vmatprep.subr.mxu1 %v10910_v32 }
 0x9f6   :  { %7396 = vmatpush3.msra.mxu0 %v11062_v23  ;;  %7375 = vmatpush3.msra.mxu1 %v11082_v4 }
 0x9f7   :  { %7397 = vmatprep.subr.mxu0 %v10910_v32  ;;  %7376 = vmatprep.subr.mxu1 %v10910_v32 }
 0x9f8   :  { %7398 = vmatpush3.msra.mxu0 %v11083_v53  ;;  %7377 = vmatpush3.msra.mxu1 %v11084_v55 }
 0x9f9   :  { %7399 = vmatprep.subr.mxu0 %v10910_v32  ;;  %7378 = vmatprep.subr.mxu1 %v10910_v32 }
 0x9fa   :  { %7400 = vmatpush3.msra.mxu0 %v11085_v57  ;;  %7379 = vmatpush3.msra.mxu1 %v11086_v58 }
 0x9fb   :  { %7401 = vmatprep.subr.mxu0 %v10910_v32  ;;  %7380 = vmatprep.subr.mxu1 %v10910_v32 }
 0x9fc   :  { %7402 = vmatpush3.msra.mxu0 %v11087_v60  ;;  %7381 = vmatpush3.msra.mxu1 %v11088_v61  ;;  %v4598_v61 = vld [vmem:[#allocation3 + $0xe] sm:$0x3] }
 0x9fd   :  { %7403 = vmatprep.subr.mxu0 %v10910_v32  ;;  %7382 = vmatprep.subr.mxu1 %v10910_v32 }
 0x9fe   :  { %7404 = vmatpush3.msra.mxu0 %v11089_v62  ;;  %7383 = vmatpush3.msra.mxu1 %v11090_v63 }
 0x9ff   :  { %7405 = vmatprep.subr.mxu0 %v10910_v32  ;;  %7384 = vmatprep.mubr.msk.f32.mxu1 %vm7831_vm2, %v10910_v32 }
 0xa00   :  { %7406 = vmatpush3.msra.mxu0 %v11091_v0  ;;  %7419 = vmatprep.mubr.msk.f32.mxu0 %vm7831_vm2, %v10910_v32 }
 0xa01   :  { %7407 = vmatprep.subr.mxu0 %v10910_v32  ;;  %7422 = vmatprep.subr.mxu1 %v10910_v32 }
 0xa02   :  { %7408 = vmatpush3.msra.mxu0 %v11092_v1 }
 0xa03   :  { %7409 = vmatprep.subr.mxu0 %v10910_v32 }
 0xa04   :  { %7410 = vmatpush3.msra.mxu0 %v11093_v3 }
 0xa05   :  { %7411 = vmatprep.subr.mxu0 %v10910_v32 }
 0xa06   :  { %7412 = vmatpush3.msra.mxu0 %v11094_v6 }
 0xa07   :  { %7413 = vmatprep.subr.mxu0 %v10910_v32 }
 0xa08   :  { %7414 = vmatpush3.msra.mxu0 %v11095_v7 }
 0xa09   :  { %7415 = vmatprep.subr.mxu0 %v10910_v32 }
 0xa0a   :  { %7416 = vmatpush3.msra.mxu0 %v11096_v16 }
 0xa0b   :  { %7417 = vmatprep.subr.mxu0 %v10910_v32 }
 0xa0c   :  { %7418 = vmatpush3.msra.mxu0 %v11097_v30 }
 0xa0d   :  { %7441 = vmatprep.subr.mxu0 %v10910_v32 }
 0xa79   :  { %v4283_v47 = vpop.f32.mrf.mxu0  ;;  %v4359_v49 = vpop.f32.mrf.mxu1 }
 0xa7a   :  { %v4284_v28 = vadd.f32 %v10576_v41, %v4283_v47  ;;  %v4360_v17 = vadd.f32 %v10582_v9, %v4359_v49 }
 0xa7b   :  { %v7221_v24 = vpop.f32.mrf.mxu0  ;;  %v7256_v42 = vpop.f32.mrf.mxu1 }
 0xa7c   :  { %v5405_v14 = vmul.f32 -1.442695, %v4284_v28  ;;  %v5406_v15 = vmul.f32 -1.442695, %v4360_v17 }
 0xa7e   :  { %7616 = vpow2.f32 %v5405_v14 }
 0xa7f   :  { %7618 = vpow2.f32 %v5406_v15 }
 0xa8a   :  { %v4438_v29 = vpop.f32.mrf.mxu0  ;;  %v4510_v10 = vpop.f32.mrf.mxu1 }
 0xa8b   :  { %v7617_v25 = vpop.eup %7616  ;;  %v4511_v27 = vadd.f32 %v10588_v8, %v4510_v10  ;;  %v4439_v19 = vadd.f32 %v10594_v13, %v4438_v29 }
 0xa8c   :  { %v4290_v2 = vadd.f32 1.0, %v7617_v25  ;;  %v7275_v12 = vpop.f32.mrf.mxu0  ;;  %v7294_v21 = vpop.f32.mrf.mxu1 }
 0xa8d   :  { %v7619_v35 = vpop.eup %7618 }
 0xa8e   :  { %7620 = vrcp.f32 %v4290_v2  ;;  %v4366_v33 = vadd.f32 1.0, %v7619_v35 }
 0xa90   :  { %7622 = vrcp.f32 %v4366_v33 }
 0xa9b   :  { %v7621_v11 = vpop.eup %7620 }
 0xa9c   :  { %v4514_v23 = vmul.f32 %v7621_v11, %v4511_v27  ;;  %v4591_v18 = vpop.f32.mrf.mxu0  ;;  %v4665_v4 = vpop.f32.mrf.mxu1  ;;  %v5075_v11 = vld [vmem:[#allocation5 + $0x4] sm:$0x3] }
 0xa9d   :  { %v4595_v53 = vadd.f32 %v4591_v18, %v4524_v54  ;;  %v4669_v63 = vadd.f32 %v4665_v4, %v4598_v61  ;;  %v7623_v1 = vpop.eup %7622 }
 0xa9e   :  { %v4515_v55 = vadd.f32 %v4514_v23, %v4439_v19  ;;  %v7313_v57 = vpop.f32.mrf.mxu0  ;;  %v7332_v58 = vpop.f32.mrf.mxu1  ;;  %v4517_v6 = vsub.f32 1.0, %v7623_v1  ;;  %v4519_v47 = vmul.f32 %v7623_v1, %v10332_v44  ;;  %v4754_v44 = vld [vmem:[#allocation4 + $0xe] sm:$0x3] }
 0xa9f   :  { %v4596_v60 = vadd.f32 %v10322_v5, %v4595_v53  ;;  %v4670_v0 = vadd.f32 %v10328_v56, %v4669_v63 }
 0xaa0   :  { %7624 = vtanh.f32 %v4515_v55 }
 0xaa1   :  { %v5412_v62 = vmul.f32 -1.442695, %v4596_v60  ;;  %v5413_v3 = vmul.f32 -1.442695, %v4670_v0 }
 0xaa3   :  { %7626 = vpow2.f32 %v5412_v62 }
 0xaa4   :  { %7628 = vpow2.f32 %v5413_v3 }
 0xaad   :  { %v7625_v7 = vpop.eup %7624  ;;  %v4737_v16 = vpop.f32.mrf.mxu0 }
 0xaae   :  { %v4518_v30 = vmul.f32 %v7625_v7, %v4517_v6  ;;  %v4738_v14 = vadd.f32 %v10341_v52, %v4737_v16  ;;  %v5076_v52 = vld [vmem:[#allocation5 + $0x6] sm:$0x3] }
 0xaaf   :  { %v7351_v49 = vpop.f32.mrf.mxu0  ;;  %v5084_v19 = vmax.f32 %v5076_v52, 0.0 }
 0xab0   :  { %v7627_v28 = vpop.eup %7626  ;;  %v10600_v24 = vadd.f32 %v4519_v47, %v4518_v30 }
 0xab1   :  { %v4744_v5 = vadd.f32 1.0, %v7627_v28  ;;  %v7629_v56 = vpop.eup %7628 }
 0xab2   :  { %4763 = vrot.lane.b32.xlu0 %v10600_v24, %s7832_s22  ;;  %4522 = vst.msk [vmem:[#allocation5 + $0xc] sm:$0x3] %vm251_vm3, %v10600_v24  ;;  %v4750_v42 = vadd.f32 1.0, %v7629_v56 }
 0xab3   :  { %7630 = vrcp.f32 %v4744_v5 }
 0xab4   :  { %7632 = vrcp.f32 %v4750_v42 }
 0xac0   :  { %v7631_v17 = vpop.eup %7630 }
 0xac1   :  { %v4755_v15 = vmul.f32 %v7631_v17, %v4738_v14  ;;  %v7633_v10 = vpop.eup %7632  ;;  %v5078_v17 = vld [vmem:[#allocation5 + $0xa] sm:$0x3] }
 0xac2   :  { %v4758_v25 = vsub.f32 1.0, %v7633_v10  ;;  %v4760_v21 = vmul.f32 %v7633_v10, %v10345_v34  ;;  %v5074_v34 = vld [vmem:[#allocation5 + $0x2] sm:$0x3] }
 0xac3   :  { %v4756_v29 = vadd.f32 %v4755_v15, %v4754_v44  ;;  %v5077_v15 = vld [vmem:[#allocation5 + $0x8] sm:$0x3]  ;;  %v5086_v44 = vmax.f32 %v5078_v17, 0.0 }
 0xac5   :  { %7634 = vtanh.f32 %v4756_v29  ;;  %v5085_v29 = vmax.f32 %v5077_v15, 0.0 }
 0xad2   :  { %v7635_v2 = vpop.eup %7634 }
 0xad3   :  { %v4759_v12 = vmul.f32 %v7635_v2, %v4758_v25  ;;  %v5124_v2 = vcombine.low %v5085_v29, %v5086_v44 }
 0xad5   :  { %v4761_v35 = vadd.f32 %v4760_v21, %v4759_v12 }
 0xb24   :  { %v4764_v33 = vpop.permute.xlu0 %4763 }
 0xb25   :  { %v4766_v27 = vsel %vm680_vm4, %v4761_v35, %v4764_v33 }
 0xb26   :  { %7385 = vmatmul.mubr.f32.vlgmr.msra.gmra.mxu1 %v4766_v27  ;;  %7420 = vmatmul.mubr.f32.vlgmr.msra.gmra.mxu0 %v4766_v27 }
 0xb27   :  { %7423 = vmatpush3.msra.mxu1 %v10352_v38  ;;  %7442 = vmatpush3.msra.mxu0 %v10355_v20  ;;  %v5073_v38 = vld [vmem:[#allocation5] sm:$0x3]  ;;  %v5082_v20 = vmax.f32 %v5074_v34, 0.0 }
 0xb28   :  { %7424 = vmatprep.subr.mxu1 %v10910_v32  ;;  %7443 = vmatprep.subr.mxu0 %v10910_v32 }
 0xb29   :  { %7425 = vmatpush3.msra.mxu1 %v10363_v40  ;;  %7444 = vmatpush3.msra.mxu0 %v10366_v43  ;;  %v5083_v40 = vmax.f32 %v5075_v11, 0.0  ;;  %v5081_v43 = vmax.f32 %v5073_v38, 0.0 }
 0xb2a   :  { %7426 = vmatprep.subr.mxu1 %v10910_v32  ;;  %7445 = vmatprep.subr.mxu0 %v10910_v32 }
 0xb2b   :  { %7427 = vmatpush3.msra.mxu1 %v10374_v45  ;;  %7446 = vmatpush3.msra.mxu0 %v10377_v22  ;;  %v5108_v23 = vcombine.low %v5083_v40, %v5084_v19  ;;  %v5107_v45 = vcombine.low %v5081_v43, %v5082_v20  ;;  %v11098_v22 = vld [vmem:[#allocation10_spill] sm:$0xff] }
 0xb2c   :  { %7428 = vmatprep.subr.mxu1 %v10910_v32  ;;  %7447 = vmatprep.subr.mxu0 %v10910_v32  ;;  %v5132_v21 = vrot.slane %v5124_v2, %v11098_v22 }
 0xb2d   :  { %7429 = vmatpush3.msra.mxu1 %v10385_v39  ;;  %7448 = vmatpush3.msra.mxu0 %v10388_v51  ;;  %v5122_v39 = vrot.slane %v5108_v23, %v11098_v22  ;;  %v5115_v51 = vrot.slane %v5107_v45, %v11098_v22 }
 0xb2e   :  { %7430 = vmatprep.subr.mxu1 %v10910_v32  ;;  %7449 = vmatprep.subr.mxu0 %v10910_v32 }
 0xb2f   :  { %7431 = vmatpush3.msra.mxu1 %v10396_v37  ;;  %7450 = vmatpush3.msra.mxu0 %v10399_v46  ;;  %v5123_v37 = vcombine.low %v5115_v51, %v5122_v39  ;;  %v5096_v46 = vld [vmem:[%s10732_s11 + $0x38] sm:$0xff] }
 0xb30   :  { %7432 = vmatprep.subr.mxu1 %v10910_v32  ;;  %7451 = vmatprep.subr.mxu0 %v10910_v32 }
 0xb31   :  { %7433 = vmatpush3.msra.mxu1 %v10407_v59  ;;  %7452 = vmatpush3.msra.mxu0 %v10410_v50  ;;  %v5095_v59 = vld [vmem:[%s10732_s11 + $0x30] sm:$0xff]  ;;  %v5093_v50 = vld [vmem:[%s10732_s11 + $0x20] sm:$0xff] }
 0xb32   :  { %7434 = vmatprep.subr.mxu1 %v10910_v32  ;;  %7453 = vmatprep.subr.mxu0 %v10910_v32 }
 0xb33   :  { %7435 = vmatpush3.msra.mxu1 %v10418_v26  ;;  %7454 = vmatpush3.msra.mxu0 %v10421_v48  ;;  %v5092_v26 = vld [vmem:[%s10732_s11 + $0x18] sm:$0xff]  ;;  %v5091_v48 = vld [vmem:[%s10732_s11 + $0x10] sm:$0xff] }
 0xb34   :  { %7436 = vmatprep.subr.mxu1 %v10910_v32  ;;  %7455 = vmatprep.subr.mxu0 %v10910_v32 }
 0xb35   :  { %7437 = vmatpush3.msra.mxu1 %v10429_v31  ;;  %7438 = vmatprep.mubr.msk.f32.mxu1 %vm7831_vm2, %v10910_v32  ;;  %v5090_v31 = vld [vmem:[%s10732_s11 + $0x8] sm:$0xff] }
 0xb36   :  { %7456 = vmatpush3.msra.mxu0 %v10434_v36  ;;  %7457 = vmatprep.mubr.msk.f32.mxu0 %vm7831_vm2, %v10910_v32  ;;  %v5094_v32 = vld [vmem:[%s10732_s11 + $0x28] sm:$0xff]  ;;  %v5089_v36 = vld [vmem:[%s10732_s11] sm:$0xff] }
 0xb37   :  { %7439 = vmatmul.mubr.msk.f32.vlgmr.msra.gmra.mxu1 %vm680_vm4, %v4761_v35  ;;  %7458 = vmatmul.mubr.msk.f32.vlgmr.msra.gmra.mxu0 %vm680_vm4, %v10600_v24 }
 0xb38   :  { %7476 = vmatprep.mubr.msk.f32.mxu1 %vm680_vm4, %v5123_v37  ;;  %7460 = vmatprep.subr.mxu1 %v5096_v46 }
 0xb39   :  { %7461 = vmatpush3.msra.mxu1 %v5096_v46 }
 0xb3a   :  { %7462 = vmatprep.subr.mxu1 %v5095_v59 }
 0xb3b   :  { %7463 = vmatpush3.msra.mxu1 %v5095_v59 }
 0xb3c   :  { %7464 = vmatprep.subr.mxu1 %v5094_v32 }
 0xb3d   :  { %7465 = vmatpush3.msra.mxu1 %v5094_v32 }
 0xb3e   :  { %7466 = vmatprep.subr.mxu1 %v5093_v50 }
 0xb3f   :  { %7467 = vmatpush3.msra.mxu1 %v5093_v50 }
 0xb40   :  { %7468 = vmatprep.subr.mxu1 %v5092_v26 }
 0xb41   :  { %7469 = vmatpush3.msra.mxu1 %v5092_v26 }
 0xb42   :  { %7470 = vmatprep.subr.mxu1 %v5091_v48 }
 0xb43   :  { %7471 = vmatpush3.msra.mxu1 %v5091_v48 }
 0xb44   :  { %7472 = vmatprep.subr.mxu1 %v5090_v31 }
 0xb45   :  { %7473 = vmatpush3.msra.mxu1 %v5090_v31 }
 0xb46   :  { %7474 = vmatprep.subr.mxu1 %v5089_v36 }
 0xb47   :  { %7475 = vmatpush3.msra.mxu1 %v5089_v36 }
 0xbe6   :  { %v4833_v54 = vpop.f32.mrf.mxu1  ;;  %v4909_v18 = vpop.f32.mrf.mxu0 }
 0xbe7   :  { %v4834_v4 = vadd.f32 %v10576_v41, %v4833_v54  ;;  %v4910_v58 = vadd.f32 %v10582_v9, %v4909_v18 }
 0xbe8   :  { %v7386_v53 = vpop.f32.mrf.mxu1  ;;  %v7421_v55 = vpop.f32.mrf.mxu0 }
 0xbe9   :  { %v5414_v57 = vmul.f32 -1.442695, %v4834_v4  ;;  %v5415_v60 = vmul.f32 -1.442695, %v4910_v58 }
 0xbeb   :  { %7636 = vpow2.f32 %v5414_v57 }
 0xbec   :  { %7638 = vpow2.f32 %v5415_v60 }
 0xbf7   :  { %v4988_v61 = vpop.f32.mrf.mxu1  ;;  %v5060_v62 = vpop.f32.mrf.mxu0 }
 0xbf8   :  { %v7637_v63 = vpop.eup %7636  ;;  %v5061_v16 = vadd.f32 %v10588_v8, %v5060_v62  ;;  %v4989_v30 = vadd.f32 %v10594_v13, %v4988_v61  ;;  %v5079_v8 = vld [vmem:[#allocation5 + $0xc] sm:$0x3] }
 0xbf9   :  { %v4840_v0 = vadd.f32 1.0, %v7637_v63  ;;  %v7440_v1 = vpop.f32.mrf.mxu1  ;;  %v7459_v3 = vpop.f32.mrf.mxu0  ;;  %v5087_v25 = vmax.f32 %v5079_v8, 0.0 }
 0xbfa   :  { %v7639_v6 = vpop.eup %7638 }
 0xbfb   :  { %7640 = vrcp.f32 %v4840_v0  ;;  %v4916_v7 = vadd.f32 1.0, %v7639_v6 }
 0xbfd   :  { %7642 = vrcp.f32 %v4916_v7 }
 0xc08   :  { %v7641_v41 = vpop.eup %7640 }
 0xc09   :  { %v5064_v47 = vmul.f32 %v7641_v41, %v5061_v16 }
 0xc0a   :  { %v7643_v9 = vpop.eup %7642 }
 0xc0b   :  { %v5065_v49 = vadd.f32 %v5064_v47, %v4989_v30  ;;  %v5067_v28 = vsub.f32 1.0, %v7643_v9  ;;  %v5069_v56 = vmul.f32 %v7643_v9, %v10600_v24  ;;  %v5098_v24 = vstv %s10733_s12 }
 0xc0d   :  { %7644 = vtanh.f32 %v5065_v49 }
 0xc1a   :  { %v7645_v5 = vpop.eup %7644 }
 0xc1b   :  { %v5068_v42 = vmul.f32 %v7645_v5, %v5067_v28 }
 0xc1d   :  { %v5070_v14 = vadd.f32 %v5069_v56, %v5068_v42 }
 0xc1f   :  { %5072 = vst.msk [vmem:[#allocation5 + $0xe] sm:$0x3] %vm251_vm3, %v5070_v14 }
 0xc26   :  { %v5080_v10 = vld [vmem:[#allocation5 + $0xe] sm:$0x3] }
 0xc27   :  { %v5088_v13 = vmax.f32 %v5080_v10, 0.0 }
 0xc29   :  { %v5125_v12 = vcombine.low %v5087_v25, %v5088_v13 }
 0xc2b   :  { %v5139_v35 = vrot.slane %v5125_v12, %v11098_v22 }
 0xc2d   :  { %v5140_v33 = vcombine.low %v5132_v21, %v5139_v35 }
 0xc2f   :  { %7477 = vmatmul.mubr.msk.f32.vlgmr.msra.gmra.mxu1 %vm680_vm4, %v5140_v33 }
 0xcef   :  { %v7478_v27 = vpop.f32.mrf.mxu1 }
 0xcf0   :  { %v5217_v52 = vadd.f32 %v7478_v27, %v5098_v24 }
 0xcf1   :  { %v5211_v34 = vpop.f32.mrf.mxu1 }
 0xcf2   :  { %v5239_v11 = vcombine.high %v5217_v52, %v5217_v52  ;;  %v5246_v19 = vrot.slane %v5217_v52, %v11098_v22  ;;  %v5212_v38 = vadd.f32 %v5211_v34, %v5098_v24 }
 0xcf4   :  { %v5253_v20 = vrot.slane %v5239_v11, %v11098_v22  ;;  %v5254_v40 = vcombine.high %v5246_v19, %v5246_v19  ;;  %5269 = vst.msk [vmem:[%s10734_s13 + $0x8] sm:$0x3] %vm5264_vm5, %v5246_v19  ;;  %v5222_v43 = vcombine.high %v5212_v38, %v5212_v38  ;;  %v5229_v23 = vrot.slane %v5212_v38, %v11098_v22 }
 0xcf6   :  { %v5255_v45 = vcombine.high %v5253_v20, %v5253_v20  ;;  %5270 = vst.msk [vmem:[%s10734_s13 + $0xa] sm:$0x3] %vm5264_vm5, %v5254_v40  ;;  %5271 = vst.msk [vmem:[%s10734_s13 + $0xc] sm:$0x3] %vm5264_vm5, %v5253_v20  ;;  %v5236_v39 = vrot.slane %v5222_v43, %v11098_v22  ;;  %v5237_v51 = vcombine.high %v5229_v23, %v5229_v23 }
 0xcf7   :  { %5265 = vst.msk [vmem:[%s10734_s13] sm:$0x3] %vm5264_vm5, %v5229_v23 }
 0xcf8   :  { %5272 = vst.msk [vmem:[%s10734_s13 + $0xe] sm:$0x3] %vm5264_vm5, %v5255_v45  ;;  %v5238_v37 = vcombine.high %v5236_v39, %v5236_v39  ;;  %5266 = vst.msk [vmem:[%s10734_s13 + $0x2] sm:$0x3] %vm5264_vm5, %v5237_v51 }
 0xcf9   :  { %5267 = vst.msk [vmem:[%s10734_s13 + $0x4] sm:$0x3] %vm5264_vm5, %v5236_v39 }
 0xcfa   :  { %5268 = vst.msk [vmem:[%s10734_s13 + $0x6] sm:$0x3] %vm5264_vm5, %v5238_v37 }
 0xcfb   :  { %5277 = vsyncpa [#allocation8], 1 }

</bundles_post_ra>
